<compile_context>
chip_gen: v6e
topology: v6e:2x2x1
jax: 0.10.0
libtpu: 0.0.40
codegen_flags: <defaults>
</compile_context>

<pallas_src>
import functools
import math

import jax
import jax.numpy as jnp
from jax.experimental import pallas as pl
from jax.experimental.pallas import tpu as pltpu


def _encoder_layer_kernel(
    x_ref,      # (Bt, S, D)  fp32 input tokens for this batch block
    bias_ref,   # (Bt, 1, S)  fp32 additive key-padding bias (0 or -1e9)
    wqkv_ref,   # (D, 3D)     compute dtype (1/sqrt(hd) pre-folded into Q cols)
    bqkv_ref,   # (1, 3D)     fp32 (Q part pre-scaled)
    wout_ref,   # (D, D)      compute dtype
    bout_ref,   # (1, D)      fp32
    w1_ref,     # (D, F)      compute dtype
    b1_ref,     # (1, F)      fp32
    w2_ref,     # (F, D)      compute dtype
    b2_ref,     # (1, D)      fp32
    g1_ref,     # (1, D)      fp32 norm1 weight
    be1_ref,    # (1, D)      fp32 norm1 bias
    g2_ref,     # (1, D)      fp32 norm2 weight
    be2_ref,    # (1, D)      fp32 norm2 bias
    o_ref,      # (Bt, S, D)
    *,
    nhead: int,
    eps: float,
    compute_dtype,
    kv_block: int,
    approx_recip: bool,
):
    Bt, S, D = x_ref.shape
    hd = D // nhead
    f32 = jnp.float32

    x3 = x_ref[...]                            # (Bt, S, D) fp32 (kept for residual)
    x2 = x3.reshape(Bt * S, D)
    xc = x2.astype(compute_dtype)

    # ---- fused QKV projection: one MXU matmul over Bt*S rows, fp32 acc ----
    qkv = jnp.dot(xc, wqkv_ref[...], preferred_element_type=f32) + bqkv_ref[0]
    qkv3 = qkv.reshape(Bt, S, 3 * D)           # leading-dim split only

    bias = bias_ref[...]                       # (Bt, 1, S) fp32, loaded once

    kvb = min(kv_block, S)
    n_kv = (S + kvb - 1) // kvb                # static

    # ---- per-head attention, head merge folded into the output projection ----
    attn_acc = jnp.zeros((Bt * S, D), f32)
    for h in range(nhead):                     # static loop; slices are layout plumbing
        lo = h * hd
        q_h = qkv3[:, :, lo:lo + hd].astype(compute_dtype)              # (Bt,S,hd)
        k_h = qkv3[:, :, D + lo:D + lo + hd].astype(compute_dtype)
        v_h = qkv3[:, :, 2 * D + lo:2 * D + lo + hd].astype(compute_dtype)

        if n_kv == 1:
            # Single-pass softmax (short S): one (Bt, S, S) fp32 block live.
            s = jnp.einsum("bqd,bkd->bqk", q_h, k_h,
                           preferred_element_type=f32) + bias
            m = jnp.max(s, axis=-1, keepdims=True)
            p = jnp.exp(s - m)
            denom = jnp.sum(p, axis=-1, keepdims=True)
            inv = pl.reciprocal(denom, approx=True) if approx_recip else 1.0 / denom
            ctx = jnp.einsum("bqk,bkd->bqd", (p * inv).astype(compute_dtype),
                             v_h, preferred_element_type=f32)            # (Bt,S,hd)
        else:
            # Flash-style online softmax over KV blocks: only a (Bt, S, kvb)
            # score block is live at any time -> no S^2 VMEM cliff.
            m_i = jnp.full((Bt, S, 1), -jnp.inf, f32)
            l_i = jnp.zeros((Bt, S, 1), f32)
            acc = jnp.zeros((Bt, S, hd), f32)
            for kb in range(n_kv):             # static; small trip count
                k0 = kb * kvb
                k1 = min(S, k0 + kvb)
                s = jnp.einsum("bqd,bkd->bqk", q_h, k_h[:, k0:k1, :],
                               preferred_element_type=f32) + bias[:, :, k0:k1]
                m_new = jnp.maximum(m_i, jnp.max(s, axis=-1, keepdims=True))
                a = jnp.exp(m_i - m_new)
                p = jnp.exp(s - m_new)
                l_i = a * l_i + jnp.sum(p, axis=-1, keepdims=True)
                acc = a * acc + jnp.einsum("bqk,bkd->bqd",
                                           p.astype(compute_dtype),
                                           v_h[:, k0:k1, :],
                                           preferred_element_type=f32)
                m_i = m_new
            inv = pl.reciprocal(l_i, approx=True) if approx_recip else 1.0 / l_i
            ctx = acc * inv

        # Head merge folded into the output projection: per-head matmul against
        # the matching Wout row block, fp32 accumulation (no lane concat of
        # sub-128-lane head slabs, no extra (Bt*S, D) merged buffer).
        attn_acc = attn_acc + jnp.dot(
            ctx.reshape(Bt * S, hd).astype(compute_dtype),
            wout_ref[lo:lo + hd, :], preferred_element_type=f32)

    attn_out = attn_acc + bout_ref[0]
    src = x2 + attn_out                                    # dropout1 = identity

    # ---- residual + LayerNorm1 (fp32 elementwise) ----
    mu = jnp.mean(src, axis=-1, keepdims=True)
    var = jnp.mean(jnp.square(src - mu), axis=-1, keepdims=True)
    src_n = (src - mu) * jax.lax.rsqrt(var + eps) * g1_ref[0] + be1_ref[0]

    # ---- feed-forward + residual + LayerNorm2 ----
    h1 = jnp.dot(src_n.astype(compute_dtype), w1_ref[...],
                 preferred_element_type=f32) + b1_ref[0]
    h1 = jnp.maximum(h1, 0.0)                              # relu
    ffn = jnp.dot(h1.astype(compute_dtype), w2_ref[...],
                  preferred_element_type=f32) + b2_ref[0]
    src2 = src_n + ffn                                     # dropout/dropout2 = identity

    mu2 = jnp.mean(src2, axis=-1, keepdims=True)
    var2 = jnp.mean(jnp.square(src2 - mu2), axis=-1, keepdims=True)
    out = (src2 - mu2) * jax.lax.rsqrt(var2 + eps) * g2_ref[0] + be2_ref[0]

    o_ref[...] = out.reshape(Bt, S, D).astype(o_ref.dtype)


def _vmem_cap_bytes():
    """Usable VMEM: 7/8 of the physical per-core capacity for this generation
    (~56 MiB on v7x, ~112 MiB on v5e/v6e), leaving headroom for compiler
    scratch and semaphores."""
    phys = 64 << 20                      # conservative default (v7x per-TC)
    try:
        phys = int(pltpu.get_tpu_info().vmem_capacity_bytes)
    except Exception:
        pass
    return (phys * 7) // 8


def _vmem_budget_bytes(block_b, S, D, F, nhead, compute_itemsize, kv_block):
    """Footprint estimate for one grid step.  Weights are counted once (the
    constant blocks are single-buffered); input/output token blocks are
    double-buffered by the pipeline."""
    hd = D // nhead
    kvb = min(kv_block, S)
    weights = (3 * D * D + D * D + 2 * D * F) * compute_itemsize
    weights += (3 * D + 2 * D + F + 4 * D) * 4               # biases + LN params
    rows = block_b * S
    act = rows * 4 * (
        2 * D        # x input block (2 pipeline buffers)
        + 2 * D      # output block  (2 pipeline buffers)
        + 3 * D      # fused qkv
        + 5 * hd     # per-head q/k/v + ctx / online accumulator
        + 3 * kvb    # per-head, per-kv-block scores / exp / probs
        + D          # attention output accumulator
        + 4 * D      # residual / layernorm temporaries
        + F          # ffn hidden
    )
    act += block_b * S * 4 * 2                               # bias block (2 buffers)
    return int(weights + act) + (8 << 20)


def flash_transformer_encoder_layer(
    src, key_padding_mask, params, *, nhead, eps=1e-5,
    compute_dtype=jnp.bfloat16, block_b=None, kv_block=512,
    single_buffer_weights=True):
    """src: (B, S, D) fp32; key_padding_mask: (B, S) bool, True = padded key."""
    B, S, D = src.shape
    F = params["w1"].shape[1]
    assert D % nhead == 0
    ci = jnp.dtype(compute_dtype).itemsize
    cap = _vmem_cap_bytes()

    if block_b is None:
        # Pick block_b so block_b*S (the M dim of every MXU matmul) is >= ~256
        # when VMEM allows; smallest such divisor keeps the grid largest
        # (megacore parallelism), preferring an even step count for v7x's 2 TCs.
        divs = [d for d in range(1, B + 1) if B % d == 0]
        fits = [d for d in divs
                if _vmem_budget_bytes(d, S, D, F, nhead, ci, kv_block) <= cap]
        if not fits:
            raise ValueError(
                "no batch block fits the VMEM budget; reduce kv_block or seq length")
        big = [d for d in fits if d * S >= 256]
        if big:
            even = [d for d in big if (B // d) % 2 == 0]
            block_b = min(even) if even else min(big)
        else:
            block_b = max(fits)
    assert B % block_b == 0
    nb = B // block_b

    budget = _vmem_budget_bytes(block_b, S, D, F, nhead, ci, kv_block)
    if budget > cap:
        raise ValueError(
            f"block_b={block_b} needs ~{budget >> 20} MiB VMEM "
            f"(> {cap >> 20} MiB cap); shrink block_b or kv_block")
    vmem_limit = int(max(32 << 20, min(budget, cap)))

    # Module semantics: if no position is padded, the mask is dropped entirely.
    any_pad = jnp.any(key_padding_mask)
    bias = jnp.where(
        any_pad,
        jnp.where(key_padding_mask, -1e9, 0.0).astype(jnp.float32),
        jnp.zeros((B, S), jnp.float32),
    ).reshape(B, 1, S)

    # Fold the 1/sqrt(head_dim) attention scale into the Q columns of the QKV
    # projection; store the big matmul weights in the compute dtype so the
    # (constant-index) weight DMAs move half the bytes in bf16 mode.
    scale = 1.0 / math.sqrt(D // nhead)
    wqkv = params["wqkv"].at[:, :D].multiply(scale).astype(compute_dtype)
    bqkv = params["bqkv"].at[:, :D].multiply(scale)
    wout = params["wout"].astype(compute_dtype)
    w1 = params["w1"].astype(compute_dtype)
    w2 = params["w2"].astype(compute_dtype)

    kernel = functools.partial(
        _encoder_layer_kernel, nhead=nhead, eps=eps, compute_dtype=compute_dtype,
        kv_block=kv_block,
        approx_recip=jnp.dtype(compute_dtype) != jnp.dtype(jnp.float32))

    args = (src, bias,
            wqkv, bqkv,
            wout, params["bout"],
            w1, params["b1"],
            w2, params["b2"],
            params["g1"], params["be1"],
            params["g2"], params["be2"])

    def _const_spec(shape, single_buf):
        index_map = lambda b: tuple(0 for _ in shape)
        if single_buf and hasattr(pl, "Buffered"):
            try:
                # Constant blocks are never re-fetched -> one buffer is enough;
                # this halves the weight VMEM footprint.
                return pl.BlockSpec(shape, index_map, pipeline_mode=pl.Buffered(1))
            except TypeError:
                pass
        return pl.BlockSpec(shape, index_map)

    def _call(single_buf):
        c = lambda shape: _const_spec(shape, single_buf)
        return pl.pallas_call(
            kernel,
            out_shape=jax.ShapeDtypeStruct((B, S, D), src.dtype),
            grid_spec=pltpu.PrefetchScalarGridSpec(
                num_scalar_prefetch=0,
                grid=(nb,),
                in_specs=[
                    pl.BlockSpec((block_b, S, D), lambda b: (b, 0, 0)),   # x
                    pl.BlockSpec((block_b, 1, S), lambda b: (b, 0, 0)),   # mask bias
                    c((D, 3 * D)), c((1, 3 * D)),                         # Wqkv, bqkv
                    c((D, D)), c((1, D)),                                 # Wout, bout
                    c((D, F)), c((1, F)),                                 # W1, b1
                    c((F, D)), c((1, D)),                                 # W2, b2
                    c((1, D)), c((1, D)),                                 # norm1 gamma/beta
                    c((1, D)), c((1, D)),                                 # norm2 gamma/beta
                ],
                out_specs=pl.BlockSpec((block_b, S, D), lambda b: (b, 0, 0)),
            ),
            compiler_params=pltpu.CompilerParams(
                dimension_semantics=("parallel",),
                vmem_limit_bytes=vmem_limit,
            ),
        )(*args)

    if single_buffer_weights:
        try:
            return _call(True)
        except Exception:
            # Fall back to default double-buffered constants if this JAX/Mosaic
            # build rejects single-buffering; correctness is unaffected.
            pass
    return _call(False)


def _reference(src, key_padding_mask, params, *, nhead, eps=1e-5):
    """Pure-JAX fp32 reference of the same forward pass (eval mode)."""
    B, S, D = src.shape
    hd = D // nhead
    any_pad = jnp.any(key_padding_mask)
    bias = jnp.where(any_pad,
                     jnp.where(key_padding_mask, -1e9, 0.0),
                     jnp.zeros((B, S)))[:, None, None, :]       # (B,1,1,S)

    qkv = src @ params["wqkv"] + params["bqkv"][0]
    q, k, v = jnp.split(qkv, 3, axis=-1)

    def heads(t):
        return t.reshape(B, S, nhead, hd).transpose(0, 2, 1, 3)  # (B,H,S,hd)

    q, k, v = heads(q), heads(k), heads(v)
    scores = jnp.einsum("bhqd,bhkd->bhqk", q, k) / math.sqrt(hd) + bias
    attn = jax.nn.softmax(scores, axis=-1)
    ctx = jnp.einsum("bhqk,bhkd->bhqd", attn, v).transpose(0, 2, 1, 3).reshape(B, S, D)
    attn_out = ctx @ params["wout"] + params["bout"][0]

    def ln(x, g, b):
        mu = x.mean(-1, keepdims=True)
        var = ((x - mu) ** 2).mean(-1, keepdims=True)
        return (x - mu) * jax.lax.rsqrt(var + eps) * g[0] + b[0]

    src1 = ln(src + attn_out, params["g1"], params["be1"])
    ffn = jnp.maximum(src1 @ params["w1"] + params["b1"][0], 0.0) @ params["w2"] + params["b2"][0]
    return ln(src1 + ffn, params["g2"], params["be2"])


if __name__ == "__main__":
    # Small shapes consistent with the module: batch=2, seq=8, d_model=32,
    # nhead=4, dim_feedforward=64.
    B, S, D, H, F = 2, 8, 32, 4, 64

    key = jax.random.PRNGKey(0)
    keys = jax.random.split(key, 16)

    def init(k, shape, scale=0.1):
        return jax.random.normal(k, shape, jnp.float32) * scale

    params = {
        "wqkv": init(keys[0], (D, 3 * D)),
        "bqkv": init(keys[1], (1, 3 * D)),
        "wout": init(keys[2], (D, D)),
        "bout": init(keys[3], (1, D)),
        "w1":   init(keys[4], (D, F)),
        "b1":   init(keys[5], (1, F)),
        "w2":   init(keys[6], (F, D)),
        "b2":   init(keys[7], (1, D)),
        "g1":   jnp.ones((1, D), jnp.float32),
        "be1":  jnp.zeros((1, D), jnp.float32),
        "g2":   jnp.ones((1, D), jnp.float32),
        "be2":  jnp.zeros((1, D), jnp.float32),
    }

    src = jax.random.normal(keys[8], (B, S, D), jnp.float32)
    # True = padded position; last two keys of batch element 1 are padded.
    key_padding_mask = jnp.zeros((B, S), dtype=bool).at[1, -2:].set(True)

    ref = _reference(src, key_padding_mask, params, nhead=H)

    # Default fast path: bf16 MXU operands / fp32 accumulation, auto block_b,
    # single-pass softmax (S <= kv_block), single-buffered weights.
    out_bf16 = flash_transformer_encoder_layer(src, key_padding_mask, params, nhead=H)
    out_bf16 = jax.block_until_ready(out_bf16)
    assert out_bf16.shape == (B, S, D)
    assert jnp.allclose(out_bf16, ref, atol=5e-2, rtol=5e-2), \
        "bf16 kernel mismatch vs. pure-JAX fp32 reference"

    # fp32 compute path (exact softmax reciprocal), whole batch in one step.
    out_f32 = flash_transformer_encoder_layer(
        src, key_padding_mask, params, nhead=H,
        compute_dtype=jnp.float32, block_b=B)
    out_f32 = jax.block_until_ready(out_f32)
    assert jnp.allclose(out_f32, ref, atol=1e-3, rtol=1e-3), \
        "fp32 kernel mismatch vs. pure-JAX reference"

    # Flash path: online softmax over KV blocks, exercised at small S by
    # forcing kv_block < S.
    out_flash = flash_transformer_encoder_layer(
        src, key_padding_mask, params, nhead=H,
        compute_dtype=jnp.float32, block_b=1, kv_block=4)
    out_flash = jax.block_until_ready(out_flash)
    assert jnp.allclose(out_flash, ref, atol=1e-3, rtol=1e-3), \
        "online-softmax (kv-blocked) kernel mismatch vs. pure-JAX reference"

    print("KERNEL_OK")
</pallas_src>

<mosaic_0001>
module attributes {stable_mosaic.version = 11 : i64} {
  func.func @_encoder_layer_kernel(%arg0: i32, %arg1: memref<2x8x32xf32, #tpu.memory_space<vmem>>, %arg2: memref<2x1x8xf32, #tpu.memory_space<vmem>>, %arg3: memref<32x96xbf16, #tpu.memory_space<vmem>>, %arg4: memref<1x96xf32, #tpu.memory_space<vmem>>, %arg5: memref<32x32xbf16, #tpu.memory_space<vmem>>, %arg6: memref<1x32xf32, #tpu.memory_space<vmem>>, %arg7: memref<32x64xbf16, #tpu.memory_space<vmem>>, %arg8: memref<1x64xf32, #tpu.memory_space<vmem>>, %arg9: memref<64x32xbf16, #tpu.memory_space<vmem>>, %arg10: memref<1x32xf32, #tpu.memory_space<vmem>>, %arg11: memref<1x32xf32, #tpu.memory_space<vmem>>, %arg12: memref<1x32xf32, #tpu.memory_space<vmem>>, %arg13: memref<1x32xf32, #tpu.memory_space<vmem>>, %arg14: memref<1x32xf32, #tpu.memory_space<vmem>>, %arg15: memref<2x8x32xf32, #tpu.memory_space<vmem>>) attributes {dimension_semantics = [#tpu.dimension_semantics<parallel>], iteration_bounds = array<i64: 1>, scalar_prefetch = 0 : i64, scratch_operands = 0 : i64, tpu.core_type = #tpu.core_type<tc>, window_params = [{transform_indices = @transform_0, window_bounds = array<i64: 2, 8, 32>}, {transform_indices = @transform_1, window_bounds = array<i64: 2, 1, 8>}, {pipeline_mode = #tpu.pipeline_mode<synchronous>, transform_indices = @transform_2, window_bounds = array<i64: 32, 96>}, {pipeline_mode = #tpu.pipeline_mode<synchronous>, transform_indices = @transform_3, window_bounds = array<i64: 1, 96>}, {pipeline_mode = #tpu.pipeline_mode<synchronous>, transform_indices = @transform_4, window_bounds = array<i64: 32, 32>}, {pipeline_mode = #tpu.pipeline_mode<synchronous>, transform_indices = @transform_5, window_bounds = array<i64: 1, 32>}, {pipeline_mode = #tpu.pipeline_mode<synchronous>, transform_indices = @transform_6, window_bounds = array<i64: 32, 64>}, {pipeline_mode = #tpu.pipeline_mode<synchronous>, transform_indices = @transform_7, window_bounds = array<i64: 1, 64>}, {pipeline_mode = #tpu.pipeline_mode<synchronous>, transform_indices = @transform_8, window_bounds = array<i64: 64, 32>}, {pipeline_mode = #tpu.pipeline_mode<synchronous>, transform_indices = @transform_9, window_bounds = array<i64: 1, 32>}, {pipeline_mode = #tpu.pipeline_mode<synchronous>, transform_indices = @transform_10, window_bounds = array<i64: 1, 32>}, {pipeline_mode = #tpu.pipeline_mode<synchronous>, transform_indices = @transform_11, window_bounds = array<i64: 1, 32>}, {pipeline_mode = #tpu.pipeline_mode<synchronous>, transform_indices = @transform_12, window_bounds = array<i64: 1, 32>}, {pipeline_mode = #tpu.pipeline_mode<synchronous>, transform_indices = @transform_13, window_bounds = array<i64: 1, 32>}, {transform_indices = @transform_14, window_bounds = array<i64: 2, 8, 32>}]} {
    %c0 = arith.constant 0 : index
    %c0_0 = arith.constant 0 : index
    %c0_1 = arith.constant 0 : index
    %0 = vector.load %arg1[%c0, %c0_0, %c0_1] : memref<2x8x32xf32, #tpu.memory_space<vmem>>, vector<2x8x32xf32>
    %1 = vector.shape_cast %0 : vector<2x8x32xf32> to vector<16x32xf32>
    %2 = arith.truncf %1 : vector<16x32xf32> to vector<16x32xbf16>
    %c0_2 = arith.constant 0 : index
    %c0_3 = arith.constant 0 : index
    %3 = vector.load %arg3[%c0_2, %c0_3] : memref<32x96xbf16, #tpu.memory_space<vmem>>, vector<32x96xbf16>
    %cst = arith.constant dense<0.000000e+00> : vector<16x96xf32>
    %4 = tpu.matmul %2, %3, %cst {dimension_numbers = #tpu.dot_dimension_numbers<[1], [0], [0], [1], [0, 0, 1, 1], [], []>} : vector<16x32xbf16>, vector<32x96xbf16>, vector<16x96xf32> -> vector<16x96xf32>
    %c0_4 = arith.constant 0 : index
    %c0_5 = arith.constant 0 : index
    %5 = vector.load %arg4[%c0_4, %c0_5] : memref<1x96xf32, #tpu.memory_space<vmem>>, vector<1x96xf32>
    %6 = vector.shape_cast %5 : vector<1x96xf32> to vector<96xf32>
    %7 = vector.shape_cast %6 : vector<96xf32> to vector<1x96xf32>
    %8 = vector.broadcast %7 : vector<1x96xf32> to vector<16x96xf32>
    %9 = arith.addf %4, %8 : vector<16x96xf32>
    %10 = vector.shape_cast %9 : vector<16x96xf32> to vector<2x8x96xf32>
    %c0_6 = arith.constant 0 : index
    %c0_7 = arith.constant 0 : index
    %c0_8 = arith.constant 0 : index
    %11 = vector.load %arg2[%c0_6, %c0_7, %c0_8] : memref<2x1x8xf32, #tpu.memory_space<vmem>>, vector<2x1x8xf32>
    %cst_9 = arith.constant 0.000000e+00 : f32
    %12 = vector.broadcast %cst_9 : f32 to vector<16x32xf32>
    %13 = vector.extract_strided_slice %10 {offsets = [0, 0, 0], sizes = [2, 8, 8], strides = [1, 1, 1]} : vector<2x8x96xf32> to vector<2x8x8xf32>
    %14 = arith.truncf %13 : vector<2x8x8xf32> to vector<2x8x8xbf16>
    %15 = vector.extract_strided_slice %10 {offsets = [0, 0, 32], sizes = [2, 8, 8], strides = [1, 1, 1]} : vector<2x8x96xf32> to vector<2x8x8xf32>
    %16 = arith.truncf %15 : vector<2x8x8xf32> to vector<2x8x8xbf16>
    %17 = vector.extract_strided_slice %10 {offsets = [0, 0, 64], sizes = [2, 8, 8], strides = [1, 1, 1]} : vector<2x8x96xf32> to vector<2x8x8xf32>
    %18 = arith.truncf %17 : vector<2x8x8xf32> to vector<2x8x8xbf16>
    "tpu.trace_start"() <{level = 10 : i32, message = "bqd,bkd->bqk"}> : () -> ()
    %cst_10 = arith.constant dense<0.000000e+00> : vector<2x8x8xf32>
    %19 = tpu.matmul %14, %16, %cst_10 {dimension_numbers = #tpu.dot_dimension_numbers<[2], [2], [1], [1], [0, 0, 0, 1, 1, 1], [0], [0]>} : vector<2x8x8xbf16>, vector<2x8x8xbf16>, vector<2x8x8xf32> -> vector<2x8x8xf32>
    "tpu.trace_stop"() : () -> ()
    %20 = vector.broadcast %11 : vector<2x1x8xf32> to vector<2x8x8xf32>
    %21 = arith.addf %19, %20 : vector<2x8x8xf32>
    %cst_11 = arith.constant dense<0xFF800000> : vector<2x8xf32>
    %22 = vector.multi_reduction <maximumf>, %21, %cst_11 [2] : vector<2x8x8xf32> to vector<2x8xf32>
    %23 = vector.shape_cast %22 : vector<2x8xf32> to vector<2x8x1xf32>
    %24 = vector.broadcast %23 : vector<2x8x1xf32> to vector<2x8x8xf32>
    %25 = arith.subf %21, %24 : vector<2x8x8xf32>
    %26 = math.exp %25 : vector<2x8x8xf32>
    %cst_12 = arith.constant dense<0.000000e+00> : vector<2x8xf32>
    %27 = vector.multi_reduction <add>, %26, %cst_12 [2] : vector<2x8x8xf32> to vector<2x8xf32>
    %28 = vector.shape_cast %27 : vector<2x8xf32> to vector<2x8x1xf32>
    %29 = tpu.reciprocal %28 {approx = true} : vector<2x8x1xf32> -> vector<2x8x1xf32>
    %30 = vector.broadcast %29 : vector<2x8x1xf32> to vector<2x8x8xf32>
    %31 = arith.mulf %26, %30 : vector<2x8x8xf32>
    %32 = arith.truncf %31 : vector<2x8x8xf32> to vector<2x8x8xbf16>
    "tpu.trace_start"() <{level = 10 : i32, message = "bqk,bkd->bqd"}> : () -> ()
    %cst_13 = arith.constant dense<0.000000e+00> : vector<2x8x8xf32>
    %33 = tpu.matmul %32, %18, %cst_13 {dimension_numbers = #tpu.dot_dimension_numbers<[2], [1], [1], [2], [0, 0, 0, 1, 1, 2], [0], [0]>} : vector<2x8x8xbf16>, vector<2x8x8xbf16>, vector<2x8x8xf32> -> vector<2x8x8xf32>
    "tpu.trace_stop"() : () -> ()
    %34 = vector.shape_cast %33 : vector<2x8x8xf32> to vector<16x8xf32>
    %35 = arith.truncf %34 : vector<16x8xf32> to vector<16x8xbf16>
    %c0_14 = arith.constant 0 : index
    %c0_15 = arith.constant 0 : index
    %36 = vector.load %arg5[%c0_14, %c0_15] : memref<32x32xbf16, #tpu.memory_space<vmem>>, vector<8x32xbf16>
    %cst_16 = arith.constant dense<0.000000e+00> : vector<16x32xf32>
    %37 = tpu.matmul %35, %36, %cst_16 {dimension_numbers = #tpu.dot_dimension_numbers<[1], [0], [0], [1], [0, 0, 1, 1], [], []>} : vector<16x8xbf16>, vector<8x32xbf16>, vector<16x32xf32> -> vector<16x32xf32>
    %38 = arith.addf %12, %37 : vector<16x32xf32>
    %39 = vector.extract_strided_slice %10 {offsets = [0, 0, 8], sizes = [2, 8, 8], strides = [1, 1, 1]} : vector<2x8x96xf32> to vector<2x8x8xf32>
    %40 = arith.truncf %39 : vector<2x8x8xf32> to vector<2x8x8xbf16>
    %41 = vector.extract_strided_slice %10 {offsets = [0, 0, 40], sizes = [2, 8, 8], strides = [1, 1, 1]} : vector<2x8x96xf32> to vector<2x8x8xf32>
    %42 = arith.truncf %41 : vector<2x8x8xf32> to vector<2x8x8xbf16>
    %43 = vector.extract_strided_slice %10 {offsets = [0, 0, 72], sizes = [2, 8, 8], strides = [1, 1, 1]} : vector<2x8x96xf32> to vector<2x8x8xf32>
    %44 = arith.truncf %43 : vector<2x8x8xf32> to vector<2x8x8xbf16>
    "tpu.trace_start"() <{level = 10 : i32, message = "bqd,bkd->bqk"}> : () -> ()
    %cst_17 = arith.constant dense<0.000000e+00> : vector<2x8x8xf32>
    %45 = tpu.matmul %40, %42, %cst_17 {dimension_numbers = #tpu.dot_dimension_numbers<[2], [2], [1], [1], [0, 0, 0, 1, 1, 1], [0], [0]>} : vector<2x8x8xbf16>, vector<2x8x8xbf16>, vector<2x8x8xf32> -> vector<2x8x8xf32>
    "tpu.trace_stop"() : () -> ()
    %46 = vector.broadcast %11 : vector<2x1x8xf32> to vector<2x8x8xf32>
    %47 = arith.addf %45, %46 : vector<2x8x8xf32>
    %cst_18 = arith.constant dense<0xFF800000> : vector<2x8xf32>
    %48 = vector.multi_reduction <maximumf>, %47, %cst_18 [2] : vector<2x8x8xf32> to vector<2x8xf32>
    %49 = vector.shape_cast %48 : vector<2x8xf32> to vector<2x8x1xf32>
    %50 = vector.broadcast %49 : vector<2x8x1xf32> to vector<2x8x8xf32>
    %51 = arith.subf %47, %50 : vector<2x8x8xf32>
    %52 = math.exp %51 : vector<2x8x8xf32>
    %cst_19 = arith.constant dense<0.000000e+00> : vector<2x8xf32>
    %53 = vector.multi_reduction <add>, %52, %cst_19 [2] : vector<2x8x8xf32> to vector<2x8xf32>
    %54 = vector.shape_cast %53 : vector<2x8xf32> to vector<2x8x1xf32>
    %55 = tpu.reciprocal %54 {approx = true} : vector<2x8x1xf32> -> vector<2x8x1xf32>
    %56 = vector.broadcast %55 : vector<2x8x1xf32> to vector<2x8x8xf32>
    %57 = arith.mulf %52, %56 : vector<2x8x8xf32>
    %58 = arith.truncf %57 : vector<2x8x8xf32> to vector<2x8x8xbf16>
    "tpu.trace_start"() <{level = 10 : i32, message = "bqk,bkd->bqd"}> : () -> ()
    %cst_20 = arith.constant dense<0.000000e+00> : vector<2x8x8xf32>
    %59 = tpu.matmul %58, %44, %cst_20 {dimension_numbers = #tpu.dot_dimension_numbers<[2], [1], [1], [2], [0, 0, 0, 1, 1, 2], [0], [0]>} : vector<2x8x8xbf16>, vector<2x8x8xbf16>, vector<2x8x8xf32> -> vector<2x8x8xf32>
    "tpu.trace_stop"() : () -> ()
    %60 = vector.shape_cast %59 : vector<2x8x8xf32> to vector<16x8xf32>
    %61 = arith.truncf %60 : vector<16x8xf32> to vector<16x8xbf16>
    %c8 = arith.constant 8 : index
    %c0_21 = arith.constant 0 : index
    %62 = vector.load %arg5[%c8, %c0_21] : memref<32x32xbf16, #tpu.memory_space<vmem>>, vector<8x32xbf16>
    %cst_22 = arith.constant dense<0.000000e+00> : vector<16x32xf32>
    %63 = tpu.matmul %61, %62, %cst_22 {dimension_numbers = #tpu.dot_dimension_numbers<[1], [0], [0], [1], [0, 0, 1, 1], [], []>} : vector<16x8xbf16>, vector<8x32xbf16>, vector<16x32xf32> -> vector<16x32xf32>
    %64 = arith.addf %38, %63 : vector<16x32xf32>
    %65 = vector.extract_strided_slice %10 {offsets = [0, 0, 16], sizes = [2, 8, 8], strides = [1, 1, 1]} : vector<2x8x96xf32> to vector<2x8x8xf32>
    %66 = arith.truncf %65 : vector<2x8x8xf32> to vector<2x8x8xbf16>
    %67 = vector.extract_strided_slice %10 {offsets = [0, 0, 48], sizes = [2, 8, 8], strides = [1, 1, 1]} : vector<2x8x96xf32> to vector<2x8x8xf32>
    %68 = arith.truncf %67 : vector<2x8x8xf32> to vector<2x8x8xbf16>
    %69 = vector.extract_strided_slice %10 {offsets = [0, 0, 80], sizes = [2, 8, 8], strides = [1, 1, 1]} : vector<2x8x96xf32> to vector<2x8x8xf32>
    %70 = arith.truncf %69 : vector<2x8x8xf32> to vector<2x8x8xbf16>
    "tpu.trace_start"() <{level = 10 : i32, message = "bqd,bkd->bqk"}> : () -> ()
    %cst_23 = arith.constant dense<0.000000e+00> : vector<2x8x8xf32>
    %71 = tpu.matmul %66, %68, %cst_23 {dimension_numbers = #tpu.dot_dimension_numbers<[2], [2], [1], [1], [0, 0, 0, 1, 1, 1], [0], [0]>} : vector<2x8x8xbf16>, vector<2x8x8xbf16>, vector<2x8x8xf32> -> vector<2x8x8xf32>
    "tpu.trace_stop"() : () -> ()
    %72 = vector.broadcast %11 : vector<2x1x8xf32> to vector<2x8x8xf32>
    %73 = arith.addf %71, %72 : vector<2x8x8xf32>
    %cst_24 = arith.constant dense<0xFF800000> : vector<2x8xf32>
    %74 = vector.multi_reduction <maximumf>, %73, %cst_24 [2] : vector<2x8x8xf32> to vector<2x8xf32>
    %75 = vector.shape_cast %74 : vector<2x8xf32> to vector<2x8x1xf32>
    %76 = vector.broadcast %75 : vector<2x8x1xf32> to vector<2x8x8xf32>
    %77 = arith.subf %73, %76 : vector<2x8x8xf32>
    %78 = math.exp %77 : vector<2x8x8xf32>
    %cst_25 = arith.constant dense<0.000000e+00> : vector<2x8xf32>
    %79 = vector.multi_reduction <add>, %78, %cst_25 [2] : vector<2x8x8xf32> to vector<2x8xf32>
    %80 = vector.shape_cast %79 : vector<2x8xf32> to vector<2x8x1xf32>
    %81 = tpu.reciprocal %80 {approx = true} : vector<2x8x1xf32> -> vector<2x8x1xf32>
    %82 = vector.broadcast %81 : vector<2x8x1xf32> to vector<2x8x8xf32>
    %83 = arith.mulf %78, %82 : vector<2x8x8xf32>
    %84 = arith.truncf %83 : vector<2x8x8xf32> to vector<2x8x8xbf16>
    "tpu.trace_start"() <{level = 10 : i32, message = "bqk,bkd->bqd"}> : () -> ()
    %cst_26 = arith.constant dense<0.000000e+00> : vector<2x8x8xf32>
    %85 = tpu.matmul %84, %70, %cst_26 {dimension_numbers = #tpu.dot_dimension_numbers<[2], [1], [1], [2], [0, 0, 0, 1, 1, 2], [0], [0]>} : vector<2x8x8xbf16>, vector<2x8x8xbf16>, vector<2x8x8xf32> -> vector<2x8x8xf32>
    "tpu.trace_stop"() : () -> ()
    %86 = vector.shape_cast %85 : vector<2x8x8xf32> to vector<16x8xf32>
    %87 = arith.truncf %86 : vector<16x8xf32> to vector<16x8xbf16>
    %c16 = arith.constant 16 : index
    %c0_27 = arith.constant 0 : index
    %88 = vector.load %arg5[%c16, %c0_27] : memref<32x32xbf16, #tpu.memory_space<vmem>>, vector<8x32xbf16>
    %cst_28 = arith.constant dense<0.000000e+00> : vector<16x32xf32>
    %89 = tpu.matmul %87, %88, %cst_28 {dimension_numbers = #tpu.dot_dimension_numbers<[1], [0], [0], [1], [0, 0, 1, 1], [], []>} : vector<16x8xbf16>, vector<8x32xbf16>, vector<16x32xf32> -> vector<16x32xf32>
    %90 = arith.addf %64, %89 : vector<16x32xf32>
    %91 = vector.extract_strided_slice %10 {offsets = [0, 0, 24], sizes = [2, 8, 8], strides = [1, 1, 1]} : vector<2x8x96xf32> to vector<2x8x8xf32>
    %92 = arith.truncf %91 : vector<2x8x8xf32> to vector<2x8x8xbf16>
    %93 = vector.extract_strided_slice %10 {offsets = [0, 0, 56], sizes = [2, 8, 8], strides = [1, 1, 1]} : vector<2x8x96xf32> to vector<2x8x8xf32>
    %94 = arith.truncf %93 : vector<2x8x8xf32> to vector<2x8x8xbf16>
    %95 = vector.extract_strided_slice %10 {offsets = [0, 0, 88], sizes = [2, 8, 8], strides = [1, 1, 1]} : vector<2x8x96xf32> to vector<2x8x8xf32>
    %96 = arith.truncf %95 : vector<2x8x8xf32> to vector<2x8x8xbf16>
    "tpu.trace_start"() <{level = 10 : i32, message = "bqd,bkd->bqk"}> : () -> ()
    %cst_29 = arith.constant dense<0.000000e+00> : vector<2x8x8xf32>
    %97 = tpu.matmul %92, %94, %cst_29 {dimension_numbers = #tpu.dot_dimension_numbers<[2], [2], [1], [1], [0, 0, 0, 1, 1, 1], [0], [0]>} : vector<2x8x8xbf16>, vector<2x8x8xbf16>, vector<2x8x8xf32> -> vector<2x8x8xf32>
    "tpu.trace_stop"() : () -> ()
    %98 = vector.broadcast %11 : vector<2x1x8xf32> to vector<2x8x8xf32>
    %99 = arith.addf %97, %98 : vector<2x8x8xf32>
    %cst_30 = arith.constant dense<0xFF800000> : vector<2x8xf32>
    %100 = vector.multi_reduction <maximumf>, %99, %cst_30 [2] : vector<2x8x8xf32> to vector<2x8xf32>
    %101 = vector.shape_cast %100 : vector<2x8xf32> to vector<2x8x1xf32>
    %102 = vector.broadcast %101 : vector<2x8x1xf32> to vector<2x8x8xf32>
    %103 = arith.subf %99, %102 : vector<2x8x8xf32>
    %104 = math.exp %103 : vector<2x8x8xf32>
    %cst_31 = arith.constant dense<0.000000e+00> : vector<2x8xf32>
    %105 = vector.multi_reduction <add>, %104, %cst_31 [2] : vector<2x8x8xf32> to vector<2x8xf32>
    %106 = vector.shape_cast %105 : vector<2x8xf32> to vector<2x8x1xf32>
    %107 = tpu.reciprocal %106 {approx = true} : vector<2x8x1xf32> -> vector<2x8x1xf32>
    %108 = vector.broadcast %107 : vector<2x8x1xf32> to vector<2x8x8xf32>
    %109 = arith.mulf %104, %108 : vector<2x8x8xf32>
    %110 = arith.truncf %109 : vector<2x8x8xf32> to vector<2x8x8xbf16>
    "tpu.trace_start"() <{level = 10 : i32, message = "bqk,bkd->bqd"}> : () -> ()
    %cst_32 = arith.constant dense<0.000000e+00> : vector<2x8x8xf32>
    %111 = tpu.matmul %110, %96, %cst_32 {dimension_numbers = #tpu.dot_dimension_numbers<[2], [1], [1], [2], [0, 0, 0, 1, 1, 2], [0], [0]>} : vector<2x8x8xbf16>, vector<2x8x8xbf16>, vector<2x8x8xf32> -> vector<2x8x8xf32>
    "tpu.trace_stop"() : () -> ()
    %112 = vector.shape_cast %111 : vector<2x8x8xf32> to vector<16x8xf32>
    %113 = arith.truncf %112 : vector<16x8xf32> to vector<16x8xbf16>
    %c24 = arith.constant 24 : index
    %c0_33 = arith.constant 0 : index
    %114 = vector.load %arg5[%c24, %c0_33] : memref<32x32xbf16, #tpu.memory_space<vmem>>, vector<8x32xbf16>
    %cst_34 = arith.constant dense<0.000000e+00> : vector<16x32xf32>
    %115 = tpu.matmul %113, %114, %cst_34 {dimension_numbers = #tpu.dot_dimension_numbers<[1], [0], [0], [1], [0, 0, 1, 1], [], []>} : vector<16x8xbf16>, vector<8x32xbf16>, vector<16x32xf32> -> vector<16x32xf32>
    %116 = arith.addf %90, %115 : vector<16x32xf32>
    %c0_35 = arith.constant 0 : index
    %c0_36 = arith.constant 0 : index
    %117 = vector.load %arg6[%c0_35, %c0_36] : memref<1x32xf32, #tpu.memory_space<vmem>>, vector<1x32xf32>
    %118 = vector.shape_cast %117 : vector<1x32xf32> to vector<32xf32>
    %119 = vector.shape_cast %118 : vector<32xf32> to vector<1x32xf32>
    %120 = vector.broadcast %119 : vector<1x32xf32> to vector<16x32xf32>
    %121 = arith.addf %116, %120 : vector<16x32xf32>
    %122 = arith.addf %1, %121 : vector<16x32xf32>
    %cst_37 = arith.constant dense<0.000000e+00> : vector<16xf32>
    %123 = vector.multi_reduction <add>, %122, %cst_37 [1] : vector<16x32xf32> to vector<16xf32>
    %124 = vector.shape_cast %123 : vector<16xf32> to vector<16x1xf32>
    %cst_38 = arith.constant 3.200000e+01 : f32
    %125 = vector.broadcast %cst_38 : f32 to vector<16x1xf32>
    %126 = arith.divf %124, %125 : vector<16x1xf32>
    %127 = vector.broadcast %126 : vector<16x1xf32> to vector<16x32xf32>
    %128 = arith.subf %122, %127 : vector<16x32xf32>
    %129 = arith.mulf %128, %128 : vector<16x32xf32>
    %cst_39 = arith.constant dense<0.000000e+00> : vector<16xf32>
    %130 = vector.multi_reduction <add>, %129, %cst_39 [1] : vector<16x32xf32> to vector<16xf32>
    %131 = vector.shape_cast %130 : vector<16xf32> to vector<16x1xf32>
    %cst_40 = arith.constant 3.200000e+01 : f32
    %132 = vector.broadcast %cst_40 : f32 to vector<16x1xf32>
    %133 = arith.divf %131, %132 : vector<16x1xf32>
    %134 = vector.broadcast %126 : vector<16x1xf32> to vector<16x32xf32>
    %135 = arith.subf %122, %134 : vector<16x32xf32>
    %cst_41 = arith.constant 9.99999974E-6 : f32
    %136 = vector.broadcast %cst_41 : f32 to vector<16x1xf32>
    %137 = arith.addf %133, %136 : vector<16x1xf32>
    %138 = math.rsqrt %137 : vector<16x1xf32>
    %139 = vector.broadcast %138 : vector<16x1xf32> to vector<16x32xf32>
    %140 = arith.mulf %135, %139 : vector<16x32xf32>
    %c0_42 = arith.constant 0 : index
    %c0_43 = arith.constant 0 : index
    %141 = vector.load %arg11[%c0_42, %c0_43] : memref<1x32xf32, #tpu.memory_space<vmem>>, vector<1x32xf32>
    %142 = vector.shape_cast %141 : vector<1x32xf32> to vector<32xf32>
    %143 = vector.shape_cast %142 : vector<32xf32> to vector<1x32xf32>
    %144 = vector.broadcast %143 : vector<1x32xf32> to vector<16x32xf32>
    %145 = arith.mulf %140, %144 : vector<16x32xf32>
    %c0_44 = arith.constant 0 : index
    %c0_45 = arith.constant 0 : index
    %146 = vector.load %arg12[%c0_44, %c0_45] : memref<1x32xf32, #tpu.memory_space<vmem>>, vector<1x32xf32>
    %147 = vector.shape_cast %146 : vector<1x32xf32> to vector<32xf32>
    %148 = vector.shape_cast %147 : vector<32xf32> to vector<1x32xf32>
    %149 = vector.broadcast %148 : vector<1x32xf32> to vector<16x32xf32>
    %150 = arith.addf %145, %149 : vector<16x32xf32>
    %151 = arith.truncf %150 : vector<16x32xf32> to vector<16x32xbf16>
    %c0_46 = arith.constant 0 : index
    %c0_47 = arith.constant 0 : index
    %152 = vector.load %arg7[%c0_46, %c0_47] : memref<32x64xbf16, #tpu.memory_space<vmem>>, vector<32x64xbf16>
    %cst_48 = arith.constant dense<0.000000e+00> : vector<16x64xf32>
    %153 = tpu.matmul %151, %152, %cst_48 {dimension_numbers = #tpu.dot_dimension_numbers<[1], [0], [0], [1], [0, 0, 1, 1], [], []>} : vector<16x32xbf16>, vector<32x64xbf16>, vector<16x64xf32> -> vector<16x64xf32>
    %c0_49 = arith.constant 0 : index
    %c0_50 = arith.constant 0 : index
    %154 = vector.load %arg8[%c0_49, %c0_50] : memref<1x64xf32, #tpu.memory_space<vmem>>, vector<1x64xf32>
    %155 = vector.shape_cast %154 : vector<1x64xf32> to vector<64xf32>
    %156 = vector.shape_cast %155 : vector<64xf32> to vector<1x64xf32>
    %157 = vector.broadcast %156 : vector<1x64xf32> to vector<16x64xf32>
    %158 = arith.addf %153, %157 : vector<16x64xf32>
    %cst_51 = arith.constant 0.000000e+00 : f32
    %159 = vector.broadcast %cst_51 : f32 to vector<16x64xf32>
    %160 = arith.maximumf %158, %159 : vector<16x64xf32>
    %161 = arith.truncf %160 : vector<16x64xf32> to vector<16x64xbf16>
    %c0_52 = arith.constant 0 : index
    %c0_53 = arith.constant 0 : index
    %162 = vector.load %arg9[%c0_52, %c0_53] : memref<64x32xbf16, #tpu.memory_space<vmem>>, vector<64x32xbf16>
    %cst_54 = arith.constant dense<0.000000e+00> : vector<16x32xf32>
    %163 = tpu.matmul %161, %162, %cst_54 {dimension_numbers = #tpu.dot_dimension_numbers<[1], [0], [0], [1], [0, 0, 1, 1], [], []>} : vector<16x64xbf16>, vector<64x32xbf16>, vector<16x32xf32> -> vector<16x32xf32>
    %c0_55 = arith.constant 0 : index
    %c0_56 = arith.constant 0 : index
    %164 = vector.load %arg10[%c0_55, %c0_56] : memref<1x32xf32, #tpu.memory_space<vmem>>, vector<1x32xf32>
    %165 = vector.shape_cast %164 : vector<1x32xf32> to vector<32xf32>
    %166 = vector.shape_cast %165 : vector<32xf32> to vector<1x32xf32>
    %167 = vector.broadcast %166 : vector<1x32xf32> to vector<16x32xf32>
    %168 = arith.addf %163, %167 : vector<16x32xf32>
    %169 = arith.addf %150, %168 : vector<16x32xf32>
    %cst_57 = arith.constant dense<0.000000e+00> : vector<16xf32>
    %170 = vector.multi_reduction <add>, %169, %cst_57 [1] : vector<16x32xf32> to vector<16xf32>
    %171 = vector.shape_cast %170 : vector<16xf32> to vector<16x1xf32>
    %cst_58 = arith.constant 3.200000e+01 : f32
    %172 = vector.broadcast %cst_58 : f32 to vector<16x1xf32>
    %173 = arith.divf %171, %172 : vector<16x1xf32>
    %174 = vector.broadcast %173 : vector<16x1xf32> to vector<16x32xf32>
    %175 = arith.subf %169, %174 : vector<16x32xf32>
    %176 = arith.mulf %175, %175 : vector<16x32xf32>
    %cst_59 = arith.constant dense<0.000000e+00> : vector<16xf32>
    %177 = vector.multi_reduction <add>, %176, %cst_59 [1] : vector<16x32xf32> to vector<16xf32>
    %178 = vector.shape_cast %177 : vector<16xf32> to vector<16x1xf32>
    %cst_60 = arith.constant 3.200000e+01 : f32
    %179 = vector.broadcast %cst_60 : f32 to vector<16x1xf32>
    %180 = arith.divf %178, %179 : vector<16x1xf32>
    %181 = vector.broadcast %173 : vector<16x1xf32> to vector<16x32xf32>
    %182 = arith.subf %169, %181 : vector<16x32xf32>
    %cst_61 = arith.constant 9.99999974E-6 : f32
    %183 = vector.broadcast %cst_61 : f32 to vector<16x1xf32>
    %184 = arith.addf %180, %183 : vector<16x1xf32>
    %185 = math.rsqrt %184 : vector<16x1xf32>
    %186 = vector.broadcast %185 : vector<16x1xf32> to vector<16x32xf32>
    %187 = arith.mulf %182, %186 : vector<16x32xf32>
    %c0_62 = arith.constant 0 : index
    %c0_63 = arith.constant 0 : index
    %188 = vector.load %arg13[%c0_62, %c0_63] : memref<1x32xf32, #tpu.memory_space<vmem>>, vector<1x32xf32>
    %189 = vector.shape_cast %188 : vector<1x32xf32> to vector<32xf32>
    %190 = vector.shape_cast %189 : vector<32xf32> to vector<1x32xf32>
    %191 = vector.broadcast %190 : vector<1x32xf32> to vector<16x32xf32>
    %192 = arith.mulf %187, %191 : vector<16x32xf32>
    %c0_64 = arith.constant 0 : index
    %c0_65 = arith.constant 0 : index
    %193 = vector.load %arg14[%c0_64, %c0_65] : memref<1x32xf32, #tpu.memory_space<vmem>>, vector<1x32xf32>
    %194 = vector.shape_cast %193 : vector<1x32xf32> to vector<32xf32>
    %195 = vector.shape_cast %194 : vector<32xf32> to vector<1x32xf32>
    %196 = vector.broadcast %195 : vector<1x32xf32> to vector<16x32xf32>
    %197 = arith.addf %192, %196 : vector<16x32xf32>
    %198 = vector.shape_cast %197 : vector<16x32xf32> to vector<2x8x32xf32>
    %c0_66 = arith.constant 0 : index
    %c0_67 = arith.constant 0 : index
    %c0_68 = arith.constant 0 : index
    %199 = vector.load %arg15[%c0_66, %c0_67, %c0_68] : memref<2x8x32xf32, #tpu.memory_space<vmem>>, vector<2x8x32xf32>
    tpu.vector_store %arg15[%c0_66, %c0_67, %c0_68], %198 {strides = array<i32>} : memref<2x8x32xf32, #tpu.memory_space<vmem>>, vector<2x8x32xf32>,
    return
  }
  func.func @transform_0(%arg0: i32) -> (i32, i32, i32) {
    %c0_i32 = arith.constant 0 : i32
    %c0_i32_0 = arith.constant 0 : i32
    %c0_i32_1 = arith.constant 0 : i32
    return %arg0, %c0_i32, %c0_i32_0 : i32, i32, i32
  }
  func.func @transform_1(%arg0: i32) -> (i32, i32, i32) {
    %c0_i32 = arith.constant 0 : i32
    %c0_i32_0 = arith.constant 0 : i32
    %c0_i32_1 = arith.constant 0 : i32
    return %arg0, %c0_i32, %c0_i32_0 : i32, i32, i32
  }
  func.func @transform_2(%arg0: i32) -> (i32, i32) {
    %c0_i32 = arith.constant 0 : i32
    %c0_i32_0 = arith.constant 0 : i32
    %c0_i32_1 = arith.constant 0 : i32
    return %c0_i32, %c0_i32_0 : i32, i32
  }
  func.func @transform_3(%arg0: i32) -> (i32, i32) {
    %c0_i32 = arith.constant 0 : i32
    %c0_i32_0 = arith.constant 0 : i32
    %c0_i32_1 = arith.constant 0 : i32
    return %c0_i32, %c0_i32_0 : i32, i32
  }
  func.func @transform_4(%arg0: i32) -> (i32, i32) {
    %c0_i32 = arith.constant 0 : i32
    %c0_i32_0 = arith.constant 0 : i32
    %c0_i32_1 = arith.constant 0 : i32
    return %c0_i32, %c0_i32_0 : i32, i32
  }
  func.func @transform_5(%arg0: i32) -> (i32, i32) {
    %c0_i32 = arith.constant 0 : i32
    %c0_i32_0 = arith.constant 0 : i32
    %c0_i32_1 = arith.constant 0 : i32
    return %c0_i32, %c0_i32_0 : i32, i32
  }
  func.func @transform_6(%arg0: i32) -> (i32, i32) {
    %c0_i32 = arith.constant 0 : i32
    %c0_i32_0 = arith.constant 0 : i32
    %c0_i32_1 = arith.constant 0 : i32
    return %c0_i32, %c0_i32_0 : i32, i32
  }
  func.func @transform_7(%arg0: i32) -> (i32, i32) {
    %c0_i32 = arith.constant 0 : i32
    %c0_i32_0 = arith.constant 0 : i32
    %c0_i32_1 = arith.constant 0 : i32
    return %c0_i32, %c0_i32_0 : i32, i32
  }
  func.func @transform_8(%arg0: i32) -> (i32, i32) {
    %c0_i32 = arith.constant 0 : i32
    %c0_i32_0 = arith.constant 0 : i32
    %c0_i32_1 = arith.constant 0 : i32
    return %c0_i32, %c0_i32_0 : i32, i32
  }
  func.func @transform_9(%arg0: i32) -> (i32, i32) {
    %c0_i32 = arith.constant 0 : i32
    %c0_i32_0 = arith.constant 0 : i32
    %c0_i32_1 = arith.constant 0 : i32
    return %c0_i32, %c0_i32_0 : i32, i32
  }
  func.func @transform_10(%arg0: i32) -> (i32, i32) {
    %c0_i32 = arith.constant 0 : i32
    %c0_i32_0 = arith.constant 0 : i32
    %c0_i32_1 = arith.constant 0 : i32
    return %c0_i32, %c0_i32_0 : i32, i32
  }
  func.func @transform_11(%arg0: i32) -> (i32, i32) {
    %c0_i32 = arith.constant 0 : i32
    %c0_i32_0 = arith.constant 0 : i32
    %c0_i32_1 = arith.constant 0 : i32
    return %c0_i32, %c0_i32_0 : i32, i32
  }
  func.func @transform_12(%arg0: i32) -> (i32, i32) {
    %c0_i32 = arith.constant 0 : i32
    %c0_i32_0 = arith.constant 0 : i32
    %c0_i32_1 = arith.constant 0 : i32
    return %c0_i32, %c0_i32_0 : i32, i32
  }
  func.func @transform_13(%arg0: i32) -> (i32, i32) {
    %c0_i32 = arith.constant 0 : i32
    %c0_i32_0 = arith.constant 0 : i32
    %c0_i32_1 = arith.constant 0 : i32
    return %c0_i32, %c0_i32_0 : i32, i32
  }
  func.func @transform_14(%arg0: i32) -> (i32, i32, i32) {
    %c0_i32 = arith.constant 0 : i32
    %c0_i32_0 = arith.constant 0 : i32
    %c0_i32_1 = arith.constant 0 : i32
    return %arg0, %c0_i32, %c0_i32_0 : i32, i32, i32
  }
}

module attributes {stable_mosaic.version = 11 : i64} {
  func.func @_encoder_layer_kernel(%arg0: i32, %arg1: memref<2x8x32xf32, #tpu.memory_space<vmem>>, %arg2: memref<2x1x8xf32, #tpu.memory_space<vmem>>, %arg3: memref<32x96xbf16, #tpu.memory_space<vmem>>, %arg4: memref<1x96xf32, #tpu.memory_space<vmem>>, %arg5: memref<32x32xbf16, #tpu.memory_space<vmem>>, %arg6: memref<1x32xf32, #tpu.memory_space<vmem>>, %arg7: memref<32x64xbf16, #tpu.memory_space<vmem>>, %arg8: memref<1x64xf32, #tpu.memory_space<vmem>>, %arg9: memref<64x32xbf16, #tpu.memory_space<vmem>>, %arg10: memref<1x32xf32, #tpu.memory_space<vmem>>, %arg11: memref<1x32xf32, #tpu.memory_space<vmem>>, %arg12: memref<1x32xf32, #tpu.memory_space<vmem>>, %arg13: memref<1x32xf32, #tpu.memory_space<vmem>>, %arg14: memref<1x32xf32, #tpu.memory_space<vmem>>, %arg15: memref<2x8x32xf32, #tpu.memory_space<vmem>>) attributes {dimension_semantics = [#tpu.dimension_semantics<parallel>], iteration_bounds = array<i64: 1>, scalar_prefetch = 0 : i64, scratch_operands = 0 : i64, tpu.core_type = #tpu.core_type<tc>, window_params = [{transform_indices = @transform_0, window_bounds = array<i64: 2, 8, 32>}, {transform_indices = @transform_1, window_bounds = array<i64: 2, 1, 8>}, {pipeline_mode = #tpu.pipeline_mode<synchronous>, transform_indices = @transform_2, window_bounds = array<i64: 32, 96>}, {pipeline_mode = #tpu.pipeline_mode<synchronous>, transform_indices = @transform_3, window_bounds = array<i64: 1, 96>}, {pipeline_mode = #tpu.pipeline_mode<synchronous>, transform_indices = @transform_4, window_bounds = array<i64: 32, 32>}, {pipeline_mode = #tpu.pipeline_mode<synchronous>, transform_indices = @transform_5, window_bounds = array<i64: 1, 32>}, {pipeline_mode = #tpu.pipeline_mode<synchronous>, transform_indices = @transform_6, window_bounds = array<i64: 32, 64>}, {pipeline_mode = #tpu.pipeline_mode<synchronous>, transform_indices = @transform_7, window_bounds = array<i64: 1, 64>}, {pipeline_mode = #tpu.pipeline_mode<synchronous>, transform_indices = @transform_8, window_bounds = array<i64: 64, 32>}, {pipeline_mode = #tpu.pipeline_mode<synchronous>, transform_indices = @transform_9, window_bounds = array<i64: 1, 32>}, {pipeline_mode = #tpu.pipeline_mode<synchronous>, transform_indices = @transform_10, window_bounds = array<i64: 1, 32>}, {pipeline_mode = #tpu.pipeline_mode<synchronous>, transform_indices = @transform_11, window_bounds = array<i64: 1, 32>}, {pipeline_mode = #tpu.pipeline_mode<synchronous>, transform_indices = @transform_12, window_bounds = array<i64: 1, 32>}, {pipeline_mode = #tpu.pipeline_mode<synchronous>, transform_indices = @transform_13, window_bounds = array<i64: 1, 32>}, {transform_indices = @transform_14, window_bounds = array<i64: 2, 8, 32>}]} {
    %c0 = arith.constant 0 : index
    %c0_0 = arith.constant 0 : index
    %c0_1 = arith.constant 0 : index
    %0 = vector.load %arg1[%c0, %c0_0, %c0_1] : memref<2x8x32xf32, #tpu.memory_space<vmem>>, vector<2x8x32xf32>
    %1 = vector.shape_cast %0 : vector<2x8x32xf32> to vector<16x32xf32>
    %2 = arith.truncf %1 : vector<16x32xf32> to vector<16x32xbf16>
    %c0_2 = arith.constant 0 : index
    %c0_3 = arith.constant 0 : index
    %3 = vector.load %arg3[%c0_2, %c0_3] : memref<32x96xbf16, #tpu.memory_space<vmem>>, vector<32x96xbf16>
    %cst = arith.constant dense<0.000000e+00> : vector<16x96xf32>
    %4 = tpu.matmul %2, %3, %cst {dimension_numbers = #tpu.dot_dimension_numbers<[1], [0], [0], [1], [0, 0, 1, 1], [], []>} : vector<16x32xbf16>, vector<32x96xbf16>, vector<16x96xf32> -> vector<16x96xf32>
    %c0_4 = arith.constant 0 : index
    %c0_5 = arith.constant 0 : index
    %5 = vector.load %arg4[%c0_4, %c0_5] : memref<1x96xf32, #tpu.memory_space<vmem>>, vector<1x96xf32>
    %6 = vector.shape_cast %5 : vector<1x96xf32> to vector<96xf32>
    %7 = vector.shape_cast %6 : vector<96xf32> to vector<1x96xf32>
    %8 = vector.broadcast %7 : vector<1x96xf32> to vector<16x96xf32>
    %9 = arith.addf %4, %8 : vector<16x96xf32>
    %10 = vector.shape_cast %9 : vector<16x96xf32> to vector<2x8x96xf32>
    %c0_6 = arith.constant 0 : index
    %c0_7 = arith.constant 0 : index
    %c0_8 = arith.constant 0 : index
    %11 = vector.load %arg2[%c0_6, %c0_7, %c0_8] : memref<2x1x8xf32, #tpu.memory_space<vmem>>, vector<2x1x8xf32>
    %cst_9 = arith.constant 0.000000e+00 : f32
    %12 = vector.broadcast %cst_9 : f32 to vector<16x32xf32>
    %13 = vector.extract_strided_slice %10 {offsets = [0, 0, 0], sizes = [2, 8, 8], strides = [1, 1, 1]} : vector<2x8x96xf32> to vector<2x8x8xf32>
    %14 = arith.truncf %13 : vector<2x8x8xf32> to vector<2x8x8xbf16>
    %15 = vector.extract_strided_slice %10 {offsets = [0, 0, 32], sizes = [2, 8, 8], strides = [1, 1, 1]} : vector<2x8x96xf32> to vector<2x8x8xf32>
    %16 = arith.truncf %15 : vector<2x8x8xf32> to vector<2x8x8xbf16>
    %17 = vector.extract_strided_slice %10 {offsets = [0, 0, 64], sizes = [2, 8, 8], strides = [1, 1, 1]} : vector<2x8x96xf32> to vector<2x8x8xf32>
    %18 = arith.truncf %17 : vector<2x8x8xf32> to vector<2x8x8xbf16>
    "tpu.trace_start"() <{level = 10 : i32, message = "bqd,bkd->bqk"}> : () -> ()
    %cst_10 = arith.constant dense<0.000000e+00> : vector<2x8x8xf32>
    %19 = tpu.matmul %14, %16, %cst_10 {dimension_numbers = #tpu.dot_dimension_numbers<[2], [2], [1], [1], [0, 0, 0, 1, 1, 1], [0], [0]>} : vector<2x8x8xbf16>, vector<2x8x8xbf16>, vector<2x8x8xf32> -> vector<2x8x8xf32>
    "tpu.trace_stop"() : () -> ()
    %20 = vector.broadcast %11 : vector<2x1x8xf32> to vector<2x8x8xf32>
    %21 = arith.addf %19, %20 : vector<2x8x8xf32>
    %cst_11 = arith.constant dense<0xFF800000> : vector<2x8xf32>
    %22 = vector.multi_reduction <maximumf>, %21, %cst_11 [2] : vector<2x8x8xf32> to vector<2x8xf32>
    %23 = vector.shape_cast %22 : vector<2x8xf32> to vector<2x8x1xf32>
    %24 = vector.broadcast %23 : vector<2x8x1xf32> to vector<2x8x8xf32>
    %25 = arith.subf %21, %24 : vector<2x8x8xf32>
    %26 = math.exp %25 : vector<2x8x8xf32>
    %cst_12 = arith.constant dense<0.000000e+00> : vector<2x8xf32>
    %27 = vector.multi_reduction <add>, %26, %cst_12 [2] : vector<2x8x8xf32> to vector<2x8xf32>
    %28 = vector.shape_cast %27 : vector<2x8xf32> to vector<2x8x1xf32>
    %29 = tpu.reciprocal %28 {approx = true} : vector<2x8x1xf32> -> vector<2x8x1xf32>
    %30 = vector.broadcast %29 : vector<2x8x1xf32> to vector<2x8x8xf32>
    %31 = arith.mulf %26, %30 : vector<2x8x8xf32>
    %32 = arith.truncf %31 : vector<2x8x8xf32> to vector<2x8x8xbf16>
    "tpu.trace_start"() <{level = 10 : i32, message = "bqk,bkd->bqd"}> : () -> ()
    %cst_13 = arith.constant dense<0.000000e+00> : vector<2x8x8xf32>
    %33 = tpu.matmul %32, %18, %cst_13 {dimension_numbers = #tpu.dot_dimension_numbers<[2], [1], [1], [2], [0, 0, 0, 1, 1, 2], [0], [0]>} : vector<2x8x8xbf16>, vector<2x8x8xbf16>, vector<2x8x8xf32> -> vector<2x8x8xf32>
    "tpu.trace_stop"() : () -> ()
    %34 = vector.shape_cast %33 : vector<2x8x8xf32> to vector<16x8xf32>
    %35 = arith.truncf %34 : vector<16x8xf32> to vector<16x8xbf16>
    %c0_14 = arith.constant 0 : index
    %c0_15 = arith.constant 0 : index
    %36 = vector.load %arg5[%c0_14, %c0_15] : memref<32x32xbf16, #tpu.memory_space<vmem>>, vector<8x32xbf16>
    %cst_16 = arith.constant dense<0.000000e+00> : vector<16x32xf32>
    %37 = tpu.matmul %35, %36, %cst_16 {dimension_numbers = #tpu.dot_dimension_numbers<[1], [0], [0], [1], [0, 0, 1, 1], [], []>} : vector<16x8xbf16>, vector<8x32xbf16>, vector<16x32xf32> -> vector<16x32xf32>
    %38 = arith.addf %12, %37 : vector<16x32xf32>
    %39 = vector.extract_strided_slice %10 {offsets = [0, 0, 8], sizes = [2, 8, 8], strides = [1, 1, 1]} : vector<2x8x96xf32> to vector<2x8x8xf32>
    %40 = arith.truncf %39 : vector<2x8x8xf32> to vector<2x8x8xbf16>
    %41 = vector.extract_strided_slice %10 {offsets = [0, 0, 40], sizes = [2, 8, 8], strides = [1, 1, 1]} : vector<2x8x96xf32> to vector<2x8x8xf32>
    %42 = arith.truncf %41 : vector<2x8x8xf32> to vector<2x8x8xbf16>
    %43 = vector.extract_strided_slice %10 {offsets = [0, 0, 72], sizes = [2, 8, 8], strides = [1, 1, 1]} : vector<2x8x96xf32> to vector<2x8x8xf32>
    %44 = arith.truncf %43 : vector<2x8x8xf32> to vector<2x8x8xbf16>
    "tpu.trace_start"() <{level = 10 : i32, message = "bqd,bkd->bqk"}> : () -> ()
    %cst_17 = arith.constant dense<0.000000e+00> : vector<2x8x8xf32>
    %45 = tpu.matmul %40, %42, %cst_17 {dimension_numbers = #tpu.dot_dimension_numbers<[2], [2], [1], [1], [0, 0, 0, 1, 1, 1], [0], [0]>} : vector<2x8x8xbf16>, vector<2x8x8xbf16>, vector<2x8x8xf32> -> vector<2x8x8xf32>
    "tpu.trace_stop"() : () -> ()
    %46 = vector.broadcast %11 : vector<2x1x8xf32> to vector<2x8x8xf32>
    %47 = arith.addf %45, %46 : vector<2x8x8xf32>
    %cst_18 = arith.constant dense<0xFF800000> : vector<2x8xf32>
    %48 = vector.multi_reduction <maximumf>, %47, %cst_18 [2] : vector<2x8x8xf32> to vector<2x8xf32>
    %49 = vector.shape_cast %48 : vector<2x8xf32> to vector<2x8x1xf32>
    %50 = vector.broadcast %49 : vector<2x8x1xf32> to vector<2x8x8xf32>
    %51 = arith.subf %47, %50 : vector<2x8x8xf32>
    %52 = math.exp %51 : vector<2x8x8xf32>
    %cst_19 = arith.constant dense<0.000000e+00> : vector<2x8xf32>
    %53 = vector.multi_reduction <add>, %52, %cst_19 [2] : vector<2x8x8xf32> to vector<2x8xf32>
    %54 = vector.shape_cast %53 : vector<2x8xf32> to vector<2x8x1xf32>
    %55 = tpu.reciprocal %54 {approx = true} : vector<2x8x1xf32> -> vector<2x8x1xf32>
    %56 = vector.broadcast %55 : vector<2x8x1xf32> to vector<2x8x8xf32>
    %57 = arith.mulf %52, %56 : vector<2x8x8xf32>
    %58 = arith.truncf %57 : vector<2x8x8xf32> to vector<2x8x8xbf16>
    "tpu.trace_start"() <{level = 10 : i32, message = "bqk,bkd->bqd"}> : () -> ()
    %cst_20 = arith.constant dense<0.000000e+00> : vector<2x8x8xf32>
    %59 = tpu.matmul %58, %44, %cst_20 {dimension_numbers = #tpu.dot_dimension_numbers<[2], [1], [1], [2], [0, 0, 0, 1, 1, 2], [0], [0]>} : vector<2x8x8xbf16>, vector<2x8x8xbf16>, vector<2x8x8xf32> -> vector<2x8x8xf32>
    "tpu.trace_stop"() : () -> ()
    %60 = vector.shape_cast %59 : vector<2x8x8xf32> to vector<16x8xf32>
    %61 = arith.truncf %60 : vector<16x8xf32> to vector<16x8xbf16>
    %c8 = arith.constant 8 : index
    %c0_21 = arith.constant 0 : index
    %62 = vector.load %arg5[%c8, %c0_21] : memref<32x32xbf16, #tpu.memory_space<vmem>>, vector<8x32xbf16>
    %cst_22 = arith.constant dense<0.000000e+00> : vector<16x32xf32>
    %63 = tpu.matmul %61, %62, %cst_22 {dimension_numbers = #tpu.dot_dimension_numbers<[1], [0], [0], [1], [0, 0, 1, 1], [], []>} : vector<16x8xbf16>, vector<8x32xbf16>, vector<16x32xf32> -> vector<16x32xf32>
    %64 = arith.addf %38, %63 : vector<16x32xf32>
    %65 = vector.extract_strided_slice %10 {offsets = [0, 0, 16], sizes = [2, 8, 8], strides = [1, 1, 1]} : vector<2x8x96xf32> to vector<2x8x8xf32>
    %66 = arith.truncf %65 : vector<2x8x8xf32> to vector<2x8x8xbf16>
    %67 = vector.extract_strided_slice %10 {offsets = [0, 0, 48], sizes = [2, 8, 8], strides = [1, 1, 1]} : vector<2x8x96xf32> to vector<2x8x8xf32>
    %68 = arith.truncf %67 : vector<2x8x8xf32> to vector<2x8x8xbf16>
    %69 = vector.extract_strided_slice %10 {offsets = [0, 0, 80], sizes = [2, 8, 8], strides = [1, 1, 1]} : vector<2x8x96xf32> to vector<2x8x8xf32>
    %70 = arith.truncf %69 : vector<2x8x8xf32> to vector<2x8x8xbf16>
    "tpu.trace_start"() <{level = 10 : i32, message = "bqd,bkd->bqk"}> : () -> ()
    %cst_23 = arith.constant dense<0.000000e+00> : vector<2x8x8xf32>
    %71 = tpu.matmul %66, %68, %cst_23 {dimension_numbers = #tpu.dot_dimension_numbers<[2], [2], [1], [1], [0, 0, 0, 1, 1, 1], [0], [0]>} : vector<2x8x8xbf16>, vector<2x8x8xbf16>, vector<2x8x8xf32> -> vector<2x8x8xf32>
    "tpu.trace_stop"() : () -> ()
    %72 = vector.broadcast %11 : vector<2x1x8xf32> to vector<2x8x8xf32>
    %73 = arith.addf %71, %72 : vector<2x8x8xf32>
    %cst_24 = arith.constant dense<0xFF800000> : vector<2x8xf32>
    %74 = vector.multi_reduction <maximumf>, %73, %cst_24 [2] : vector<2x8x8xf32> to vector<2x8xf32>
    %75 = vector.shape_cast %74 : vector<2x8xf32> to vector<2x8x1xf32>
    %76 = vector.broadcast %75 : vector<2x8x1xf32> to vector<2x8x8xf32>
    %77 = arith.subf %73, %76 : vector<2x8x8xf32>
    %78 = math.exp %77 : vector<2x8x8xf32>
    %cst_25 = arith.constant dense<0.000000e+00> : vector<2x8xf32>
    %79 = vector.multi_reduction <add>, %78, %cst_25 [2] : vector<2x8x8xf32> to vector<2x8xf32>
    %80 = vector.shape_cast %79 : vector<2x8xf32> to vector<2x8x1xf32>
    %81 = tpu.reciprocal %80 {approx = true} : vector<2x8x1xf32> -> vector<2x8x1xf32>
    %82 = vector.broadcast %81 : vector<2x8x1xf32> to vector<2x8x8xf32>
    %83 = arith.mulf %78, %82 : vector<2x8x8xf32>
    %84 = arith.truncf %83 : vector<2x8x8xf32> to vector<2x8x8xbf16>
    "tpu.trace_start"() <{level = 10 : i32, message = "bqk,bkd->bqd"}> : () -> ()
    %cst_26 = arith.constant dense<0.000000e+00> : vector<2x8x8xf32>
    %85 = tpu.matmul %84, %70, %cst_26 {dimension_numbers = #tpu.dot_dimension_numbers<[2], [1], [1], [2], [0, 0, 0, 1, 1, 2], [0], [0]>} : vector<2x8x8xbf16>, vector<2x8x8xbf16>, vector<2x8x8xf32> -> vector<2x8x8xf32>
    "tpu.trace_stop"() : () -> ()
    %86 = vector.shape_cast %85 : vector<2x8x8xf32> to vector<16x8xf32>
    %87 = arith.truncf %86 : vector<16x8xf32> to vector<16x8xbf16>
    %c16 = arith.constant 16 : index
    %c0_27 = arith.constant 0 : index
    %88 = vector.load %arg5[%c16, %c0_27] : memref<32x32xbf16, #tpu.memory_space<vmem>>, vector<8x32xbf16>
    %cst_28 = arith.constant dense<0.000000e+00> : vector<16x32xf32>
    %89 = tpu.matmul %87, %88, %cst_28 {dimension_numbers = #tpu.dot_dimension_numbers<[1], [0], [0], [1], [0, 0, 1, 1], [], []>} : vector<16x8xbf16>, vector<8x32xbf16>, vector<16x32xf32> -> vector<16x32xf32>
    %90 = arith.addf %64, %89 : vector<16x32xf32>
    %91 = vector.extract_strided_slice %10 {offsets = [0, 0, 24], sizes = [2, 8, 8], strides = [1, 1, 1]} : vector<2x8x96xf32> to vector<2x8x8xf32>
    %92 = arith.truncf %91 : vector<2x8x8xf32> to vector<2x8x8xbf16>
    %93 = vector.extract_strided_slice %10 {offsets = [0, 0, 56], sizes = [2, 8, 8], strides = [1, 1, 1]} : vector<2x8x96xf32> to vector<2x8x8xf32>
    %94 = arith.truncf %93 : vector<2x8x8xf32> to vector<2x8x8xbf16>
    %95 = vector.extract_strided_slice %10 {offsets = [0, 0, 88], sizes = [2, 8, 8], strides = [1, 1, 1]} : vector<2x8x96xf32> to vector<2x8x8xf32>
    %96 = arith.truncf %95 : vector<2x8x8xf32> to vector<2x8x8xbf16>
    "tpu.trace_start"() <{level = 10 : i32, message = "bqd,bkd->bqk"}> : () -> ()
    %cst_29 = arith.constant dense<0.000000e+00> : vector<2x8x8xf32>
    %97 = tpu.matmul %92, %94, %cst_29 {dimension_numbers = #tpu.dot_dimension_numbers<[2], [2], [1], [1], [0, 0, 0, 1, 1, 1], [0], [0]>} : vector<2x8x8xbf16>, vector<2x8x8xbf16>, vector<2x8x8xf32> -> vector<2x8x8xf32>
    "tpu.trace_stop"() : () -> ()
    %98 = vector.broadcast %11 : vector<2x1x8xf32> to vector<2x8x8xf32>
    %99 = arith.addf %97, %98 : vector<2x8x8xf32>
    %cst_30 = arith.constant dense<0xFF800000> : vector<2x8xf32>
    %100 = vector.multi_reduction <maximumf>, %99, %cst_30 [2] : vector<2x8x8xf32> to vector<2x8xf32>
    %101 = vector.shape_cast %100 : vector<2x8xf32> to vector<2x8x1xf32>
    %102 = vector.broadcast %101 : vector<2x8x1xf32> to vector<2x8x8xf32>
    %103 = arith.subf %99, %102 : vector<2x8x8xf32>
    %104 = math.exp %103 : vector<2x8x8xf32>
    %cst_31 = arith.constant dense<0.000000e+00> : vector<2x8xf32>
    %105 = vector.multi_reduction <add>, %104, %cst_31 [2] : vector<2x8x8xf32> to vector<2x8xf32>
    %106 = vector.shape_cast %105 : vector<2x8xf32> to vector<2x8x1xf32>
    %107 = tpu.reciprocal %106 {approx = true} : vector<2x8x1xf32> -> vector<2x8x1xf32>
    %108 = vector.broadcast %107 : vector<2x8x1xf32> to vector<2x8x8xf32>
    %109 = arith.mulf %104, %108 : vector<2x8x8xf32>
    %110 = arith.truncf %109 : vector<2x8x8xf32> to vector<2x8x8xbf16>
    "tpu.trace_start"() <{level = 10 : i32, message = "bqk,bkd->bqd"}> : () -> ()
    %cst_32 = arith.constant dense<0.000000e+00> : vector<2x8x8xf32>
    %111 = tpu.matmul %110, %96, %cst_32 {dimension_numbers = #tpu.dot_dimension_numbers<[2], [1], [1], [2], [0, 0, 0, 1, 1, 2], [0], [0]>} : vector<2x8x8xbf16>, vector<2x8x8xbf16>, vector<2x8x8xf32> -> vector<2x8x8xf32>
    "tpu.trace_stop"() : () -> ()
    %112 = vector.shape_cast %111 : vector<2x8x8xf32> to vector<16x8xf32>
    %113 = arith.truncf %112 : vector<16x8xf32> to vector<16x8xbf16>
    %c24 = arith.constant 24 : index
    %c0_33 = arith.constant 0 : index
    %114 = vector.load %arg5[%c24, %c0_33] : memref<32x32xbf16, #tpu.memory_space<vmem>>, vector<8x32xbf16>
    %cst_34 = arith.constant dense<0.000000e+00> : vector<16x32xf32>
    %115 = tpu.matmul %113, %114, %cst_34 {dimension_numbers = #tpu.dot_dimension_numbers<[1], [0], [0], [1], [0, 0, 1, 1], [], []>} : vector<16x8xbf16>, vector<8x32xbf16>, vector<16x32xf32> -> vector<16x32xf32>
    %116 = arith.addf %90, %115 : vector<16x32xf32>
    %c0_35 = arith.constant 0 : index
    %c0_36 = arith.constant 0 : index
    %117 = vector.load %arg6[%c0_35, %c0_36] : memref<1x32xf32, #tpu.memory_space<vmem>>, vector<1x32xf32>
    %118 = vector.shape_cast %117 : vector<1x32xf32> to vector<32xf32>
    %119 = vector.shape_cast %118 : vector<32xf32> to vector<1x32xf32>
    %120 = vector.broadcast %119 : vector<1x32xf32> to vector<16x32xf32>
    %121 = arith.addf %116, %120 : vector<16x32xf32>
    %122 = arith.addf %1, %121 : vector<16x32xf32>
    %cst_37 = arith.constant dense<0.000000e+00> : vector<16xf32>
    %123 = vector.multi_reduction <add>, %122, %cst_37 [1] : vector<16x32xf32> to vector<16xf32>
    %124 = vector.shape_cast %123 : vector<16xf32> to vector<16x1xf32>
    %cst_38 = arith.constant 3.200000e+01 : f32
    %125 = vector.broadcast %cst_38 : f32 to vector<16x1xf32>
    %126 = arith.divf %124, %125 : vector<16x1xf32>
    %127 = vector.broadcast %126 : vector<16x1xf32> to vector<16x32xf32>
    %128 = arith.subf %122, %127 : vector<16x32xf32>
    %129 = arith.mulf %128, %128 : vector<16x32xf32>
    %cst_39 = arith.constant dense<0.000000e+00> : vector<16xf32>
    %130 = vector.multi_reduction <add>, %129, %cst_39 [1] : vector<16x32xf32> to vector<16xf32>
    %131 = vector.shape_cast %130 : vector<16xf32> to vector<16x1xf32>
    %cst_40 = arith.constant 3.200000e+01 : f32
    %132 = vector.broadcast %cst_40 : f32 to vector<16x1xf32>
    %133 = arith.divf %131, %132 : vector<16x1xf32>
    %134 = vector.broadcast %126 : vector<16x1xf32> to vector<16x32xf32>
    %135 = arith.subf %122, %134 : vector<16x32xf32>
    %cst_41 = arith.constant 9.99999974E-6 : f32
    %136 = vector.broadcast %cst_41 : f32 to vector<16x1xf32>
    %137 = arith.addf %133, %136 : vector<16x1xf32>
    %138 = math.rsqrt %137 : vector<16x1xf32>
    %139 = vector.broadcast %138 : vector<16x1xf32> to vector<16x32xf32>
    %140 = arith.mulf %135, %139 : vector<16x32xf32>
    %c0_42 = arith.constant 0 : index
    %c0_43 = arith.constant 0 : index
    %141 = vector.load %arg11[%c0_42, %c0_43] : memref<1x32xf32, #tpu.memory_space<vmem>>, vector<1x32xf32>
    %142 = vector.shape_cast %141 : vector<1x32xf32> to vector<32xf32>
    %143 = vector.shape_cast %142 : vector<32xf32> to vector<1x32xf32>
    %144 = vector.broadcast %143 : vector<1x32xf32> to vector<16x32xf32>
    %145 = arith.mulf %140, %144 : vector<16x32xf32>
    %c0_44 = arith.constant 0 : index
    %c0_45 = arith.constant 0 : index
    %146 = vector.load %arg12[%c0_44, %c0_45] : memref<1x32xf32, #tpu.memory_space<vmem>>, vector<1x32xf32>
    %147 = vector.shape_cast %146 : vector<1x32xf32> to vector<32xf32>
    %148 = vector.shape_cast %147 : vector<32xf32> to vector<1x32xf32>
    %149 = vector.broadcast %148 : vector<1x32xf32> to vector<16x32xf32>
    %150 = arith.addf %145, %149 : vector<16x32xf32>
    %151 = arith.truncf %150 : vector<16x32xf32> to vector<16x32xbf16>
    %c0_46 = arith.constant 0 : index
    %c0_47 = arith.constant 0 : index
    %152 = vector.load %arg7[%c0_46, %c0_47] : memref<32x64xbf16, #tpu.memory_space<vmem>>, vector<32x64xbf16>
    %cst_48 = arith.constant dense<0.000000e+00> : vector<16x64xf32>
    %153 = tpu.matmul %151, %152, %cst_48 {dimension_numbers = #tpu.dot_dimension_numbers<[1], [0], [0], [1], [0, 0, 1, 1], [], []>} : vector<16x32xbf16>, vector<32x64xbf16>, vector<16x64xf32> -> vector<16x64xf32>
    %c0_49 = arith.constant 0 : index
    %c0_50 = arith.constant 0 : index
    %154 = vector.load %arg8[%c0_49, %c0_50] : memref<1x64xf32, #tpu.memory_space<vmem>>, vector<1x64xf32>
    %155 = vector.shape_cast %154 : vector<1x64xf32> to vector<64xf32>
    %156 = vector.shape_cast %155 : vector<64xf32> to vector<1x64xf32>
    %157 = vector.broadcast %156 : vector<1x64xf32> to vector<16x64xf32>
    %158 = arith.addf %153, %157 : vector<16x64xf32>
    %cst_51 = arith.constant 0.000000e+00 : f32
    %159 = vector.broadcast %cst_51 : f32 to vector<16x64xf32>
    %160 = arith.maximumf %158, %159 : vector<16x64xf32>
    %161 = arith.truncf %160 : vector<16x64xf32> to vector<16x64xbf16>
    %c0_52 = arith.constant 0 : index
    %c0_53 = arith.constant 0 : index
    %162 = vector.load %arg9[%c0_52, %c0_53] : memref<64x32xbf16, #tpu.memory_space<vmem>>, vector<64x32xbf16>
    %cst_54 = arith.constant dense<0.000000e+00> : vector<16x32xf32>
    %163 = tpu.matmul %161, %162, %cst_54 {dimension_numbers = #tpu.dot_dimension_numbers<[1], [0], [0], [1], [0, 0, 1, 1], [], []>} : vector<16x64xbf16>, vector<64x32xbf16>, vector<16x32xf32> -> vector<16x32xf32>
    %c0_55 = arith.constant 0 : index
    %c0_56 = arith.constant 0 : index
    %164 = vector.load %arg10[%c0_55, %c0_56] : memref<1x32xf32, #tpu.memory_space<vmem>>, vector<1x32xf32>
    %165 = vector.shape_cast %164 : vector<1x32xf32> to vector<32xf32>
    %166 = vector.shape_cast %165 : vector<32xf32> to vector<1x32xf32>
    %167 = vector.broadcast %166 : vector<1x32xf32> to vector<16x32xf32>
    %168 = arith.addf %163, %167 : vector<16x32xf32>
    %169 = arith.addf %150, %168 : vector<16x32xf32>
    %cst_57 = arith.constant dense<0.000000e+00> : vector<16xf32>
    %170 = vector.multi_reduction <add>, %169, %cst_57 [1] : vector<16x32xf32> to vector<16xf32>
    %171 = vector.shape_cast %170 : vector<16xf32> to vector<16x1xf32>
    %cst_58 = arith.constant 3.200000e+01 : f32
    %172 = vector.broadcast %cst_58 : f32 to vector<16x1xf32>
    %173 = arith.divf %171, %172 : vector<16x1xf32>
    %174 = vector.broadcast %173 : vector<16x1xf32> to vector<16x32xf32>
    %175 = arith.subf %169, %174 : vector<16x32xf32>
    %176 = arith.mulf %175, %175 : vector<16x32xf32>
    %cst_59 = arith.constant dense<0.000000e+00> : vector<16xf32>
    %177 = vector.multi_reduction <add>, %176, %cst_59 [1] : vector<16x32xf32> to vector<16xf32>
    %178 = vector.shape_cast %177 : vector<16xf32> to vector<16x1xf32>
    %cst_60 = arith.constant 3.200000e+01 : f32
    %179 = vector.broadcast %cst_60 : f32 to vector<16x1xf32>
    %180 = arith.divf %178, %179 : vector<16x1xf32>
    %181 = vector.broadcast %173 : vector<16x1xf32> to vector<16x32xf32>
    %182 = arith.subf %169, %181 : vector<16x32xf32>
    %cst_61 = arith.constant 9.99999974E-6 : f32
    %183 = vector.broadcast %cst_61 : f32 to vector<16x1xf32>
    %184 = arith.addf %180, %183 : vector<16x1xf32>
    %185 = math.rsqrt %184 : vector<16x1xf32>
    %186 = vector.broadcast %185 : vector<16x1xf32> to vector<16x32xf32>
    %187 = arith.mulf %182, %186 : vector<16x32xf32>
    %c0_62 = arith.constant 0 : index
    %c0_63 = arith.constant 0 : index
    %188 = vector.load %arg13[%c0_62, %c0_63] : memref<1x32xf32, #tpu.memory_space<vmem>>, vector<1x32xf32>
    %189 = vector.shape_cast %188 : vector<1x32xf32> to vector<32xf32>
    %190 = vector.shape_cast %189 : vector<32xf32> to vector<1x32xf32>
    %191 = vector.broadcast %190 : vector<1x32xf32> to vector<16x32xf32>
    %192 = arith.mulf %187, %191 : vector<16x32xf32>
    %c0_64 = arith.constant 0 : index
    %c0_65 = arith.constant 0 : index
    %193 = vector.load %arg14[%c0_64, %c0_65] : memref<1x32xf32, #tpu.memory_space<vmem>>, vector<1x32xf32>
    %194 = vector.shape_cast %193 : vector<1x32xf32> to vector<32xf32>
    %195 = vector.shape_cast %194 : vector<32xf32> to vector<1x32xf32>
    %196 = vector.broadcast %195 : vector<1x32xf32> to vector<16x32xf32>
    %197 = arith.addf %192, %196 : vector<16x32xf32>
    %198 = vector.shape_cast %197 : vector<16x32xf32> to vector<2x8x32xf32>
    %c0_66 = arith.constant 0 : index
    %c0_67 = arith.constant 0 : index
    %c0_68 = arith.constant 0 : index
    %199 = vector.load %arg15[%c0_66, %c0_67, %c0_68] : memref<2x8x32xf32, #tpu.memory_space<vmem>>, vector<2x8x32xf32>
    tpu.vector_store %arg15[%c0_66, %c0_67, %c0_68], %198 {strides = array<i32>} : memref<2x8x32xf32, #tpu.memory_space<vmem>>, vector<2x8x32xf32>,
    return
  }
  func.func @transform_0(%arg0: i32) -> (i32, i32, i32) {
    %c0_i32 = arith.constant 0 : i32
    %c0_i32_0 = arith.constant 0 : i32
    %c0_i32_1 = arith.constant 0 : i32
    return %arg0, %c0_i32, %c0_i32_0 : i32, i32, i32
  }
  func.func @transform_1(%arg0: i32) -> (i32, i32, i32) {
    %c0_i32 = arith.constant 0 : i32
    %c0_i32_0 = arith.constant 0 : i32
    %c0_i32_1 = arith.constant 0 : i32
    return %arg0, %c0_i32, %c0_i32_0 : i32, i32, i32
  }
  func.func @transform_2(%arg0: i32) -> (i32, i32) {
    %c0_i32 = arith.constant 0 : i32
    %c0_i32_0 = arith.constant 0 : i32
    %c0_i32_1 = arith.constant 0 : i32
    return %c0_i32, %c0_i32_0 : i32, i32
  }
  func.func @transform_3(%arg0: i32) -> (i32, i32) {
    %c0_i32 = arith.constant 0 : i32
    %c0_i32_0 = arith.constant 0 : i32
    %c0_i32_1 = arith.constant 0 : i32
    return %c0_i32, %c0_i32_0 : i32, i32
  }
  func.func @transform_4(%arg0: i32) -> (i32, i32) {
    %c0_i32 = arith.constant 0 : i32
    %c0_i32_0 = arith.constant 0 : i32
    %c0_i32_1 = arith.constant 0 : i32
    return %c0_i32, %c0_i32_0 : i32, i32
  }
  func.func @transform_5(%arg0: i32) -> (i32, i32) {
    %c0_i32 = arith.constant 0 : i32
    %c0_i32_0 = arith.constant 0 : i32
    %c0_i32_1 = arith.constant 0 : i32
    return %c0_i32, %c0_i32_0 : i32, i32
  }
  func.func @transform_6(%arg0: i32) -> (i32, i32) {
    %c0_i32 = arith.constant 0 : i32
    %c0_i32_0 = arith.constant 0 : i32
    %c0_i32_1 = arith.constant 0 : i32
    return %c0_i32, %c0_i32_0 : i32, i32
  }
  func.func @transform_7(%arg0: i32) -> (i32, i32) {
    %c0_i32 = arith.constant 0 : i32
    %c0_i32_0 = arith.constant 0 : i32
    %c0_i32_1 = arith.constant 0 : i32
    return %c0_i32, %c0_i32_0 : i32, i32
  }
  func.func @transform_8(%arg0: i32) -> (i32, i32) {
    %c0_i32 = arith.constant 0 : i32
    %c0_i32_0 = arith.constant 0 : i32
    %c0_i32_1 = arith.constant 0 : i32
    return %c0_i32, %c0_i32_0 : i32, i32
  }
  func.func @transform_9(%arg0: i32) -> (i32, i32) {
    %c0_i32 = arith.constant 0 : i32
    %c0_i32_0 = arith.constant 0 : i32
    %c0_i32_1 = arith.constant 0 : i32
    return %c0_i32, %c0_i32_0 : i32, i32
  }
  func.func @transform_10(%arg0: i32) -> (i32, i32) {
    %c0_i32 = arith.constant 0 : i32
    %c0_i32_0 = arith.constant 0 : i32
    %c0_i32_1 = arith.constant 0 : i32
    return %c0_i32, %c0_i32_0 : i32, i32
  }
  func.func @transform_11(%arg0: i32) -> (i32, i32) {
    %c0_i32 = arith.constant 0 : i32
    %c0_i32_0 = arith.constant 0 : i32
    %c0_i32_1 = arith.constant 0 : i32
    return %c0_i32, %c0_i32_0 : i32, i32
  }
  func.func @transform_12(%arg0: i32) -> (i32, i32) {
    %c0_i32 = arith.constant 0 : i32
    %c0_i32_0 = arith.constant 0 : i32
    %c0_i32_1 = arith.constant 0 : i32
    return %c0_i32, %c0_i32_0 : i32, i32
  }
  func.func @transform_13(%arg0: i32) -> (i32, i32) {
    %c0_i32 = arith.constant 0 : i32
    %c0_i32_0 = arith.constant 0 : i32
    %c0_i32_1 = arith.constant 0 : i32
    return %c0_i32, %c0_i32_0 : i32, i32
  }
  func.func @transform_14(%arg0: i32) -> (i32, i32, i32) {
    %c0_i32 = arith.constant 0 : i32
    %c0_i32_0 = arith.constant 0 : i32
    %c0_i32_1 = arith.constant 0 : i32
    return %arg0, %c0_i32, %c0_i32_0 : i32, i32, i32
  }
}

</mosaic_0001>

<bundles_post_ra>
// kernel: tpu_custom_call.1
= control target key start
LH: loop header
LB: loop body
LE: loop exit
PB: predicated region body
PF: predicated region fallthrough
CT: control target
= control target key end

     0   :  { %19 = vsyncpa [#allocation3], 0  ;;  %s2280_s0 = inlined_call_operand.vmem [shape: f32[2,8,32], index: 0, kind: input, shape index: {}]   ;;  %s2281_s1 = inlined_call_operand.hbm [shape: f32[2,1,8], index: 1, kind: input, shape index: {}]   ;;  %s2282_s2 = inlined_call_operand.vmem [shape: bf16[32,96], index: 2, kind: input, shape index: {}]   ;;  %s2283_s3 = inlined_call_operand.vmem [shape: f32[1,96], index: 3, kind: input, shape index: {}]   ;;  %s2284_s4 = inlined_call_operand.vmem [shape: bf16[32,32], index: 4, kind: input, shape index: {}]   ;;  %s2285_s5 = inlined_call_operand.vmem [shape: f32[1,32], index: 5, kind: input, shape index: {}]   ;;  %s2286_s6 = inlined_call_operand.hbm [shape: bf16[32,64], index: 6, kind: input, shape index: {}]   ;;  %s2287_s7 = inlined_call_operand.vmem [shape: f32[1,64], index: 7, kind: input, shape index: {}]   ;;  %s2288_s8 = inlined_call_operand.vmem [shape: bf16[64,32], index: 8, kind: input, shape index: {}]   ;;  %s2289_s9 = inlined_call_operand.vmem [shape: f32[1,32], index: 9, kind: input, shape index: {}]   ;;  %s2290_s10 = inlined_call_operand.vmem [shape: f32[1,32], index: 10, kind: input, shape index: {}]   ;;  %s2291_s11 = inlined_call_operand.vmem [shape: f32[1,32], index: 11, kind: input, shape index: {}]   ;;  %s2292_s12 = inlined_call_operand.vmem [shape: f32[1,32], index: 12, kind: input, shape index: {}]   ;;  %s2293_s13 = inlined_call_operand.vmem [shape: f32[1,32], index: 13, kind: input, shape index: {}]   ;;  %s2294_s14 = inlined_call_operand.hbm [shape: f32[2,8,32], index: 14, kind: output, shape index: {}]  }
   0x1   :  { %20 = vsyncpa [#allocation6], 0 }
   0x2   :  { %21 = vsyncpa [#allocation4], 0  ;;  %s1896_s29 = smov [#allocation2]  }
   0x3   :  { %s29_s30 = sshll.u32 %s1896_s29, 4  ;;  %s30_s30 = int_to_ptr.vmem [resolvable:$true] %s29_s30 }
   0x4   :  { %s1838_s15 = scalar_lea.vmem %s30_s30, 32  ;;  %p1843_p1 = scmp.lt.s32.totalorder %s30_s30, %s30_s30 }
   0x5   :  { %p1839_p0 = scmp.ne.s32.totalorder %s30_s30, %s1838_s15  ;;  %p1844_p2 = scmp.lt.s32.totalorder %s1838_s15, %s1838_s15 }
   0x7   :  { %p1845_p3 = por %p1844_p2, %p1843_p1 }
   0x9   :  { %p1846_p4 = pnand %p1845_p3, %p1839_p0 }
   0xb   :  { %1849 = shalt.err (!%p1846_p4)
}
   0xc   :  { %s1897_s16 = smov 16   ;;  %s1898_s17 = smov 1  }
   0xd   :  { %35 = dma.hbm_to_vmem [thread:$0]  %s2281_s1, 32, %s30_s30, [#allocation3], %s1897_s16, %s1897_s16, %s1898_s17  }
   0xe   :  { %s1899_s20 = smov [#allocation5]  }
   0xf   :  { %s49_s21 = sshll.u32 %s1899_s20, 4  ;;  %s50_s21 = int_to_ptr.vmem [resolvable:$true] %s49_s21 }
  0x10   :  { %s1858_s22 = scalar_lea.vmem %s50_s21, 256  ;;  %p1863_p6 = scmp.lt.s32.totalorder %s50_s21, %s50_s21 }
  0x11   :  { %p1859_p5 = scmp.ne.s32.totalorder %s50_s21, %s1858_s22  ;;  %p1864_p7 = scmp.lt.s32.totalorder %s1858_s22, %s1858_s22 }
  0x13   :  { %p1865_p8 = por %p1864_p7, %p1863_p6 }
  0x15   :  { %p1866_p9 = pnand %p1865_p8, %p1859_p5 }
  0x17   :  { %1869 = shalt.err (!%p1866_p9)
}
  0x18   :  { %s1900_s23 = smov 64   ;;  %s1901_s24 = smov 4  }
  0x19   :  { %55 = dma.hbm_to_vmem [thread:$0]  %s2286_s6, 256, %s50_s21, [#allocation6], %s1900_s23, %s1900_s23, %s1901_s24  }
  0x1a   :  { %1890 = dma.done.wait [#allocation3], 32  }
  0x1b   :  { %1891 = vsyncadd [#allocation3], 4294967264 }
  0x1c   :  { %1892 = dma.done.wait [#allocation6], 256  }
  0x1d   :  { %1893 = vsyncadd [#allocation6], 4294967040  ;;  %v1902_v0 = vmov 0.0   ;;  %vm1903_vm0 = vmmov 0   ;;  %v1782_v1 = vld [vmem:[%s2282_s2 + $0x8] sm:$0xff]   ;;  %v1783_v2 = vld [vmem:[%s2282_s2] sm:$0xff]  }
  0x1e   :  { %1613 = vmatprep.subr.bf16.mxu1 %v1902_v0  ;;  %1617 = vmatprep.mubr.msk.bf16.mxu1 %vm1903_vm0, %v1902_v0  ;;  %v2015_v3 = vld [vmem:[%s2280_s0] sm:$0xff]  ;;  %v2020_v4 = vld [vmem:[%s2280_s0 + $0x8] sm:$0xff]  ;;  %vm103_vm1 = vcmask 261120   ;;  %s1904_s0 = smov 96   ;;  %vm167_vm2 = vcmask 64512   ;;  %vm292_vm3 = vcmask 1043456  }
  0x1f   :  { %1627 = vmatprep.subr.bf16.mxu0 %v1902_v0  ;;  %1629 = vmatprep.mubr.msk.bf16.mxu0 %vm1903_vm0, %v1902_v0  ;;  %v79_v5 = vpack.c.bf16 %v2020_v4, %v2015_v3  ;;  %v1521_v6 = vld [vmem:[%s2283_s3] ss:$0 sm:$0xff]  ;;  %v2053_v23 = vld [vmem:[#allocation2 + $0x1] ss:$0 sm:$0xff]  ;;  %s1905_s3 = smov 88   ;;  %s1906_s18 = smov 120  }
  0x20   :  { %1614 = vmatpush3.bf16.msra.mxu1 %v1782_v1  ;;  %v2050_v19 = vld [vmem:[#allocation2] ss:$0 sm:$0xff]  ;;  %s1907_s19 = smov 56   ;;  %s1908_s20 = smov 112   ;;  %vm1410_vm4 = vcmask 523264  }
  0x21   :  { %1615 = vmatprep.subr.bf16.mxu1 %v1902_v0  ;;  %s1909_s21 = smov 80   ;;  %s1910_s26 = smov 48  }
  0x22   :  { %s1911_s1 = smov 72   ;;  %s1912_s27 = smov 104  }
  0x23   :  { %s1913_s29 = smov 40  }
  0x24   :  { %1616 = vmatpush3.bf16.msra.mxu1 %v1783_v2 }
  0x25   :  { %1621 = vmatprep.subr.bf16.mxu1 %v1902_v0 }
  0x27   :  { %1618 = vmatmul.mubr.msk.bf16.vlgmr.msra.gmra.mxu1 %vm103_vm1, %v79_v5 }
  0x28   :  { %1623 = vmatprep.mubr.msk.bf16.mxu1 %vm1903_vm0, %v1902_v0 }
  0xe7   :  { %v141_v7 = vpop.f32.mrf.mxu1 }
  0xe8   :  { %v142_v8 = vadd.f32 %v1521_v6, %v141_v7 }
  0xe9   :  { %v1619_v9 = vpop.f32.mrf.mxu1 }
  0xea   :  { %v2032_v10 = vpack.c.bf16 %v142_v8, %v142_v8 }
  0xeb   :  { %v144_v11 = vpop.f32.mrf.mxu1 }
  0xec   :  { %v145_v12 = vadd.f32 %v1521_v6, %v144_v11  ;;  %165 = vrot.lane.b32.xlu0 %v2032_v10, %s1904_s0 }
  0xed   :  { %v1620_v13 = vpop.f32.mrf.mxu1 }
  0xee   :  { %v2035_v14 = vpack.c.bf16 %v145_v12, %v145_v12 }
  0xf0   :  { %215 = vrot.lane.b32.xlu0 %v2035_v14, %s1904_s0 }
 0x15e   :  { %v166_v15 = vpop.permute.xlu0 %165 }
 0x15f   :  { %v172_v16 = vsel %vm167_vm2, %v166_v15, 0 }
 0x160   :  { %1622 = vmatpush3.bf16.xpose.msra.mxu1 %v172_v16 }
 0x161   :  { %1633 = vmatprep.subr.bf16.mxu1 %v1902_v0 }
 0x162   :  { %v216_v17 = vpop.permute.xlu0 %215 }
 0x163   :  { %v221_v18 = vsel %vm167_vm2, %v216_v17, 0 }
 0x164   :  { %1628 = vmatpush3.bf16.xpose.msra.mxu0 %v221_v18 }
 0x165   :  { %1639 = vmatprep.subr.bf16.mxu0 %v1902_v0 }
 0x167   :  { %1624 = vmatmul.mubr.msk.bf16.vlgmr.msra.gmra.mxu1 %vm167_vm2, %v2032_v10 }
 0x168   :  { %1635 = vmatprep.mubr.msk.bf16.mxu1 %vm1903_vm0, %v1902_v0 }
 0x16b   :  { %1630 = vmatmul.mubr.msk.bf16.vlgmr.msra.gmra.mxu0 %vm167_vm2, %v2035_v14 }
 0x16c   :  { %1641 = vmatprep.mubr.msk.bf16.mxu0 %vm1903_vm0, %v1902_v0 }
 0x227   :  { %v208_v20 = vpop.f32.mrf.mxu1 }
 0x228   :  { %v209_v21 = vadd.f32 %v2050_v19, %v208_v20 }
 0x229   :  { %v1625_v22 = vpop.f32.mrf.mxu1 }
 0x22a   :  { %v263_v24 = vsel %vm167_vm2, %v209_v21, -inf }
 0x22b   :  { %v257_v25 = vpop.f32.mrf.mxu0  ;;  %264 = vmax.xlane.f32.xlu1 %v263_v24  ;;  %v211_v26 = vpop.f32.mrf.mxu1 }
 0x22c   :  { %v258_v27 = vadd.f32 %v2053_v23, %v257_v25 }
 0x22d   :  { %v1626_v28 = vpop.f32.mrf.mxu1  ;;  %v1631_v29 = vpop.f32.mrf.mxu0 }
 0x22e   :  { %v266_v30 = vsel %vm167_vm2, %v258_v27, -inf }
 0x22f   :  { %v260_v31 = vpop.f32.mrf.mxu0  ;;  %267 = vmax.xlane.f32.xlu1 %v266_v30 }
 0x231   :  { %v1632_v32 = vpop.f32.mrf.mxu0 }
 0x240   :  { %287 = vrot.lane.b32.xlu1 %v2032_v10, %s1900_s23 }
 0x244   :  { %336 = vrot.lane.b32.xlu1 %v2035_v14, %s1900_s23 }
 0x248   :  { %388 = vrot.lane.b32.xlu1 %v2032_v10, %s1905_s3 }
 0x2b4   :  { %v265_v33 = vpop.xlane.xlu1 %264 }
 0x2b5   :  { %v269_v34 = vsub.f32 %v209_v21, %v265_v33 }
 0x2b7   :  { %v271_v35 = vmul.f32 1.442695, %v269_v34 }
 0x2b8   :  { %v268_v36 = vpop.xlane.xlu1 %267 }
 0x2b9   :  { %1790 = vpow2.f32 %v271_v35  ;;  %v270_v37 = vsub.f32 %v258_v27, %v268_v36 }
 0x2bb   :  { %v273_v38 = vmul.f32 1.442695, %v270_v37 }
 0x2bc   :  { %v288_v39 = vpop.permute.xlu1 %287 }
 0x2bd   :  { %1792 = vpow2.f32 %v273_v38  ;;  %v294_v40 = vsel %vm292_vm3, %v288_v39, 0 }
 0x2be   :  { %1634 = vmatpush3.bf16.msra.mxu1 %v294_v40 }
 0x2bf   :  { %1645 = vmatprep.subr.bf16.mxu1 %v1902_v0 }
 0x2c0   :  { %v337_v41 = vpop.permute.xlu1 %336 }
 0x2c1   :  { %v342_v42 = vsel %vm292_vm3, %v337_v41, 0 }
 0x2c2   :  { %1640 = vmatpush3.bf16.msra.mxu0 %v342_v42 }
 0x2c3   :  { %1651 = vmatprep.subr.bf16.mxu0 %v1902_v0 }
 0x2c4   :  { %v389_v47 = vpop.permute.xlu1 %388 }
 0x2c5   :  { %v394_v54 = vsel %vm167_vm2, %v389_v47, 0 }
 0x2c6   :  { %v1791_v43 = vpop.eup %1790 }
 0x2c7   :  { %v275_v44 = vsel %vm167_vm2, %v1791_v43, 0.0 }
 0x2c8   :  { %276 = vadd.xlane.f32.xlu0 %v275_v44 }
 0x2ca   :  { %v1793_v45 = vpop.eup %1792 }
 0x2cb   :  { %v278_v46 = vsel %vm167_vm2, %v1793_v45, 0.0 }
 0x2cc   :  { %279 = vadd.xlane.f32.xlu1 %v278_v46 }
 0x2dd   :  { %438 = vrot.lane.b32.xlu1 %v2035_v14, %s1905_s3 }
 0x2de   :  { %386 = vrot.lane.b32.xlu0 %v2032_v10, %s1906_s18 }
 0x2e1   :  { %436 = vrot.lane.b32.xlu1 %v2035_v14, %s1906_s18 }
 0x351   :  { %v277_v48 = vpop.xlane.xlu0 %276 }
 0x352   :  { %1794 = vrcp.f32 %v277_v48 }
 0x355   :  { %v280_v49 = vpop.xlane.xlu1 %279  ;;  %v387_v59 = vpop.permute.xlu0 %386 }
 0x356   :  { %1796 = vrcp.f32 %v280_v49 }
 0x359   :  { %v439_v56 = vpop.permute.xlu1 %438 }
 0x35a   :  { %v444_v58 = vsel %vm167_vm2, %v439_v56, 0 }
 0x35d   :  { %v437_v60 = vpop.permute.xlu1 %436 }
 0x35f   :  { %v1795_v50 = vpop.eup %1794 }
 0x360   :  { %v283_v51 = vmul.f32 %v1795_v50, %v1791_v43 }
 0x362   :  { %v285_v52 = vpack.c.bf16 %v283_v51, %v283_v51 }
 0x363   :  { %v1797_v53 = vpop.eup %1796 }
 0x364   :  { %1636 = vmatmul.mubr.msk.bf16.vlgmr.msra.gmra.mxu1 %vm167_vm2, %v285_v52  ;;  %v284_v55 = vmul.f32 %v1797_v53, %v1793_v45  ;;  %v385_v45 = vld [vmem:[%s2284_s4] sm:$0xf]  ;;  %v607_v53 = vld [vmem:[%s2284_s4 + $0x4] sm:$0xf] }
 0x365   :  { %1646 = vmatpush3.bf16.xpose.msra.mxu1 %v394_v54  ;;  %1647 = vmatprep.mubr.msk.bf16.mxu1 %vm1903_vm0, %v1902_v0  ;;  %v659_v48 = vsel %vm292_vm3, %v385_v45, 0  ;;  %v612_v54 = vsel %vm292_vm3, %v607_v53, 0 }
 0x366   :  { %v286_v57 = vpack.c.bf16 %v284_v55, %v284_v55  ;;  %1657 = vmatprep.subr.bf16.mxu1 %v1902_v0 }
 0x368   :  { %1642 = vmatmul.mubr.msk.bf16.vlgmr.msra.gmra.mxu0 %vm167_vm2, %v286_v57 }
 0x369   :  { %1652 = vmatpush3.bf16.xpose.msra.mxu0 %v444_v58  ;;  %1653 = vmatprep.mubr.msk.bf16.mxu0 %vm1903_vm0, %v1902_v0 }
 0x36a   :  { %1663 = vmatprep.subr.bf16.mxu0 %v1902_v0 }
 0x36c   :  { %1648 = vmatmul.mubr.msk.bf16.vlgmr.msra.gmra.mxu1 %vm167_vm2, %v387_v59 }
 0x36d   :  { %1659 = vmatprep.mubr.msk.bf16.mxu1 %vm1903_vm0, %v1902_v0 }
 0x370   :  { %1654 = vmatmul.mubr.msk.bf16.vlgmr.msra.gmra.mxu0 %vm167_vm2, %v437_v60 }
 0x371   :  { %1665 = vmatprep.mubr.msk.bf16.mxu0 %vm1903_vm0, %v1902_v0 }
 0x424   :  { %v2088_v61 = vpop.f32.mrf.mxu1 }
 0x426   :  { %v1637_v62 = vpop.f32.mrf.mxu1 }
 0x428   :  { %v333_v63 = vpop.f32.mrf.mxu1  ;;  %v2090_v1 = vpop.f32.mrf.mxu0 }
 0x429   :  { %v384_v2 = vpack.c.bf16 %v2090_v1, %v2088_v61 }
 0x42a   :  { %v1638_v5 = vpop.f32.mrf.mxu1  ;;  %v1643_v6 = vpop.f32.mrf.mxu0 }
 0x42c   :  { %v381_v7 = vpop.f32.mrf.mxu0  ;;  %v430_v8 = vpop.f32.mrf.mxu1 }
 0x42d   :  { %v431_v9 = vadd.f32 %v2050_v19, %v430_v8 }
 0x42e   :  { %v1644_v11 = vpop.f32.mrf.mxu0  ;;  %v1649_v12 = vpop.f32.mrf.mxu1 }
 0x42f   :  { %v486_v13 = vsel %vm167_vm2, %v431_v9, -inf }
 0x430   :  { %v480_v15 = vpop.f32.mrf.mxu0  ;;  %487 = vmax.xlane.f32.xlu1 %v486_v13  ;;  %v433_v16 = vpop.f32.mrf.mxu1 }
 0x431   :  { %v481_v17 = vadd.f32 %v2053_v23, %v480_v15 }
 0x432   :  { %v1650_v18 = vpop.f32.mrf.mxu1  ;;  %v1655_v20 = vpop.f32.mrf.mxu0 }
 0x433   :  { %v489_v21 = vsel %vm167_vm2, %v481_v17, -inf }
 0x434   :  { %490 = vmax.xlane.f32.xlu0 %v489_v21  ;;  %v483_v22 = vpop.f32.mrf.mxu0 }
 0x436   :  { %v1656_v24 = vpop.f32.mrf.mxu0 }
 0x44a   :  { %558 = vrot.lane.b32.xlu0 %v2035_v14, %s1907_s19 }
 0x44e   :  { %702 = vrot.lane.b32.xlu0 %v2032_v10, %s1908_s20 }
 0x4b9   :  { %v488_v25 = vpop.xlane.xlu1 %487 }
 0x4ba   :  { %v492_v26 = vsub.f32 %v431_v9, %v488_v25 }
 0x4bc   :  { %v494_v27 = vmul.f32 1.442695, %v492_v26 }
 0x4bd   :  { %v491_v28 = vpop.xlane.xlu0 %490 }
 0x4be   :  { %1798 = vpow2.f32 %v494_v27  ;;  %v493_v29 = vsub.f32 %v481_v17, %v491_v28 }
 0x4c0   :  { %v496_v30 = vmul.f32 1.442695, %v493_v29 }
 0x4c1   :  { %v559_v31 = vpop.permute.xlu0 %558 }
 0x4c2   :  { %1800 = vpow2.f32 %v496_v30  ;;  %v564_v32 = vsel %vm292_vm3, %v559_v31, 0 }
 0x4c3   :  { %1664 = vmatpush3.bf16.msra.mxu0 %v564_v32 }
 0x4c4   :  { %1675 = vmatprep.subr.bf16.mxu0 %v1902_v0 }
 0x4c5   :  { %v703_v5 = vpop.permute.xlu0 %702 }
 0x4cb   :  { %v1799_v33 = vpop.eup %1798 }
 0x4cc   :  { %v498_v34 = vsel %vm167_vm2, %v1799_v33, 0.0 }
 0x4cd   :  { %499 = vadd.xlane.f32.xlu1 %v498_v34 }
 0x4cf   :  { %v1801_v35 = vpop.eup %1800 }
 0x4d0   :  { %v501_v36 = vsel %vm167_vm2, %v1801_v35, 0.0 }
 0x4d1   :  { %502 = vadd.xlane.f32.xlu1 %v501_v36 }
 0x4e2   :  { %510 = vrot.lane.b32.xlu1 %v2032_v10, %s1907_s19 }
 0x4e6   :  { %704 = vrot.lane.b32.xlu1 %v2032_v10, %s1909_s21 }
 0x4ea   :  { %754 = vrot.lane.b32.xlu1 %v2035_v14, %s1909_s21 }
 0x4ee   :  { %752 = vrot.lane.b32.xlu1 %v2035_v14, %s1908_s20 }
 0x556   :  { %v500_v37 = vpop.xlane.xlu1 %499 }
 0x557   :  { %1802 = vrcp.f32 %v500_v37 }
 0x55a   :  { %v503_v38 = vpop.xlane.xlu1 %502 }
 0x55b   :  { %1804 = vrcp.f32 %v503_v38 }
 0x55e   :  { %v511_v39 = vpop.permute.xlu1 %510 }
 0x55f   :  { %v516_v40 = vsel %vm292_vm3, %v511_v39, 0 }
 0x560   :  { %1658 = vmatpush3.bf16.msra.mxu1 %v516_v40 }
 0x561   :  { %1669 = vmatprep.subr.bf16.mxu1 %v1902_v0 }
 0x562   :  { %v705_v49 = vpop.permute.xlu1 %704 }
 0x563   :  { %v710_v62 = vsel %vm167_vm2, %v705_v49, 0 }
 0x564   :  { %v1803_v41 = vpop.eup %1802 }
 0x565   :  { %v506_v42 = vmul.f32 %v1803_v41, %v1799_v33 }
 0x566   :  { %v755_v50 = vpop.permute.xlu1 %754 }
 0x567   :  { %v508_v43 = vpack.c.bf16 %v506_v42, %v506_v42  ;;  %v760_v51 = vsel %vm167_vm2, %v755_v50, 0 }
 0x568   :  { %v1805_v44 = vpop.eup %1804 }
 0x569   :  { %1660 = vmatmul.mubr.msk.bf16.vlgmr.msra.gmra.mxu1 %vm167_vm2, %v508_v43  ;;  %v507_v46 = vmul.f32 %v1805_v44, %v1801_v35 }
 0x56a   :  { %1671 = vmatprep.mubr.msk.bf16.mxu1 %vm1903_vm0, %v1902_v0  ;;  %v753_v52 = vpop.permute.xlu1 %752  ;;  %1670 = vmatpush3.bf16.msra.mxu1 %v612_v54  ;;  %v923_v54 = vld [vmem:[%s2284_s4 + $0x8] sm:$0xf] }
 0x56b   :  { %v509_v47 = vpack.c.bf16 %v507_v46, %v507_v46  ;;  %1681 = vmatprep.subr.bf16.mxu1 %v1902_v0 }
 0x56d   :  { %1666 = vmatmul.mubr.msk.bf16.vlgmr.msra.gmra.mxu0 %vm167_vm2, %v509_v47 }
 0x56e   :  { %1676 = vmatpush3.bf16.msra.mxu0 %v659_v48  ;;  %1677 = vmatprep.mubr.msk.bf16.mxu0 %vm1903_vm0, %v1902_v0 }
 0x56f   :  { %1687 = vmatprep.subr.bf16.mxu0 %v1902_v0 }
 0x575   :  { %1678 = vmatmul.mubr.msk.bf16.vlgmr.msra.gmra.mxu0 %vm167_vm2, %v384_v2 }
 0x576   :  { %1688 = vmatpush3.bf16.xpose.msra.mxu0 %v760_v51  ;;  %1689 = vmatprep.mubr.msk.bf16.mxu0 %vm1903_vm0, %v1902_v0 }
 0x577   :  { %1699 = vmatprep.subr.bf16.mxu0 %v1902_v0 }
 0x57d   :  { %1690 = vmatmul.mubr.msk.bf16.vlgmr.msra.gmra.mxu0 %vm167_vm2, %v753_v52 }
 0x57e   :  { %1701 = vmatprep.mubr.msk.bf16.mxu0 %vm1903_vm0, %v1902_v0 }
 0x629   :  { %v552_v55 = vpop.f32.mrf.mxu1 }
 0x62b   :  { %v1661_v56 = vpop.f32.mrf.mxu1 }
 0x62d   :  { %v555_v57 = vpop.f32.mrf.mxu1  ;;  %v600_v58 = vpop.f32.mrf.mxu0 }
 0x62e   :  { %v606_v59 = vpack.c.bf16 %v600_v58, %v552_v55  ;;  %v928_v55 = vsel %vm292_vm3, %v923_v54, 0 }
 0x62f   :  { %v1662_v60 = vpop.f32.mrf.mxu1  ;;  %v1667_v61 = vpop.f32.mrf.mxu0 }
 0x630   :  { %1672 = vmatmul.mubr.msk.bf16.vlgmr.msra.gmra.mxu1 %vm167_vm2, %v606_v59 }
 0x631   :  { %1682 = vmatpush3.bf16.xpose.msra.mxu1 %v710_v62  ;;  %v603_v63 = vpop.f32.mrf.mxu0  ;;  %1683 = vmatprep.mubr.msk.bf16.mxu1 %vm1903_vm0, %v1902_v0 }
 0x632   :  { %1693 = vmatprep.subr.bf16.mxu1 %v1902_v0 }
 0x633   :  { %v1668_v1 = vpop.f32.mrf.mxu0 }
 0x635   :  { %v2142_v2 = vpop.f32.mrf.mxu0 }
 0x637   :  { %v1679_v6 = vpop.f32.mrf.mxu0 }
 0x638   :  { %1684 = vmatmul.mubr.msk.bf16.vlgmr.msra.gmra.mxu1 %vm167_vm2, %v703_v5 }
 0x639   :  { %v2145_v7 = vpop.f32.mrf.mxu0  ;;  %1695 = vmatprep.mubr.msk.bf16.mxu1 %vm1903_vm0, %v1902_v0 }
 0x63b   :  { %v1680_v8 = vpop.f32.mrf.mxu0 }
 0x63d   :  { %v796_v9 = vpop.f32.mrf.mxu0 }
 0x63e   :  { %v797_v11 = vadd.f32 %v2053_v23, %v796_v9 }
 0x63f   :  { %v1691_v12 = vpop.f32.mrf.mxu0 }
 0x640   :  { %v805_v13 = vsel %vm167_vm2, %v797_v11, -inf }
 0x641   :  { %806 = vmax.xlane.f32.xlu1 %v805_v13  ;;  %v799_v15 = vpop.f32.mrf.mxu0 }
 0x643   :  { %v1692_v16 = vpop.f32.mrf.mxu0 }
 0x652   :  { %826 = vrot.lane.b32.xlu1 %v2032_v10, %s1910_s26 }
 0x656   :  { %975 = vrot.lane.b32.xlu1 %v2032_v10, %s1911_s1 }
 0x65a   :  { %1025 = vrot.lane.b32.xlu1 %v2035_v14, %s1911_s1 }
 0x65e   :  { %1023 = vrot.lane.b32.xlu1 %v2035_v14, %s1912_s27 }
 0x6ca   :  { %v807_v17 = vpop.xlane.xlu1 %806 }
 0x6cb   :  { %v809_v21 = vsub.f32 %v797_v11, %v807_v17 }
 0x6cd   :  { %v812_v22 = vmul.f32 1.442695, %v809_v21 }
 0x6ce   :  { %v827_v18 = vpop.permute.xlu1 %826 }
 0x6cf   :  { %v832_v20 = vsel %vm292_vm3, %v827_v18, 0  ;;  %1806 = vpow2.f32 %v812_v22 }
 0x6d0   :  { %1694 = vmatpush3.bf16.msra.mxu1 %v832_v20 }
 0x6d1   :  { %1705 = vmatprep.subr.bf16.mxu1 %v1902_v0 }
 0x6d2   :  { %v976_v47 = vpop.permute.xlu1 %975 }
 0x6d3   :  { %v981_v49 = vsel %vm167_vm2, %v976_v47, 0 }
 0x6d6   :  { %v1026_v61 = vpop.permute.xlu1 %1025 }
 0x6d7   :  { %v1031_v11 = vsel %vm167_vm2, %v1026_v61, 0  ;;  %v1547_v61 = vld [vmem:[%s2285_s5] ss:$0 sm:$0xff] }
 0x6da   :  { %v1024_v15 = vpop.permute.xlu1 %1023 }
 0x6dc   :  { %v1807_v32 = vpop.eup %1806 }
 0x6dd   :  { %v817_v35 = vsel %vm167_vm2, %v1807_v32, 0.0 }
 0x6f0   :  { %v2159_v24 = vpop.f32.mrf.mxu1 }
 0x6f1   :  { %v696_v22 = vadd.f32 %v2142_v2, %v2159_v24 }
 0x6f2   :  { %v1673_v25 = vpop.f32.mrf.mxu1 }
 0x6f4   :  { %v2161_v26 = vpop.f32.mrf.mxu1 }
 0x6f6   :  { %v1674_v27 = vpop.f32.mrf.mxu1 }
 0x6f8   :  { %v746_v28 = vpop.f32.mrf.mxu1 }
 0x6f9   :  { %v747_v29 = vadd.f32 %v2050_v19, %v746_v28 }
 0x6fa   :  { %v1685_v30 = vpop.f32.mrf.mxu1 }
 0x6fb   :  { %v802_v31 = vsel %vm167_vm2, %v747_v29, -inf }
 0x6fc   :  { %803 = vmax.xlane.f32.xlu0 %v802_v31  ;;  %v749_v33 = vpop.f32.mrf.mxu1 }
 0x6fe   :  { %v1686_v34 = vpop.f32.mrf.mxu1 }
 0x700   :  { %818 = vadd.xlane.f32.xlu0 %v817_v35 }
 0x785   :  { %v804_v36 = vpop.xlane.xlu0 %803 }
 0x786   :  { %v808_v37 = vsub.f32 %v747_v29, %v804_v36  ;;  %v699_v29 = vadd.f32 %v2145_v7, %v2161_v26 }
 0x788   :  { %v810_v38 = vmul.f32 1.442695, %v808_v37 }
 0x789   :  { %v819_v41 = vpop.xlane.xlu0 %818 }
 0x78a   :  { %1808 = vpow2.f32 %v810_v38 }
 0x78b   :  { %1810 = vrcp.f32 %v819_v41 }
 0x797   :  { %v1809_v39 = vpop.eup %1808 }
 0x798   :  { %v814_v40 = vsel %vm167_vm2, %v1809_v39, 0.0  ;;  %v1811_v42 = vpop.eup %1810 }
 0x799   :  { %815 = vadd.xlane.f32.xlu0 %v814_v40  ;;  %v823_v44 = vmul.f32 %v1811_v42, %v1807_v32 }
 0x79b   :  { %v825_v48 = vpack.c.bf16 %v823_v44, %v823_v44  ;;  %v1194_v44 = vld [vmem:[%s2284_s4 + $0xc] sm:$0xf] }
 0x7af   :  { %874 = vrot.lane.b32.xlu0 %v2035_v14, %s1910_s26 }
 0x7b3   :  { %973 = vrot.lane.b32.xlu0 %v2032_v10, %s1912_s27  ;;  %s1914_s27 = smov [#allocation7]  }
 0x7b4   :  { %s1508_s6 = sshll.u32 %s1914_s27, 4  ;;  %s1509_s6 = int_to_ptr.vmem [resolvable:$true] %s1508_s6 }
 0x7b5   :  { %s1870_s28 = scalar_lea.vmem %s1509_s6, 256  ;;  %p1875_p11 = scmp.lt.s32.totalorder %s1509_s6, %s1509_s6 }
 0x7b6   :  { %p1871_p10 = scmp.ne.s32.totalorder %s1509_s6, %s1870_s28  ;;  %p1876_p12 = scmp.lt.s32.totalorder %s1870_s28, %s1870_s28 }
 0x7b8   :  { %p1877_p13 = por %p1876_p12, %p1875_p11 }
 0x7ba   :  { %p1878_p0 = pnand %p1877_p13, %p1871_p10 }
 0x822   :  { %v816_v43 = vpop.xlane.xlu0 %815 }
 0x823   :  { %1812 = vrcp.f32 %v816_v43 }
 0x826   :  { %v875_v45 = vpop.permute.xlu0 %874 }
 0x827   :  { %v880_v46 = vsel %vm292_vm3, %v875_v45, 0  ;;  %v1199_v45 = vsel %vm292_vm3, %v1194_v44, 0  ;;  %v1550_v44 = vld [vmem:[%s2287_s7] ss:$0 sm:$0xff] }
 0x828   :  { %1700 = vmatpush3.bf16.msra.mxu0 %v880_v46 }
 0x829   :  { %1711 = vmatprep.subr.bf16.mxu0 %v1902_v0 }
 0x82a   :  { %v974_v52 = vpop.permute.xlu0 %973 }
 0x82b   :  { %1702 = vmatmul.mubr.msk.bf16.vlgmr.msra.gmra.mxu0 %vm167_vm2, %v825_v48 }
 0x82c   :  { %1712 = vmatpush3.bf16.xpose.msra.mxu0 %v981_v49  ;;  %1713 = vmatprep.mubr.msk.bf16.mxu0 %vm1903_vm0, %v1902_v0 }
 0x82d   :  { %1723 = vmatprep.subr.bf16.mxu0 %v1902_v0 }
 0x830   :  { %v1813_v50 = vpop.eup %1812 }
 0x831   :  { %v822_v51 = vmul.f32 %v1813_v50, %v1809_v39 }
 0x833   :  { %1714 = vmatmul.mubr.msk.bf16.vlgmr.msra.gmra.mxu0 %vm167_vm2, %v974_v52  ;;  %v824_v53 = vpack.c.bf16 %v822_v51, %v822_v51 }
 0x834   :  { %1725 = vmatprep.mubr.msk.bf16.mxu0 %vm1903_vm0, %v1902_v0 }
 0x835   :  { %1696 = vmatmul.mubr.msk.bf16.vlgmr.msra.gmra.mxu1 %vm167_vm2, %v824_v53 }
 0x836   :  { %1707 = vmatprep.mubr.msk.bf16.mxu1 %vm1903_vm0, %v1902_v0  ;;  %1706 = vmatpush3.bf16.msra.mxu1 %v928_v55 }
 0x837   :  { %1717 = vmatprep.subr.bf16.mxu1 %v1902_v0 }
 0x8eb   :  { %v916_v56 = vpop.f32.mrf.mxu0 }
 0x8ed   :  { %v1703_v57 = vpop.f32.mrf.mxu0 }
 0x8ef   :  { %v919_v58 = vpop.f32.mrf.mxu0 }
 0x8f1   :  { %v1704_v59 = vpop.f32.mrf.mxu0 }
 0x8f3   :  { %v1017_v60 = vpop.f32.mrf.mxu0 }
 0x8f4   :  { %v1018_v62 = vadd.f32 %v2050_v19, %v1017_v60 }
 0x8f5   :  { %v868_v63 = vpop.f32.mrf.mxu1  ;;  %v1715_v1 = vpop.f32.mrf.mxu0 }
 0x8f6   :  { %v922_v5 = vpack.c.bf16 %v916_v56, %v868_v63  ;;  %v1073_v6 = vsel %vm167_vm2, %v1018_v62, -inf }
 0x8f7   :  { %1074 = vmax.xlane.f32.xlu0 %v1073_v6  ;;  %v1697_v8 = vpop.f32.mrf.mxu1  ;;  %v1020_v9 = vpop.f32.mrf.mxu0 }
 0x8f8   :  { %1708 = vmatmul.mubr.msk.bf16.vlgmr.msra.gmra.mxu1 %vm167_vm2, %v922_v5 }
 0x8f9   :  { %1718 = vmatpush3.bf16.xpose.msra.mxu1 %v1031_v11  ;;  %v871_v12 = vpop.f32.mrf.mxu1  ;;  %v1716_v13 = vpop.f32.mrf.mxu0  ;;  %1719 = vmatprep.mubr.msk.bf16.mxu1 %vm1903_vm0, %v1902_v0 }
 0x8fa   :  { %1729 = vmatprep.subr.bf16.mxu1 %v1902_v0 }
 0x8fb   :  { %v1698_v19 = vpop.f32.mrf.mxu1 }
 0x900   :  { %1720 = vmatmul.mubr.msk.bf16.vlgmr.msra.gmra.mxu1 %vm167_vm2, %v1024_v15 }
 0x901   :  { %1731 = vmatprep.mubr.msk.bf16.mxu1 %vm1903_vm0, %v1902_v0 }
 0x980   :  { %v1075_v16 = vpop.xlane.xlu0 %1074 }
 0x981   :  { %v1079_v17 = vsub.f32 %v1018_v62, %v1075_v16 }
 0x983   :  { %v1081_v18 = vmul.f32 1.442695, %v1079_v17 }
 0x985   :  { %1814 = vpow2.f32 %v1081_v18 }
 0x992   :  { %v1815_v20 = vpop.eup %1814 }
 0x993   :  { %v1085_v21 = vsel %vm167_vm2, %v1815_v20, 0.0 }
 0x994   :  { %1086 = vadd.xlane.f32.xlu0 %v1085_v21 }
 0x9b8   :  { %v964_v25 = vpop.f32.mrf.mxu1 }
 0x9b9   :  { %v971_v27 = vadd.f32 %v964_v25, %v696_v22 }
 0x9ba   :  { %v1709_v28 = vpop.f32.mrf.mxu1 }
 0x9bb   :  { %v1784_v28 = vld [vmem:[#allocation5 + $0x8] sm:$0xff]  }
 0x9bc   :  { %v967_v30 = vpop.f32.mrf.mxu1 }
 0x9bd   :  { %v972_v31 = vadd.f32 %v967_v30, %v699_v29  ;;  %v1786_v29 = vld [vmem:[%s2288_s8 + $0x18] sm:$0xff]  }
 0x9be   :  { %v1710_v32 = vpop.f32.mrf.mxu1 }
 0x9c0   :  { %v1067_v33 = vpop.f32.mrf.mxu1 }
 0x9c1   :  { %v1068_v34 = vadd.f32 %v2053_v23, %v1067_v33 }
 0x9c2   :  { %v1721_v35 = vpop.f32.mrf.mxu1 }
 0x9c3   :  { %v1076_v36 = vsel %vm167_vm2, %v1068_v34, -inf }
 0x9c4   :  { %1077 = vmax.xlane.f32.xlu1 %v1076_v36  ;;  %v1070_v37 = vpop.f32.mrf.mxu1 }
 0x9c6   :  { %v1722_v38 = vpop.f32.mrf.mxu1 }
 0x9c7   :  { %v1548_v38 = vld [vmem:[%s2290_s10] ss:$0 sm:$0xff] }
 0x9d5   :  { %1097 = vrot.lane.b32.xlu1 %v2032_v10, %s1913_s29 }
 0xa1d   :  { %v1087_v2 = vpop.xlane.xlu0 %1086 }
 0xa1e   :  { %1816 = vrcp.f32 %v1087_v2 }
 0xa2b   :  { %v1817_v24 = vpop.eup %1816 }
 0xa2c   :  { %v1093_v40 = vmul.f32 %v1817_v24, %v1815_v20 }
 0xa2e   :  { %v1095_v42 = vpack.c.bf16 %v1093_v40, %v1093_v40 }
 0xa4d   :  { %v1078_v39 = vpop.xlane.xlu1 %1077 }
 0xa4e   :  { %v1080_v7 = vsub.f32 %v1068_v34, %v1078_v39 }
 0xa50   :  { %v1083_v26 = vmul.f32 1.442695, %v1080_v7  ;;  %v1549_v7 = vld [vmem:[%s2291_s11] ss:$0 sm:$0xff] }
 0xa51   :  { %v1098_v41 = vpop.permute.xlu1 %1097 }
 0xa52   :  { %1818 = vpow2.f32 %v1083_v26  ;;  %v1103_v23 = vsel %vm292_vm3, %v1098_v41, 0 }
 0xa53   :  { %1724 = vmatpush3.bf16.msra.mxu0 %v1103_v23 }
 0xa54   :  { %1735 = vmatprep.subr.bf16.mxu0 %v1902_v0 }
 0xa56   :  { %1726 = vmatmul.mubr.msk.bf16.vlgmr.msra.gmra.mxu0 %vm167_vm2, %v1095_v42  ;;  %v1787_v42 = vld [vmem:[%s2288_s8 + $0x10] sm:$0xff]  }
 0xa57   :  { %1737 = vmatprep.mubr.msk.bf16.mxu0 %vm1903_vm0, %v1902_v0  ;;  %1736 = vmatpush3.bf16.msra.mxu0 %v1199_v45 }
 0xa58   :  { %1749 = vmatprep.subr.bf16.mxu0 %v1902_v0 }
 0xa5f   :  { %v1819_v10 = vpop.eup %1818 }
 0xa60   :  { %v1088_v43 = vsel %vm167_vm2, %v1819_v10, 0.0 }
 0xa61   :  { %1089 = vadd.xlane.f32.xlu0 %v1088_v43  ;;  %v1789_v43 = vld [vmem:[%s2288_s8] sm:$0xff]  }
 0xa77   :  { %1145 = vrot.lane.b32.xlu0 %v2035_v14, %s1913_s29 }
 0xaea   :  { %v1090_v46 = vpop.xlane.xlu0 %1089 }
 0xaeb   :  { %1820 = vrcp.f32 %v1090_v46 }
 0xaee   :  { %v1146_v47 = vpop.permute.xlu0 %1145 }
 0xaef   :  { %v1151_v48 = vsel %vm292_vm3, %v1146_v47, 0 }
 0xaf0   :  { %1730 = vmatpush3.bf16.msra.mxu1 %v1151_v48 }
 0xaf1   :  { %1741 = vmatprep.subr.bf16.mxu1 %v1902_v0 }
 0xaf8   :  { %v1821_v49 = vpop.eup %1820 }
 0xaf9   :  { %v1094_v50 = vmul.f32 %v1821_v49, %v1819_v10  ;;  %v1788_v10 = vld [vmem:[%s2288_s8 + $0x8] sm:$0xff]  }
 0xafb   :  { %v1096_v14 = vpack.c.bf16 %v1094_v50, %v1094_v50 }
 0xafd   :  { %1732 = vmatmul.mubr.msk.bf16.vlgmr.msra.gmra.mxu1 %vm167_vm2, %v1096_v14 }
 0xafe   :  { %1745 = vmatprep.mubr.msk.bf16.mxu1 %vm1903_vm0, %v1902_v0  ;;  %1742 = vmatpush3.bf16.msra.mxu1 %v1784_v28 }
 0xaff   :  { %1743 = vmatprep.subr.bf16.mxu1 %v1902_v0 }
 0xb16   :  { %v1139_v51 = vpop.f32.mrf.mxu0 }
 0xb18   :  { %v1727_v52 = vpop.f32.mrf.mxu0 }
 0xb1a   :  { %v1142_v53 = vpop.f32.mrf.mxu0 }
 0xb1c   :  { %v1728_v54 = vpop.f32.mrf.mxu0 }
 0xbbd   :  { %v1187_v55 = vpop.f32.mrf.mxu1 }
 0xbbe   :  { %v1193_v56 = vpack.c.bf16 %v1187_v55, %v1139_v51 }
 0xbbf   :  { %v1733_v57 = vpop.f32.mrf.mxu1 }
 0xbc0   :  { %1738 = vmatmul.mubr.msk.bf16.vlgmr.msra.gmra.mxu0 %vm167_vm2, %v1193_v56 }
 0xbc1   :  { %v1190_v58 = vpop.f32.mrf.mxu1  ;;  %1757 = vmatprep.mubr.msk.bf16.mxu0 %vm1903_vm0, %v1902_v0  ;;  %1750 = vmatpush3.bf16.msra.mxu0 %v1786_v29 }
 0xbc2   :  { %1751 = vmatprep.subr.bf16.mxu0 %v1902_v0 }
 0xbc3   :  { %v1734_v59 = vpop.f32.mrf.mxu1 }
 0xbc5   :  { %1752 = vmatpush3.bf16.msra.mxu0 %v1787_v42 }
 0xbc6   :  { %1753 = vmatprep.subr.bf16.mxu0 %v1902_v0 }
 0xbc9   :  { %1754 = vmatpush3.bf16.msra.mxu0 %v1788_v10 }
 0xbca   :  { %1755 = vmatprep.subr.bf16.mxu0 %v1902_v0  ;;  %v1554_v0 = vld [vmem:[%s2289_s9] ss:$0 sm:$0xff] }
 0xbcd   :  { %1756 = vmatpush3.bf16.msra.mxu0 %v1789_v43 }
 0xc80   :  { %v1235_v60 = vpop.f32.mrf.mxu0 }
 0xc81   :  { %v1242_v62 = vadd.f32 %v1235_v60, %v971_v27 }
 0xc82   :  { %v1739_v63 = vpop.f32.mrf.mxu0 }
 0xc83   :  { %v1251_v1 = vadd.f32 %v1547_v61, %v1242_v62 }
 0xc84   :  { %v1238_v5 = vpop.f32.mrf.mxu0 }
 0xc85   :  { %v1243_v6 = vadd.f32 %v1238_v5, %v972_v31  ;;  %v1253_v8 = vadd.f32 %v1251_v1, %v2015_v3 }
 0xc86   :  { %v1740_v9 = vpop.f32.mrf.mxu0 }
 0xc87   :  { %v1252_v11 = vadd.f32 %v1547_v61, %v1243_v6  ;;  %v1255_v12 = vsel %vm103_vm1, %v1253_v8, 0.0 }
 0xc88   :  { %1256 = vadd.xlane.f32.xlu1 %v1255_v12 }
 0xc89   :  { %v1254_v13 = vadd.f32 %v1252_v11, %v2020_v4  ;;  %v1785_v4 = vld [vmem:[#allocation5] sm:$0xff]  }
 0xc8a   :  { %1744 = vmatpush3.bf16.msra.mxu1 %v1785_v4 }
 0xc8b   :  { %v1258_v19 = vsel %vm103_vm1, %v1254_v13, 0.0 }
 0xc8c   :  { %1259 = vadd.xlane.f32.xlu0 %v1258_v19 }
 0xd11   :  { %v1257_v15 = vpop.xlane.xlu1 %1256 }
 0xd12   :  { %v1262_v16 = vmul.f32 0.03125, %v1257_v15 }
 0xd14   :  { %v1264_v17 = vsub.f32 %v1253_v8, %v1262_v16 }
 0xd15   :  { %v1260_v18 = vpop.xlane.xlu0 %1259 }
 0xd16   :  { %v1263_v20 = vmul.f32 0.03125, %v1260_v18  ;;  %v1266_v21 = vmul.f32 %v1264_v17, %v1264_v17 }
 0xd18   :  { %v1265_v22 = vsub.f32 %v1254_v13, %v1263_v20  ;;  %v1268_v25 = vsel %vm103_vm1, %v1266_v21, 0.0 }
 0xd19   :  { %1269 = vadd.xlane.f32.xlu1 %v1268_v25  ;;  %v1560_v25 = vld [vmem:[%s2292_s12] ss:$0 sm:$0xff] }
 0xd1a   :  { %v1267_v3 = vmul.f32 %v1265_v22, %v1265_v22 }
 0xd1c   :  { %v1271_v27 = vsel %vm103_vm1, %v1267_v3, 0.0 }
 0xd1d   :  { %1272 = vadd.xlane.f32.xlu0 %v1271_v27  ;;  %v1561_v27 = vld [vmem:[%s2293_s13] ss:$0 sm:$0xff] }
 0xda2   :  { %v1270_v30 = vpop.xlane.xlu1 %1269 }
 0xda3   :  { %v1274_v31 = vmul.f32 0.03125, %v1270_v30 }
 0xda5   :  { %v1276_v32 = vadd.f32 1e-05, %v1274_v31 }
 0xda6   :  { %v1273_v33 = vpop.xlane.xlu0 %1272 }
 0xda7   :  { %1822 = vrsqrt.f32 %v1276_v32  ;;  %v1275_v34 = vmul.f32 0.03125, %v1273_v33 }
 0xda9   :  { %v1277_v35 = vadd.f32 1e-05, %v1275_v34 }
 0xdab   :  { %1824 = vrsqrt.f32 %v1277_v35 }
 0xdb4   :  { %v1823_v36 = vpop.eup %1822 }
 0xdb5   :  { %v1280_v37 = vmul.f32 %v1823_v36, %v1264_v17 }
 0xdb7   :  { %v1289_v39 = vmul.f32 %v1548_v38, %v1280_v37 }
 0xdb8   :  { %v1825_v2 = vpop.eup %1824 }
 0xdb9   :  { %v1281_v24 = vmul.f32 %v1825_v2, %v1265_v22  ;;  %v1298_v40 = vadd.f32 %v1549_v7, %v1289_v39 }
 0xdbb   :  { %v1290_v26 = vmul.f32 %v1548_v38, %v1281_v24 }
 0xdbd   :  { %v1299_v41 = vadd.f32 %v1549_v7, %v1290_v26 }
 0xdbf   :  { %v1300_v23 = vpack.c.bf16 %v1299_v41, %v1298_v40 }
 0xdc1   :  { %1746 = vmatmul.mubr.msk.bf16.vlgmr.msra.gmra.mxu1 %vm103_vm1, %v1300_v23 }
 0xe81   :  { %v1361_v45 = vpop.f32.mrf.mxu1 }
 0xe82   :  { %v1362_v47 = vadd.f32 %v1550_v44, %v1361_v45 }
 0xe83   :  { %v1747_v46 = vpop.f32.mrf.mxu1 }
 0xe84   :  { %v1368_v14 = vmax.f32 %v1362_v47, 0.0 }
 0xe85   :  { %v1364_v48 = vpop.f32.mrf.mxu1 }
 0xe86   :  { %v1365_v49 = vadd.f32 %v1550_v44, %v1364_v48 }
 0xe87   :  { %v1748_v50 = vpop.f32.mrf.mxu1 }
 0xe88   :  { %v1369_v51 = vmax.f32 %v1365_v49, 0.0 }
 0xe8a   :  { %v1370_v52 = vpack.c.bf16 %v1369_v51, %v1368_v14 }
 0xe8c   :  { %1758 = vmatmul.mubr.msk.bf16.vlgmr.msra.gmra.mxu0 %vm1410_vm4, %v1370_v52 }
 0xf4c   :  { %v1448_v53 = vpop.f32.mrf.mxu0 }
 0xf4d   :  { %v1449_v54 = vadd.f32 %v1554_v0, %v1448_v53 }
 0xf4e   :  { %v1759_v55 = vpop.f32.mrf.mxu0 }
 0xf4f   :  { %v1455_v56 = vadd.f32 %v1449_v54, %v1298_v40 }
 0xf50   :  { %v1451_v57 = vpop.f32.mrf.mxu0 }
 0xf51   :  { %v1452_v58 = vadd.f32 %v1554_v0, %v1451_v57  ;;  %v1457_v59 = vsel %vm103_vm1, %v1455_v56, 0.0 }
 0xf52   :  { %1458 = vadd.xlane.f32.xlu1 %v1457_v59  ;;  %v1760_v60 = vpop.f32.mrf.mxu0 }
 0xf53   :  { %v1456_v61 = vadd.f32 %v1452_v58, %v1299_v41 }
 0xf55   :  { %v1460_v62 = vsel %vm103_vm1, %v1456_v61, 0.0 }
 0xf56   :  { %1461 = vadd.xlane.f32.xlu0 %v1460_v62 }
 0xfdb   :  { %v1459_v63 = vpop.xlane.xlu1 %1458 }
 0xfdc   :  { %v1463_v1 = vmul.f32 0.03125, %v1459_v63 }
 0xfde   :  { %v1465_v5 = vsub.f32 %v1455_v56, %v1463_v1 }
 0xfdf   :  { %v1462_v6 = vpop.xlane.xlu0 %1461 }
 0xfe0   :  { %v1464_v8 = vmul.f32 0.03125, %v1462_v6  ;;  %v1467_v9 = vmul.f32 %v1465_v5, %v1465_v5 }
 0xfe2   :  { %v1466_v11 = vsub.f32 %v1456_v61, %v1464_v8  ;;  %v1469_v12 = vsel %vm103_vm1, %v1467_v9, 0.0 }
 0xfe3   :  { %1470 = vadd.xlane.f32.xlu1 %v1469_v12 }
 0xfe4   :  { %v1468_v13 = vmul.f32 %v1466_v11, %v1466_v11 }
 0xfe6   :  { %v1472_v19 = vsel %vm103_vm1, %v1468_v13, 0.0 }
 0xfe7   :  { %1473 = vadd.xlane.f32.xlu0 %v1472_v19 }
0x106c   :  { %v1471_v15 = vpop.xlane.xlu1 %1470 }
0x106d   :  { %v1475_v16 = vmul.f32 0.03125, %v1471_v15 }
0x106f   :  { %v1477_v17 = vadd.f32 1e-05, %v1475_v16 }
0x1070   :  { %v1474_v18 = vpop.xlane.xlu0 %1473 }
0x1071   :  { %1826 = vrsqrt.f32 %v1477_v17  ;;  %v1476_v20 = vmul.f32 0.03125, %v1474_v18 }
0x1073   :  { %v1478_v21 = vadd.f32 1e-05, %v1476_v20 }
0x1075   :  { %1828 = vrsqrt.f32 %v1478_v21 }
0x107e   :  { %v1827_v22 = vpop.eup %1826 }
0x107f   :  { %v1481_v3 = vmul.f32 %v1827_v22, %v1465_v5 }
0x1081   :  { %v1490_v28 = vmul.f32 %v1560_v25, %v1481_v3 }
0x1082   :  { %v1829_v4 = vpop.eup %1828 }
0x1083   :  { %v1482_v29 = vmul.f32 %v1829_v4, %v1466_v11  ;;  %v1499_v30 = vadd.f32 %v1561_v27, %v1490_v28 }
0x1085   :  { %v1491_v31 = vmul.f32 %v1560_v25, %v1482_v29  ;;  %1501 = vst.msk [vmem:[#allocation7] sm:$0xff] %vm103_vm1, %v1499_v30 }
0x1087   :  { %v1500_v32 = vadd.f32 %v1561_v27, %v1491_v31 }
0x1089   :  { %1502 = vst.msk [vmem:[#allocation7 + $0x8] sm:$0xff] %vm103_vm1, %v1500_v32 }
0x108a   :  { %1881 = shalt.err (!%p1878_p0)
}
0x108b   :  { %s1915_s12 = smov 128   ;;  %s1916_s13 = smov 8  }
0x108c   :  { %1514 = dma.vmem_to_hbm [thread:$0]  %s1509_s6, 256, %s2294_s14, [#allocation4], %s1915_s12, %s1915_s12, %s1916_s13  }
0x108d   :  { %1894 = dma.done.wait [#allocation4], 256  }
0x108e   :  { %1895 = vsyncadd [#allocation4], 4294967040 }
0x108f   :  { %1518 = vsyncpa [#allocation3], 1 }
0x1090   :  { %1519 = vsyncpa [#allocation6], 1 }
0x1091   :  { %1520 = vsyncpa [#allocation4], 1 }

// kernel: tpu_custom_call.1
= control target key start
LH: loop header
LB: loop body
LE: loop exit
PB: predicated region body
PF: predicated region fallthrough
CT: control target
= control target key end

     0   :  { %19 = vsyncpa [#allocation3], 0  ;;  %s2280_s0 = inlined_call_operand.vmem [shape: f32[2,8,32], index: 0, kind: input, shape index: {}]   ;;  %s2281_s1 = inlined_call_operand.hbm [shape: f32[2,1,8], index: 1, kind: input, shape index: {}]   ;;  %s2282_s2 = inlined_call_operand.vmem [shape: bf16[32,96], index: 2, kind: input, shape index: {}]   ;;  %s2283_s3 = inlined_call_operand.vmem [shape: f32[1,96], index: 3, kind: input, shape index: {}]   ;;  %s2284_s4 = inlined_call_operand.vmem [shape: bf16[32,32], index: 4, kind: input, shape index: {}]   ;;  %s2285_s5 = inlined_call_operand.vmem [shape: f32[1,32], index: 5, kind: input, shape index: {}]   ;;  %s2286_s6 = inlined_call_operand.hbm [shape: bf16[32,64], index: 6, kind: input, shape index: {}]   ;;  %s2287_s7 = inlined_call_operand.vmem [shape: f32[1,64], index: 7, kind: input, shape index: {}]   ;;  %s2288_s8 = inlined_call_operand.vmem [shape: bf16[64,32], index: 8, kind: input, shape index: {}]   ;;  %s2289_s9 = inlined_call_operand.vmem [shape: f32[1,32], index: 9, kind: input, shape index: {}]   ;;  %s2290_s10 = inlined_call_operand.vmem [shape: f32[1,32], index: 10, kind: input, shape index: {}]   ;;  %s2291_s11 = inlined_call_operand.vmem [shape: f32[1,32], index: 11, kind: input, shape index: {}]   ;;  %s2292_s12 = inlined_call_operand.vmem [shape: f32[1,32], index: 12, kind: input, shape index: {}]   ;;  %s2293_s13 = inlined_call_operand.vmem [shape: f32[1,32], index: 13, kind: input, shape index: {}]   ;;  %s2294_s14 = inlined_call_operand.hbm [shape: f32[2,8,32], index: 14, kind: output, shape index: {}]  }
   0x1   :  { %20 = vsyncpa [#allocation6], 0 }
   0x2   :  { %21 = vsyncpa [#allocation4], 0  ;;  %s1896_s29 = smov [#allocation2]  }
   0x3   :  { %s29_s30 = sshll.u32 %s1896_s29, 4  ;;  %s30_s30 = int_to_ptr.vmem [resolvable:$true] %s29_s30 }
   0x4   :  { %s1838_s15 = scalar_lea.vmem %s30_s30, 32  ;;  %p1843_p1 = scmp.lt.s32.totalorder %s30_s30, %s30_s30 }
   0x5   :  { %p1839_p0 = scmp.ne.s32.totalorder %s30_s30, %s1838_s15  ;;  %p1844_p2 = scmp.lt.s32.totalorder %s1838_s15, %s1838_s15 }
   0x7   :  { %p1845_p3 = por %p1844_p2, %p1843_p1 }
   0x9   :  { %p1846_p4 = pnand %p1845_p3, %p1839_p0 }
   0xb   :  { %1849 = shalt.err (!%p1846_p4)
}
   0xc   :  { %s1897_s16 = smov 16   ;;  %s1898_s17 = smov 1  }
   0xd   :  { %35 = dma.hbm_to_vmem [thread:$0]  %s2281_s1, 32, %s30_s30, [#allocation3], %s1897_s16, %s1897_s16, %s1898_s17  }
   0xe   :  { %s1899_s20 = smov [#allocation5]  }
   0xf   :  { %s49_s21 = sshll.u32 %s1899_s20, 4  ;;  %s50_s21 = int_to_ptr.vmem [resolvable:$true] %s49_s21 }
  0x10   :  { %s1858_s22 = scalar_lea.vmem %s50_s21, 256  ;;  %p1863_p6 = scmp.lt.s32.totalorder %s50_s21, %s50_s21 }
  0x11   :  { %p1859_p5 = scmp.ne.s32.totalorder %s50_s21, %s1858_s22  ;;  %p1864_p7 = scmp.lt.s32.totalorder %s1858_s22, %s1858_s22 }
  0x13   :  { %p1865_p8 = por %p1864_p7, %p1863_p6 }
  0x15   :  { %p1866_p9 = pnand %p1865_p8, %p1859_p5 }
  0x17   :  { %1869 = shalt.err (!%p1866_p9)
}
  0x18   :  { %s1900_s23 = smov 64   ;;  %s1901_s24 = smov 4  }
  0x19   :  { %55 = dma.hbm_to_vmem [thread:$0]  %s2286_s6, 256, %s50_s21, [#allocation6], %s1900_s23, %s1900_s23, %s1901_s24  }
  0x1a   :  { %1890 = dma.done.wait [#allocation3], 32  }
  0x1b   :  { %1891 = vsyncadd [#allocation3], 4294967264 }
  0x1c   :  { %1892 = dma.done.wait [#allocation6], 256  }
  0x1d   :  { %1893 = vsyncadd [#allocation6], 4294967040  ;;  %v1902_v0 = vmov 0.0   ;;  %vm1903_vm0 = vmmov 0   ;;  %v1782_v1 = vld [vmem:[%s2282_s2 + $0x8] sm:$0xff]   ;;  %v1783_v2 = vld [vmem:[%s2282_s2] sm:$0xff]  }
  0x1e   :  { %1613 = vmatprep.subr.bf16.mxu1 %v1902_v0  ;;  %1617 = vmatprep.mubr.msk.bf16.mxu1 %vm1903_vm0, %v1902_v0  ;;  %v2015_v3 = vld [vmem:[%s2280_s0] sm:$0xff]  ;;  %v2020_v4 = vld [vmem:[%s2280_s0 + $0x8] sm:$0xff]  ;;  %vm103_vm1 = vcmask 261120   ;;  %s1904_s0 = smov 96   ;;  %vm167_vm2 = vcmask 64512   ;;  %vm292_vm3 = vcmask 1043456  }
  0x1f   :  { %1627 = vmatprep.subr.bf16.mxu0 %v1902_v0  ;;  %1629 = vmatprep.mubr.msk.bf16.mxu0 %vm1903_vm0, %v1902_v0  ;;  %v79_v5 = vpack.c.bf16 %v2020_v4, %v2015_v3  ;;  %v1521_v6 = vld [vmem:[%s2283_s3] ss:$0 sm:$0xff]  ;;  %v2053_v23 = vld [vmem:[#allocation2 + $0x1] ss:$0 sm:$0xff]  ;;  %s1905_s3 = smov 88   ;;  %s1906_s18 = smov 120  }
  0x20   :  { %1614 = vmatpush3.bf16.msra.mxu1 %v1782_v1  ;;  %v2050_v19 = vld [vmem:[#allocation2] ss:$0 sm:$0xff]  ;;  %s1907_s19 = smov 56   ;;  %s1908_s20 = smov 112   ;;  %vm1410_vm4 = vcmask 523264  }
  0x21   :  { %1615 = vmatprep.subr.bf16.mxu1 %v1902_v0  ;;  %s1909_s21 = smov 80   ;;  %s1910_s26 = smov 48  }
  0x22   :  { %s1911_s1 = smov 72   ;;  %s1912_s27 = smov 104  }
  0x23   :  { %s1913_s29 = smov 40  }
  0x24   :  { %1616 = vmatpush3.bf16.msra.mxu1 %v1783_v2 }
  0x25   :  { %1621 = vmatprep.subr.bf16.mxu1 %v1902_v0 }
  0x27   :  { %1618 = vmatmul.mubr.msk.bf16.vlgmr.msra.gmra.mxu1 %vm103_vm1, %v79_v5 }
  0x28   :  { %1623 = vmatprep.mubr.msk.bf16.mxu1 %vm1903_vm0, %v1902_v0 }
  0xe7   :  { %v141_v7 = vpop.f32.mrf.mxu1 }
  0xe8   :  { %v142_v8 = vadd.f32 %v1521_v6, %v141_v7 }
  0xe9   :  { %v1619_v9 = vpop.f32.mrf.mxu1 }
  0xea   :  { %v2032_v10 = vpack.c.bf16 %v142_v8, %v142_v8 }
  0xeb   :  { %v144_v11 = vpop.f32.mrf.mxu1 }
  0xec   :  { %v145_v12 = vadd.f32 %v1521_v6, %v144_v11  ;;  %165 = vrot.lane.b32.xlu0 %v2032_v10, %s1904_s0 }
  0xed   :  { %v1620_v13 = vpop.f32.mrf.mxu1 }
  0xee   :  { %v2035_v14 = vpack.c.bf16 %v145_v12, %v145_v12 }
  0xf0   :  { %215 = vrot.lane.b32.xlu0 %v2035_v14, %s1904_s0 }
 0x15e   :  { %v166_v15 = vpop.permute.xlu0 %165 }
 0x15f   :  { %v172_v16 = vsel %vm167_vm2, %v166_v15, 0 }
 0x160   :  { %1622 = vmatpush3.bf16.xpose.msra.mxu1 %v172_v16 }
 0x161   :  { %1633 = vmatprep.subr.bf16.mxu1 %v1902_v0 }
 0x162   :  { %v216_v17 = vpop.permute.xlu0 %215 }
 0x163   :  { %v221_v18 = vsel %vm167_vm2, %v216_v17, 0 }
 0x164   :  { %1628 = vmatpush3.bf16.xpose.msra.mxu0 %v221_v18 }
 0x165   :  { %1639 = vmatprep.subr.bf16.mxu0 %v1902_v0 }
 0x167   :  { %1624 = vmatmul.mubr.msk.bf16.vlgmr.msra.gmra.mxu1 %vm167_vm2, %v2032_v10 }
 0x168   :  { %1635 = vmatprep.mubr.msk.bf16.mxu1 %vm1903_vm0, %v1902_v0 }
 0x16b   :  { %1630 = vmatmul.mubr.msk.bf16.vlgmr.msra.gmra.mxu0 %vm167_vm2, %v2035_v14 }
 0x16c   :  { %1641 = vmatprep.mubr.msk.bf16.mxu0 %vm1903_vm0, %v1902_v0 }
 0x227   :  { %v208_v20 = vpop.f32.mrf.mxu1 }
 0x228   :  { %v209_v21 = vadd.f32 %v2050_v19, %v208_v20 }
 0x229   :  { %v1625_v22 = vpop.f32.mrf.mxu1 }
 0x22a   :  { %v263_v24 = vsel %vm167_vm2, %v209_v21, -inf }
 0x22b   :  { %v257_v25 = vpop.f32.mrf.mxu0  ;;  %264 = vmax.xlane.f32.xlu1 %v263_v24  ;;  %v211_v26 = vpop.f32.mrf.mxu1 }
 0x22c   :  { %v258_v27 = vadd.f32 %v2053_v23, %v257_v25 }
 0x22d   :  { %v1626_v28 = vpop.f32.mrf.mxu1  ;;  %v1631_v29 = vpop.f32.mrf.mxu0 }
 0x22e   :  { %v266_v30 = vsel %vm167_vm2, %v258_v27, -inf }
 0x22f   :  { %v260_v31 = vpop.f32.mrf.mxu0  ;;  %267 = vmax.xlane.f32.xlu1 %v266_v30 }
 0x231   :  { %v1632_v32 = vpop.f32.mrf.mxu0 }
 0x240   :  { %287 = vrot.lane.b32.xlu1 %v2032_v10, %s1900_s23 }
 0x244   :  { %336 = vrot.lane.b32.xlu1 %v2035_v14, %s1900_s23 }
 0x248   :  { %388 = vrot.lane.b32.xlu1 %v2032_v10, %s1905_s3 }
 0x2b4   :  { %v265_v33 = vpop.xlane.xlu1 %264 }
 0x2b5   :  { %v269_v34 = vsub.f32 %v209_v21, %v265_v33 }
 0x2b7   :  { %v271_v35 = vmul.f32 1.442695, %v269_v34 }
 0x2b8   :  { %v268_v36 = vpop.xlane.xlu1 %267 }
 0x2b9   :  { %1790 = vpow2.f32 %v271_v35  ;;  %v270_v37 = vsub.f32 %v258_v27, %v268_v36 }
 0x2bb   :  { %v273_v38 = vmul.f32 1.442695, %v270_v37 }
 0x2bc   :  { %v288_v39 = vpop.permute.xlu1 %287 }
 0x2bd   :  { %1792 = vpow2.f32 %v273_v38  ;;  %v294_v40 = vsel %vm292_vm3, %v288_v39, 0 }
 0x2be   :  { %1634 = vmatpush3.bf16.msra.mxu1 %v294_v40 }
 0x2bf   :  { %1645 = vmatprep.subr.bf16.mxu1 %v1902_v0 }
 0x2c0   :  { %v337_v41 = vpop.permute.xlu1 %336 }
 0x2c1   :  { %v342_v42 = vsel %vm292_vm3, %v337_v41, 0 }
 0x2c2   :  { %1640 = vmatpush3.bf16.msra.mxu0 %v342_v42 }
 0x2c3   :  { %1651 = vmatprep.subr.bf16.mxu0 %v1902_v0 }
 0x2c4   :  { %v389_v47 = vpop.permute.xlu1 %388 }
 0x2c5   :  { %v394_v54 = vsel %vm167_vm2, %v389_v47, 0 }
 0x2c6   :  { %v1791_v43 = vpop.eup %1790 }
 0x2c7   :  { %v275_v44 = vsel %vm167_vm2, %v1791_v43, 0.0 }
 0x2c8   :  { %276 = vadd.xlane.f32.xlu0 %v275_v44 }
 0x2ca   :  { %v1793_v45 = vpop.eup %1792 }
 0x2cb   :  { %v278_v46 = vsel %vm167_vm2, %v1793_v45, 0.0 }
 0x2cc   :  { %279 = vadd.xlane.f32.xlu1 %v278_v46 }
 0x2dd   :  { %438 = vrot.lane.b32.xlu1 %v2035_v14, %s1905_s3 }
 0x2de   :  { %386 = vrot.lane.b32.xlu0 %v2032_v10, %s1906_s18 }
 0x2e1   :  { %436 = vrot.lane.b32.xlu1 %v2035_v14, %s1906_s18 }
 0x351   :  { %v277_v48 = vpop.xlane.xlu0 %276 }
 0x352   :  { %1794 = vrcp.f32 %v277_v48 }
 0x355   :  { %v280_v49 = vpop.xlane.xlu1 %279  ;;  %v387_v59 = vpop.permute.xlu0 %386 }
 0x356   :  { %1796 = vrcp.f32 %v280_v49 }
 0x359   :  { %v439_v56 = vpop.permute.xlu1 %438 }
 0x35a   :  { %v444_v58 = vsel %vm167_vm2, %v439_v56, 0 }
 0x35d   :  { %v437_v60 = vpop.permute.xlu1 %436 }
 0x35f   :  { %v1795_v50 = vpop.eup %1794 }
 0x360   :  { %v283_v51 = vmul.f32 %v1795_v50, %v1791_v43 }
 0x362   :  { %v285_v52 = vpack.c.bf16 %v283_v51, %v283_v51 }
 0x363   :  { %v1797_v53 = vpop.eup %1796 }
 0x364   :  { %1636 = vmatmul.mubr.msk.bf16.vlgmr.msra.gmra.mxu1 %vm167_vm2, %v285_v52  ;;  %v284_v55 = vmul.f32 %v1797_v53, %v1793_v45  ;;  %v385_v45 = vld [vmem:[%s2284_s4] sm:$0xf]  ;;  %v607_v53 = vld [vmem:[%s2284_s4 + $0x4] sm:$0xf] }
 0x365   :  { %1646 = vmatpush3.bf16.xpose.msra.mxu1 %v394_v54  ;;  %1647 = vmatprep.mubr.msk.bf16.mxu1 %vm1903_vm0, %v1902_v0  ;;  %v659_v48 = vsel %vm292_vm3, %v385_v45, 0  ;;  %v612_v54 = vsel %vm292_vm3, %v607_v53, 0 }
 0x366   :  { %v286_v57 = vpack.c.bf16 %v284_v55, %v284_v55  ;;  %1657 = vmatprep.subr.bf16.mxu1 %v1902_v0 }
 0x368   :  { %1642 = vmatmul.mubr.msk.bf16.vlgmr.msra.gmra.mxu0 %vm167_vm2, %v286_v57 }
 0x369   :  { %1652 = vmatpush3.bf16.xpose.msra.mxu0 %v444_v58  ;;  %1653 = vmatprep.mubr.msk.bf16.mxu0 %vm1903_vm0, %v1902_v0 }
 0x36a   :  { %1663 = vmatprep.subr.bf16.mxu0 %v1902_v0 }
 0x36c   :  { %1648 = vmatmul.mubr.msk.bf16.vlgmr.msra.gmra.mxu1 %vm167_vm2, %v387_v59 }
 0x36d   :  { %1659 = vmatprep.mubr.msk.bf16.mxu1 %vm1903_vm0, %v1902_v0 }
 0x370   :  { %1654 = vmatmul.mubr.msk.bf16.vlgmr.msra.gmra.mxu0 %vm167_vm2, %v437_v60 }
 0x371   :  { %1665 = vmatprep.mubr.msk.bf16.mxu0 %vm1903_vm0, %v1902_v0 }
 0x424   :  { %v2088_v61 = vpop.f32.mrf.mxu1 }
 0x426   :  { %v1637_v62 = vpop.f32.mrf.mxu1 }
 0x428   :  { %v333_v63 = vpop.f32.mrf.mxu1  ;;  %v2090_v1 = vpop.f32.mrf.mxu0 }
 0x429   :  { %v384_v2 = vpack.c.bf16 %v2090_v1, %v2088_v61 }
 0x42a   :  { %v1638_v5 = vpop.f32.mrf.mxu1  ;;  %v1643_v6 = vpop.f32.mrf.mxu0 }
 0x42c   :  { %v381_v7 = vpop.f32.mrf.mxu0  ;;  %v430_v8 = vpop.f32.mrf.mxu1 }
 0x42d   :  { %v431_v9 = vadd.f32 %v2050_v19, %v430_v8 }
 0x42e   :  { %v1644_v11 = vpop.f32.mrf.mxu0  ;;  %v1649_v12 = vpop.f32.mrf.mxu1 }
 0x42f   :  { %v486_v13 = vsel %vm167_vm2, %v431_v9, -inf }
 0x430   :  { %v480_v15 = vpop.f32.mrf.mxu0  ;;  %487 = vmax.xlane.f32.xlu1 %v486_v13  ;;  %v433_v16 = vpop.f32.mrf.mxu1 }
 0x431   :  { %v481_v17 = vadd.f32 %v2053_v23, %v480_v15 }
 0x432   :  { %v1650_v18 = vpop.f32.mrf.mxu1  ;;  %v1655_v20 = vpop.f32.mrf.mxu0 }
 0x433   :  { %v489_v21 = vsel %vm167_vm2, %v481_v17, -inf }
 0x434   :  { %490 = vmax.xlane.f32.xlu0 %v489_v21  ;;  %v483_v22 = vpop.f32.mrf.mxu0 }
 0x436   :  { %v1656_v24 = vpop.f32.mrf.mxu0 }
 0x44a   :  { %558 = vrot.lane.b32.xlu0 %v2035_v14, %s1907_s19 }
 0x44e   :  { %702 = vrot.lane.b32.xlu0 %v2032_v10, %s1908_s20 }
 0x4b9   :  { %v488_v25 = vpop.xlane.xlu1 %487 }
 0x4ba   :  { %v492_v26 = vsub.f32 %v431_v9, %v488_v25 }
 0x4bc   :  { %v494_v27 = vmul.f32 1.442695, %v492_v26 }
 0x4bd   :  { %v491_v28 = vpop.xlane.xlu0 %490 }
 0x4be   :  { %1798 = vpow2.f32 %v494_v27  ;;  %v493_v29 = vsub.f32 %v481_v17, %v491_v28 }
 0x4c0   :  { %v496_v30 = vmul.f32 1.442695, %v493_v29 }
 0x4c1   :  { %v559_v31 = vpop.permute.xlu0 %558 }
 0x4c2   :  { %1800 = vpow2.f32 %v496_v30  ;;  %v564_v32 = vsel %vm292_vm3, %v559_v31, 0 }
 0x4c3   :  { %1664 = vmatpush3.bf16.msra.mxu0 %v564_v32 }
 0x4c4   :  { %1675 = vmatprep.subr.bf16.mxu0 %v1902_v0 }
 0x4c5   :  { %v703_v5 = vpop.permute.xlu0 %702 }
 0x4cb   :  { %v1799_v33 = vpop.eup %1798 }
 0x4cc   :  { %v498_v34 = vsel %vm167_vm2, %v1799_v33, 0.0 }
 0x4cd   :  { %499 = vadd.xlane.f32.xlu1 %v498_v34 }
 0x4cf   :  { %v1801_v35 = vpop.eup %1800 }
 0x4d0   :  { %v501_v36 = vsel %vm167_vm2, %v1801_v35, 0.0 }
 0x4d1   :  { %502 = vadd.xlane.f32.xlu1 %v501_v36 }
 0x4e2   :  { %510 = vrot.lane.b32.xlu1 %v2032_v10, %s1907_s19 }
 0x4e6   :  { %704 = vrot.lane.b32.xlu1 %v2032_v10, %s1909_s21 }
 0x4ea   :  { %754 = vrot.lane.b32.xlu1 %v2035_v14, %s1909_s21 }
 0x4ee   :  { %752 = vrot.lane.b32.xlu1 %v2035_v14, %s1908_s20 }
 0x556   :  { %v500_v37 = vpop.xlane.xlu1 %499 }
 0x557   :  { %1802 = vrcp.f32 %v500_v37 }
 0x55a   :  { %v503_v38 = vpop.xlane.xlu1 %502 }
 0x55b   :  { %1804 = vrcp.f32 %v503_v38 }
 0x55e   :  { %v511_v39 = vpop.permute.xlu1 %510 }
 0x55f   :  { %v516_v40 = vsel %vm292_vm3, %v511_v39, 0 }
 0x560   :  { %1658 = vmatpush3.bf16.msra.mxu1 %v516_v40 }
 0x561   :  { %1669 = vmatprep.subr.bf16.mxu1 %v1902_v0 }
 0x562   :  { %v705_v49 = vpop.permute.xlu1 %704 }
 0x563   :  { %v710_v62 = vsel %vm167_vm2, %v705_v49, 0 }
 0x564   :  { %v1803_v41 = vpop.eup %1802 }
 0x565   :  { %v506_v42 = vmul.f32 %v1803_v41, %v1799_v33 }
 0x566   :  { %v755_v50 = vpop.permute.xlu1 %754 }
 0x567   :  { %v508_v43 = vpack.c.bf16 %v506_v42, %v506_v42  ;;  %v760_v51 = vsel %vm167_vm2, %v755_v50, 0 }
 0x568   :  { %v1805_v44 = vpop.eup %1804 }
 0x569   :  { %1660 = vmatmul.mubr.msk.bf16.vlgmr.msra.gmra.mxu1 %vm167_vm2, %v508_v43  ;;  %v507_v46 = vmul.f32 %v1805_v44, %v1801_v35 }
 0x56a   :  { %1671 = vmatprep.mubr.msk.bf16.mxu1 %vm1903_vm0, %v1902_v0  ;;  %v753_v52 = vpop.permute.xlu1 %752  ;;  %1670 = vmatpush3.bf16.msra.mxu1 %v612_v54  ;;  %v923_v54 = vld [vmem:[%s2284_s4 + $0x8] sm:$0xf] }
 0x56b   :  { %v509_v47 = vpack.c.bf16 %v507_v46, %v507_v46  ;;  %1681 = vmatprep.subr.bf16.mxu1 %v1902_v0 }
 0x56d   :  { %1666 = vmatmul.mubr.msk.bf16.vlgmr.msra.gmra.mxu0 %vm167_vm2, %v509_v47 }
 0x56e   :  { %1676 = vmatpush3.bf16.msra.mxu0 %v659_v48  ;;  %1677 = vmatprep.mubr.msk.bf16.mxu0 %vm1903_vm0, %v1902_v0 }
 0x56f   :  { %1687 = vmatprep.subr.bf16.mxu0 %v1902_v0 }
 0x575   :  { %1678 = vmatmul.mubr.msk.bf16.vlgmr.msra.gmra.mxu0 %vm167_vm2, %v384_v2 }
 0x576   :  { %1688 = vmatpush3.bf16.xpose.msra.mxu0 %v760_v51  ;;  %1689 = vmatprep.mubr.msk.bf16.mxu0 %vm1903_vm0, %v1902_v0 }
 0x577   :  { %1699 = vmatprep.subr.bf16.mxu0 %v1902_v0 }
 0x57d   :  { %1690 = vmatmul.mubr.msk.bf16.vlgmr.msra.gmra.mxu0 %vm167_vm2, %v753_v52 }
 0x57e   :  { %1701 = vmatprep.mubr.msk.bf16.mxu0 %vm1903_vm0, %v1902_v0 }
 0x629   :  { %v552_v55 = vpop.f32.mrf.mxu1 }
 0x62b   :  { %v1661_v56 = vpop.f32.mrf.mxu1 }
 0x62d   :  { %v555_v57 = vpop.f32.mrf.mxu1  ;;  %v600_v58 = vpop.f32.mrf.mxu0 }
 0x62e   :  { %v606_v59 = vpack.c.bf16 %v600_v58, %v552_v55  ;;  %v928_v55 = vsel %vm292_vm3, %v923_v54, 0 }
 0x62f   :  { %v1662_v60 = vpop.f32.mrf.mxu1  ;;  %v1667_v61 = vpop.f32.mrf.mxu0 }
 0x630   :  { %1672 = vmatmul.mubr.msk.bf16.vlgmr.msra.gmra.mxu1 %vm167_vm2, %v606_v59 }
 0x631   :  { %1682 = vmatpush3.bf16.xpose.msra.mxu1 %v710_v62  ;;  %v603_v63 = vpop.f32.mrf.mxu0  ;;  %1683 = vmatprep.mubr.msk.bf16.mxu1 %vm1903_vm0, %v1902_v0 }
 0x632   :  { %1693 = vmatprep.subr.bf16.mxu1 %v1902_v0 }
 0x633   :  { %v1668_v1 = vpop.f32.mrf.mxu0 }
 0x635   :  { %v2142_v2 = vpop.f32.mrf.mxu0 }
 0x637   :  { %v1679_v6 = vpop.f32.mrf.mxu0 }
 0x638   :  { %1684 = vmatmul.mubr.msk.bf16.vlgmr.msra.gmra.mxu1 %vm167_vm2, %v703_v5 }
 0x639   :  { %v2145_v7 = vpop.f32.mrf.mxu0  ;;  %1695 = vmatprep.mubr.msk.bf16.mxu1 %vm1903_vm0, %v1902_v0 }
 0x63b   :  { %v1680_v8 = vpop.f32.mrf.mxu0 }
 0x63d   :  { %v796_v9 = vpop.f32.mrf.mxu0 }
 0x63e   :  { %v797_v11 = vadd.f32 %v2053_v23, %v796_v9 }
 0x63f   :  { %v1691_v12 = vpop.f32.mrf.mxu0 }
 0x640   :  { %v805_v13 = vsel %vm167_vm2, %v797_v11, -inf }
 0x641   :  { %806 = vmax.xlane.f32.xlu1 %v805_v13  ;;  %v799_v15 = vpop.f32.mrf.mxu0 }
 0x643   :  { %v1692_v16 = vpop.f32.mrf.mxu0 }
 0x652   :  { %826 = vrot.lane.b32.xlu1 %v2032_v10, %s1910_s26 }
 0x656   :  { %975 = vrot.lane.b32.xlu1 %v2032_v10, %s1911_s1 }
 0x65a   :  { %1025 = vrot.lane.b32.xlu1 %v2035_v14, %s1911_s1 }
 0x65e   :  { %1023 = vrot.lane.b32.xlu1 %v2035_v14, %s1912_s27 }
 0x6ca   :  { %v807_v17 = vpop.xlane.xlu1 %806 }
 0x6cb   :  { %v809_v21 = vsub.f32 %v797_v11, %v807_v17 }
 0x6cd   :  { %v812_v22 = vmul.f32 1.442695, %v809_v21 }
 0x6ce   :  { %v827_v18 = vpop.permute.xlu1 %826 }
 0x6cf   :  { %v832_v20 = vsel %vm292_vm3, %v827_v18, 0  ;;  %1806 = vpow2.f32 %v812_v22 }
 0x6d0   :  { %1694 = vmatpush3.bf16.msra.mxu1 %v832_v20 }
 0x6d1   :  { %1705 = vmatprep.subr.bf16.mxu1 %v1902_v0 }
 0x6d2   :  { %v976_v47 = vpop.permute.xlu1 %975 }
 0x6d3   :  { %v981_v49 = vsel %vm167_vm2, %v976_v47, 0 }
 0x6d6   :  { %v1026_v61 = vpop.permute.xlu1 %1025 }
 0x6d7   :  { %v1031_v11 = vsel %vm167_vm2, %v1026_v61, 0  ;;  %v1547_v61 = vld [vmem:[%s2285_s5] ss:$0 sm:$0xff] }
 0x6da   :  { %v1024_v15 = vpop.permute.xlu1 %1023 }
 0x6dc   :  { %v1807_v32 = vpop.eup %1806 }
 0x6dd   :  { %v817_v35 = vsel %vm167_vm2, %v1807_v32, 0.0 }
 0x6f0   :  { %v2159_v24 = vpop.f32.mrf.mxu1 }
 0x6f1   :  { %v696_v22 = vadd.f32 %v2142_v2, %v2159_v24 }
 0x6f2   :  { %v1673_v25 = vpop.f32.mrf.mxu1 }
 0x6f4   :  { %v2161_v26 = vpop.f32.mrf.mxu1 }
 0x6f6   :  { %v1674_v27 = vpop.f32.mrf.mxu1 }
 0x6f8   :  { %v746_v28 = vpop.f32.mrf.mxu1 }
 0x6f9   :  { %v747_v29 = vadd.f32 %v2050_v19, %v746_v28 }
 0x6fa   :  { %v1685_v30 = vpop.f32.mrf.mxu1 }
 0x6fb   :  { %v802_v31 = vsel %vm167_vm2, %v747_v29, -inf }
 0x6fc   :  { %803 = vmax.xlane.f32.xlu0 %v802_v31  ;;  %v749_v33 = vpop.f32.mrf.mxu1 }
 0x6fe   :  { %v1686_v34 = vpop.f32.mrf.mxu1 }
 0x700   :  { %818 = vadd.xlane.f32.xlu0 %v817_v35 }
 0x785   :  { %v804_v36 = vpop.xlane.xlu0 %803 }
 0x786   :  { %v808_v37 = vsub.f32 %v747_v29, %v804_v36  ;;  %v699_v29 = vadd.f32 %v2145_v7, %v2161_v26 }
 0x788   :  { %v810_v38 = vmul.f32 1.442695, %v808_v37 }
 0x789   :  { %v819_v41 = vpop.xlane.xlu0 %818 }
 0x78a   :  { %1808 = vpow2.f32 %v810_v38 }
 0x78b   :  { %1810 = vrcp.f32 %v819_v41 }
 0x797   :  { %v1809_v39 = vpop.eup %1808 }
 0x798   :  { %v814_v40 = vsel %vm167_vm2, %v1809_v39, 0.0  ;;  %v1811_v42 = vpop.eup %1810 }
 0x799   :  { %815 = vadd.xlane.f32.xlu0 %v814_v40  ;;  %v823_v44 = vmul.f32 %v1811_v42, %v1807_v32 }
 0x79b   :  { %v825_v48 = vpack.c.bf16 %v823_v44, %v823_v44  ;;  %v1194_v44 = vld [vmem:[%s2284_s4 + $0xc] sm:$0xf] }
 0x7af   :  { %874 = vrot.lane.b32.xlu0 %v2035_v14, %s1910_s26 }
 0x7b3   :  { %973 = vrot.lane.b32.xlu0 %v2032_v10, %s1912_s27  ;;  %s1914_s27 = smov [#allocation7]  }
 0x7b4   :  { %s1508_s6 = sshll.u32 %s1914_s27, 4  ;;  %s1509_s6 = int_to_ptr.vmem [resolvable:$true] %s1508_s6 }
 0x7b5   :  { %s1870_s28 = scalar_lea.vmem %s1509_s6, 256  ;;  %p1875_p11 = scmp.lt.s32.totalorder %s1509_s6, %s1509_s6 }
 0x7b6   :  { %p1871_p10 = scmp.ne.s32.totalorder %s1509_s6, %s1870_s28  ;;  %p1876_p12 = scmp.lt.s32.totalorder %s1870_s28, %s1870_s28 }
 0x7b8   :  { %p1877_p13 = por %p1876_p12, %p1875_p11 }
 0x7ba   :  { %p1878_p0 = pnand %p1877_p13, %p1871_p10 }
 0x822   :  { %v816_v43 = vpop.xlane.xlu0 %815 }
 0x823   :  { %1812 = vrcp.f32 %v816_v43 }
 0x826   :  { %v875_v45 = vpop.permute.xlu0 %874 }
 0x827   :  { %v880_v46 = vsel %vm292_vm3, %v875_v45, 0  ;;  %v1199_v45 = vsel %vm292_vm3, %v1194_v44, 0  ;;  %v1550_v44 = vld [vmem:[%s2287_s7] ss:$0 sm:$0xff] }
 0x828   :  { %1700 = vmatpush3.bf16.msra.mxu0 %v880_v46 }
 0x829   :  { %1711 = vmatprep.subr.bf16.mxu0 %v1902_v0 }
 0x82a   :  { %v974_v52 = vpop.permute.xlu0 %973 }
 0x82b   :  { %1702 = vmatmul.mubr.msk.bf16.vlgmr.msra.gmra.mxu0 %vm167_vm2, %v825_v48 }
 0x82c   :  { %1712 = vmatpush3.bf16.xpose.msra.mxu0 %v981_v49  ;;  %1713 = vmatprep.mubr.msk.bf16.mxu0 %vm1903_vm0, %v1902_v0 }
 0x82d   :  { %1723 = vmatprep.subr.bf16.mxu0 %v1902_v0 }
 0x830   :  { %v1813_v50 = vpop.eup %1812 }
 0x831   :  { %v822_v51 = vmul.f32 %v1813_v50, %v1809_v39 }
 0x833   :  { %1714 = vmatmul.mubr.msk.bf16.vlgmr.msra.gmra.mxu0 %vm167_vm2, %v974_v52  ;;  %v824_v53 = vpack.c.bf16 %v822_v51, %v822_v51 }
 0x834   :  { %1725 = vmatprep.mubr.msk.bf16.mxu0 %vm1903_vm0, %v1902_v0 }
 0x835   :  { %1696 = vmatmul.mubr.msk.bf16.vlgmr.msra.gmra.mxu1 %vm167_vm2, %v824_v53 }
 0x836   :  { %1707 = vmatprep.mubr.msk.bf16.mxu1 %vm1903_vm0, %v1902_v0  ;;  %1706 = vmatpush3.bf16.msra.mxu1 %v928_v55 }
 0x837   :  { %1717 = vmatprep.subr.bf16.mxu1 %v1902_v0 }
 0x8eb   :  { %v916_v56 = vpop.f32.mrf.mxu0 }
 0x8ed   :  { %v1703_v57 = vpop.f32.mrf.mxu0 }
 0x8ef   :  { %v919_v58 = vpop.f32.mrf.mxu0 }
 0x8f1   :  { %v1704_v59 = vpop.f32.mrf.mxu0 }
 0x8f3   :  { %v1017_v60 = vpop.f32.mrf.mxu0 }
 0x8f4   :  { %v1018_v62 = vadd.f32 %v2050_v19, %v1017_v60 }
 0x8f5   :  { %v868_v63 = vpop.f32.mrf.mxu1  ;;  %v1715_v1 = vpop.f32.mrf.mxu0 }
 0x8f6   :  { %v922_v5 = vpack.c.bf16 %v916_v56, %v868_v63  ;;  %v1073_v6 = vsel %vm167_vm2, %v1018_v62, -inf }
 0x8f7   :  { %1074 = vmax.xlane.f32.xlu0 %v1073_v6  ;;  %v1697_v8 = vpop.f32.mrf.mxu1  ;;  %v1020_v9 = vpop.f32.mrf.mxu0 }
 0x8f8   :  { %1708 = vmatmul.mubr.msk.bf16.vlgmr.msra.gmra.mxu1 %vm167_vm2, %v922_v5 }
 0x8f9   :  { %1718 = vmatpush3.bf16.xpose.msra.mxu1 %v1031_v11  ;;  %v871_v12 = vpop.f32.mrf.mxu1  ;;  %v1716_v13 = vpop.f32.mrf.mxu0  ;;  %1719 = vmatprep.mubr.msk.bf16.mxu1 %vm1903_vm0, %v1902_v0 }
 0x8fa   :  { %1729 = vmatprep.subr.bf16.mxu1 %v1902_v0 }
 0x8fb   :  { %v1698_v19 = vpop.f32.mrf.mxu1 }
 0x900   :  { %1720 = vmatmul.mubr.msk.bf16.vlgmr.msra.gmra.mxu1 %vm167_vm2, %v1024_v15 }
 0x901   :  { %1731 = vmatprep.mubr.msk.bf16.mxu1 %vm1903_vm0, %v1902_v0 }
 0x980   :  { %v1075_v16 = vpop.xlane.xlu0 %1074 }
 0x981   :  { %v1079_v17 = vsub.f32 %v1018_v62, %v1075_v16 }
 0x983   :  { %v1081_v18 = vmul.f32 1.442695, %v1079_v17 }
 0x985   :  { %1814 = vpow2.f32 %v1081_v18 }
 0x992   :  { %v1815_v20 = vpop.eup %1814 }
 0x993   :  { %v1085_v21 = vsel %vm167_vm2, %v1815_v20, 0.0 }
 0x994   :  { %1086 = vadd.xlane.f32.xlu0 %v1085_v21 }
 0x9b8   :  { %v964_v25 = vpop.f32.mrf.mxu1 }
 0x9b9   :  { %v971_v27 = vadd.f32 %v964_v25, %v696_v22 }
 0x9ba   :  { %v1709_v28 = vpop.f32.mrf.mxu1 }
 0x9bb   :  { %v1784_v28 = vld [vmem:[#allocation5 + $0x8] sm:$0xff]  }
 0x9bc   :  { %v967_v30 = vpop.f32.mrf.mxu1 }
 0x9bd   :  { %v972_v31 = vadd.f32 %v967_v30, %v699_v29  ;;  %v1786_v29 = vld [vmem:[%s2288_s8 + $0x18] sm:$0xff]  }
 0x9be   :  { %v1710_v32 = vpop.f32.mrf.mxu1 }
 0x9c0   :  { %v1067_v33 = vpop.f32.mrf.mxu1 }
 0x9c1   :  { %v1068_v34 = vadd.f32 %v2053_v23, %v1067_v33 }
 0x9c2   :  { %v1721_v35 = vpop.f32.mrf.mxu1 }
 0x9c3   :  { %v1076_v36 = vsel %vm167_vm2, %v1068_v34, -inf }
 0x9c4   :  { %1077 = vmax.xlane.f32.xlu1 %v1076_v36  ;;  %v1070_v37 = vpop.f32.mrf.mxu1 }
 0x9c6   :  { %v1722_v38 = vpop.f32.mrf.mxu1 }
 0x9c7   :  { %v1548_v38 = vld [vmem:[%s2290_s10] ss:$0 sm:$0xff] }
 0x9d5   :  { %1097 = vrot.lane.b32.xlu1 %v2032_v10, %s1913_s29 }
 0xa1d   :  { %v1087_v2 = vpop.xlane.xlu0 %1086 }
 0xa1e   :  { %1816 = vrcp.f32 %v1087_v2 }
 0xa2b   :  { %v1817_v24 = vpop.eup %1816 }
 0xa2c   :  { %v1093_v40 = vmul.f32 %v1817_v24, %v1815_v20 }
 0xa2e   :  { %v1095_v42 = vpack.c.bf16 %v1093_v40, %v1093_v40 }
 0xa4d   :  { %v1078_v39 = vpop.xlane.xlu1 %1077 }
 0xa4e   :  { %v1080_v7 = vsub.f32 %v1068_v34, %v1078_v39 }
 0xa50   :  { %v1083_v26 = vmul.f32 1.442695, %v1080_v7  ;;  %v1549_v7 = vld [vmem:[%s2291_s11] ss:$0 sm:$0xff] }
 0xa51   :  { %v1098_v41 = vpop.permute.xlu1 %1097 }
 0xa52   :  { %1818 = vpow2.f32 %v1083_v26  ;;  %v1103_v23 = vsel %vm292_vm3, %v1098_v41, 0 }
 0xa53   :  { %1724 = vmatpush3.bf16.msra.mxu0 %v1103_v23 }
 0xa54   :  { %1735 = vmatprep.subr.bf16.mxu0 %v1902_v0 }
 0xa56   :  { %1726 = vmatmul.mubr.msk.bf16.vlgmr.msra.gmra.mxu0 %vm167_vm2, %v1095_v42  ;;  %v1787_v42 = vld [vmem:[%s2288_s8 + $0x10] sm:$0xff]  }
 0xa57   :  { %1737 = vmatprep.mubr.msk.bf16.mxu0 %vm1903_vm0, %v1902_v0  ;;  %1736 = vmatpush3.bf16.msra.mxu0 %v1199_v45 }
 0xa58   :  { %1749 = vmatprep.subr.bf16.mxu0 %v1902_v0 }
 0xa5f   :  { %v1819_v10 = vpop.eup %1818 }
 0xa60   :  { %v1088_v43 = vsel %vm167_vm2, %v1819_v10, 0.0 }
 0xa61   :  { %1089 = vadd.xlane.f32.xlu0 %v1088_v43  ;;  %v1789_v43 = vld [vmem:[%s2288_s8] sm:$0xff]  }
 0xa77   :  { %1145 = vrot.lane.b32.xlu0 %v2035_v14, %s1913_s29 }
 0xaea   :  { %v1090_v46 = vpop.xlane.xlu0 %1089 }
 0xaeb   :  { %1820 = vrcp.f32 %v1090_v46 }
 0xaee   :  { %v1146_v47 = vpop.permute.xlu0 %1145 }
 0xaef   :  { %v1151_v48 = vsel %vm292_vm3, %v1146_v47, 0 }
 0xaf0   :  { %1730 = vmatpush3.bf16.msra.mxu1 %v1151_v48 }
 0xaf1   :  { %1741 = vmatprep.subr.bf16.mxu1 %v1902_v0 }
 0xaf8   :  { %v1821_v49 = vpop.eup %1820 }
 0xaf9   :  { %v1094_v50 = vmul.f32 %v1821_v49, %v1819_v10  ;;  %v1788_v10 = vld [vmem:[%s2288_s8 + $0x8] sm:$0xff]  }
 0xafb   :  { %v1096_v14 = vpack.c.bf16 %v1094_v50, %v1094_v50 }
 0xafd   :  { %1732 = vmatmul.mubr.msk.bf16.vlgmr.msra.gmra.mxu1 %vm167_vm2, %v1096_v14 }
 0xafe   :  { %1745 = vmatprep.mubr.msk.bf16.mxu1 %vm1903_vm0, %v1902_v0  ;;  %1742 = vmatpush3.bf16.msra.mxu1 %v1784_v28 }
 0xaff   :  { %1743 = vmatprep.subr.bf16.mxu1 %v1902_v0 }
 0xb16   :  { %v1139_v51 = vpop.f32.mrf.mxu0 }
 0xb18   :  { %v1727_v52 = vpop.f32.mrf.mxu0 }
 0xb1a   :  { %v1142_v53 = vpop.f32.mrf.mxu0 }
 0xb1c   :  { %v1728_v54 = vpop.f32.mrf.mxu0 }
 0xbbd   :  { %v1187_v55 = vpop.f32.mrf.mxu1 }
 0xbbe   :  { %v1193_v56 = vpack.c.bf16 %v1187_v55, %v1139_v51 }
 0xbbf   :  { %v1733_v57 = vpop.f32.mrf.mxu1 }
 0xbc0   :  { %1738 = vmatmul.mubr.msk.bf16.vlgmr.msra.gmra.mxu0 %vm167_vm2, %v1193_v56 }
 0xbc1   :  { %v1190_v58 = vpop.f32.mrf.mxu1  ;;  %1757 = vmatprep.mubr.msk.bf16.mxu0 %vm1903_vm0, %v1902_v0  ;;  %1750 = vmatpush3.bf16.msra.mxu0 %v1786_v29 }
 0xbc2   :  { %1751 = vmatprep.subr.bf16.mxu0 %v1902_v0 }
 0xbc3   :  { %v1734_v59 = vpop.f32.mrf.mxu1 }
 0xbc5   :  { %1752 = vmatpush3.bf16.msra.mxu0 %v1787_v42 }
 0xbc6   :  { %1753 = vmatprep.subr.bf16.mxu0 %v1902_v0 }
 0xbc9   :  { %1754 = vmatpush3.bf16.msra.mxu0 %v1788_v10 }
 0xbca   :  { %1755 = vmatprep.subr.bf16.mxu0 %v1902_v0  ;;  %v1554_v0 = vld [vmem:[%s2289_s9] ss:$0 sm:$0xff] }
 0xbcd   :  { %1756 = vmatpush3.bf16.msra.mxu0 %v1789_v43 }
 0xc80   :  { %v1235_v60 = vpop.f32.mrf.mxu0 }
 0xc81   :  { %v1242_v62 = vadd.f32 %v1235_v60, %v971_v27 }
 0xc82   :  { %v1739_v63 = vpop.f32.mrf.mxu0 }
 0xc83   :  { %v1251_v1 = vadd.f32 %v1547_v61, %v1242_v62 }
 0xc84   :  { %v1238_v5 = vpop.f32.mrf.mxu0 }
 0xc85   :  { %v1243_v6 = vadd.f32 %v1238_v5, %v972_v31  ;;  %v1253_v8 = vadd.f32 %v1251_v1, %v2015_v3 }
 0xc86   :  { %v1740_v9 = vpop.f32.mrf.mxu0 }
 0xc87   :  { %v1252_v11 = vadd.f32 %v1547_v61, %v1243_v6  ;;  %v1255_v12 = vsel %vm103_vm1, %v1253_v8, 0.0 }
 0xc88   :  { %1256 = vadd.xlane.f32.xlu1 %v1255_v12 }
 0xc89   :  { %v1254_v13 = vadd.f32 %v1252_v11, %v2020_v4  ;;  %v1785_v4 = vld [vmem:[#allocation5] sm:$0xff]  }
 0xc8a   :  { %1744 = vmatpush3.bf16.msra.mxu1 %v1785_v4 }
 0xc8b   :  { %v1258_v19 = vsel %vm103_vm1, %v1254_v13, 0.0 }
 0xc8c   :  { %1259 = vadd.xlane.f32.xlu0 %v1258_v19 }
 0xd11   :  { %v1257_v15 = vpop.xlane.xlu1 %1256 }
 0xd12   :  { %v1262_v16 = vmul.f32 0.03125, %v1257_v15 }
 0xd14   :  { %v1264_v17 = vsub.f32 %v1253_v8, %v1262_v16 }
 0xd15   :  { %v1260_v18 = vpop.xlane.xlu0 %1259 }
 0xd16   :  { %v1263_v20 = vmul.f32 0.03125, %v1260_v18  ;;  %v1266_v21 = vmul.f32 %v1264_v17, %v1264_v17 }
 0xd18   :  { %v1265_v22 = vsub.f32 %v1254_v13, %v1263_v20  ;;  %v1268_v25 = vsel %vm103_vm1, %v1266_v21, 0.0 }
 0xd19   :  { %1269 = vadd.xlane.f32.xlu1 %v1268_v25  ;;  %v1560_v25 = vld [vmem:[%s2292_s12] ss:$0 sm:$0xff] }
 0xd1a   :  { %v1267_v3 = vmul.f32 %v1265_v22, %v1265_v22 }
 0xd1c   :  { %v1271_v27 = vsel %vm103_vm1, %v1267_v3, 0.0 }
 0xd1d   :  { %1272 = vadd.xlane.f32.xlu0 %v1271_v27  ;;  %v1561_v27 = vld [vmem:[%s2293_s13] ss:$0 sm:$0xff] }
 0xda2   :  { %v1270_v30 = vpop.xlane.xlu1 %1269 }
 0xda3   :  { %v1274_v31 = vmul.f32 0.03125, %v1270_v30 }
 0xda5   :  { %v1276_v32 = vadd.f32 1e-05, %v1274_v31 }
 0xda6   :  { %v1273_v33 = vpop.xlane.xlu0 %1272 }
 0xda7   :  { %1822 = vrsqrt.f32 %v1276_v32  ;;  %v1275_v34 = vmul.f32 0.03125, %v1273_v33 }
 0xda9   :  { %v1277_v35 = vadd.f32 1e-05, %v1275_v34 }
 0xdab   :  { %1824 = vrsqrt.f32 %v1277_v35 }
 0xdb4   :  { %v1823_v36 = vpop.eup %1822 }
 0xdb5   :  { %v1280_v37 = vmul.f32 %v1823_v36, %v1264_v17 }
 0xdb7   :  { %v1289_v39 = vmul.f32 %v1548_v38, %v1280_v37 }
 0xdb8   :  { %v1825_v2 = vpop.eup %1824 }
 0xdb9   :  { %v1281_v24 = vmul.f32 %v1825_v2, %v1265_v22  ;;  %v1298_v40 = vadd.f32 %v1549_v7, %v1289_v39 }
 0xdbb   :  { %v1290_v26 = vmul.f32 %v1548_v38, %v1281_v24 }
 0xdbd   :  { %v1299_v41 = vadd.f32 %v1549_v7, %v1290_v26 }
 0xdbf   :  { %v1300_v23 = vpack.c.bf16 %v1299_v41, %v1298_v40 }
 0xdc1   :  { %1746 = vmatmul.mubr.msk.bf16.vlgmr.msra.gmra.mxu1 %vm103_vm1, %v1300_v23 }
 0xe81   :  { %v1361_v45 = vpop.f32.mrf.mxu1 }
 0xe82   :  { %v1362_v47 = vadd.f32 %v1550_v44, %v1361_v45 }
 0xe83   :  { %v1747_v46 = vpop.f32.mrf.mxu1 }
 0xe84   :  { %v1368_v14 = vmax.f32 %v1362_v47, 0.0 }
 0xe85   :  { %v1364_v48 = vpop.f32.mrf.mxu1 }
 0xe86   :  { %v1365_v49 = vadd.f32 %v1550_v44, %v1364_v48 }
 0xe87   :  { %v1748_v50 = vpop.f32.mrf.mxu1 }
 0xe88   :  { %v1369_v51 = vmax.f32 %v1365_v49, 0.0 }
 0xe8a   :  { %v1370_v52 = vpack.c.bf16 %v1369_v51, %v1368_v14 }
 0xe8c   :  { %1758 = vmatmul.mubr.msk.bf16.vlgmr.msra.gmra.mxu0 %vm1410_vm4, %v1370_v52 }
 0xf4c   :  { %v1448_v53 = vpop.f32.mrf.mxu0 }
 0xf4d   :  { %v1449_v54 = vadd.f32 %v1554_v0, %v1448_v53 }
 0xf4e   :  { %v1759_v55 = vpop.f32.mrf.mxu0 }
 0xf4f   :  { %v1455_v56 = vadd.f32 %v1449_v54, %v1298_v40 }
 0xf50   :  { %v1451_v57 = vpop.f32.mrf.mxu0 }
 0xf51   :  { %v1452_v58 = vadd.f32 %v1554_v0, %v1451_v57  ;;  %v1457_v59 = vsel %vm103_vm1, %v1455_v56, 0.0 }
 0xf52   :  { %1458 = vadd.xlane.f32.xlu1 %v1457_v59  ;;  %v1760_v60 = vpop.f32.mrf.mxu0 }
 0xf53   :  { %v1456_v61 = vadd.f32 %v1452_v58, %v1299_v41 }
 0xf55   :  { %v1460_v62 = vsel %vm103_vm1, %v1456_v61, 0.0 }
 0xf56   :  { %1461 = vadd.xlane.f32.xlu0 %v1460_v62 }
 0xfdb   :  { %v1459_v63 = vpop.xlane.xlu1 %1458 }
 0xfdc   :  { %v1463_v1 = vmul.f32 0.03125, %v1459_v63 }
 0xfde   :  { %v1465_v5 = vsub.f32 %v1455_v56, %v1463_v1 }
 0xfdf   :  { %v1462_v6 = vpop.xlane.xlu0 %1461 }
 0xfe0   :  { %v1464_v8 = vmul.f32 0.03125, %v1462_v6  ;;  %v1467_v9 = vmul.f32 %v1465_v5, %v1465_v5 }
 0xfe2   :  { %v1466_v11 = vsub.f32 %v1456_v61, %v1464_v8  ;;  %v1469_v12 = vsel %vm103_vm1, %v1467_v9, 0.0 }
 0xfe3   :  { %1470 = vadd.xlane.f32.xlu1 %v1469_v12 }
 0xfe4   :  { %v1468_v13 = vmul.f32 %v1466_v11, %v1466_v11 }
 0xfe6   :  { %v1472_v19 = vsel %vm103_vm1, %v1468_v13, 0.0 }
 0xfe7   :  { %1473 = vadd.xlane.f32.xlu0 %v1472_v19 }
0x106c   :  { %v1471_v15 = vpop.xlane.xlu1 %1470 }
0x106d   :  { %v1475_v16 = vmul.f32 0.03125, %v1471_v15 }
0x106f   :  { %v1477_v17 = vadd.f32 1e-05, %v1475_v16 }
0x1070   :  { %v1474_v18 = vpop.xlane.xlu0 %1473 }
0x1071   :  { %1826 = vrsqrt.f32 %v1477_v17  ;;  %v1476_v20 = vmul.f32 0.03125, %v1474_v18 }
0x1073   :  { %v1478_v21 = vadd.f32 1e-05, %v1476_v20 }
0x1075   :  { %1828 = vrsqrt.f32 %v1478_v21 }
0x107e   :  { %v1827_v22 = vpop.eup %1826 }
0x107f   :  { %v1481_v3 = vmul.f32 %v1827_v22, %v1465_v5 }
0x1081   :  { %v1490_v28 = vmul.f32 %v1560_v25, %v1481_v3 }
0x1082   :  { %v1829_v4 = vpop.eup %1828 }
0x1083   :  { %v1482_v29 = vmul.f32 %v1829_v4, %v1466_v11  ;;  %v1499_v30 = vadd.f32 %v1561_v27, %v1490_v28 }
0x1085   :  { %v1491_v31 = vmul.f32 %v1560_v25, %v1482_v29  ;;  %1501 = vst.msk [vmem:[#allocation7] sm:$0xff] %vm103_vm1, %v1499_v30 }
0x1087   :  { %v1500_v32 = vadd.f32 %v1561_v27, %v1491_v31 }
0x1089   :  { %1502 = vst.msk [vmem:[#allocation7 + $0x8] sm:$0xff] %vm103_vm1, %v1500_v32 }
0x108a   :  { %1881 = shalt.err (!%p1878_p0)
}
0x108b   :  { %s1915_s12 = smov 128   ;;  %s1916_s13 = smov 8  }
0x108c   :  { %1514 = dma.vmem_to_hbm [thread:$0]  %s1509_s6, 256, %s2294_s14, [#allocation4], %s1915_s12, %s1915_s12, %s1916_s13  }
0x108d   :  { %1894 = dma.done.wait [#allocation4], 256  }
0x108e   :  { %1895 = vsyncadd [#allocation4], 4294967040 }
0x108f   :  { %1518 = vsyncpa [#allocation3], 1 }
0x1090   :  { %1519 = vsyncpa [#allocation6], 1 }
0x1091   :  { %1520 = vsyncpa [#allocation4], 1 }

</bundles_post_ra>
